<compile_context>
chip_gen: v5e
topology: v5e:2x2
jax: 0.10.0
libtpu: 0.0.40
codegen_flags: <defaults>
</compile_context>

<pallas_src>
import jax
import jax.numpy as jnp
from jax.experimental import pallas as pl
from jax.experimental.pallas import tpu as pltpu

EPS = 1e-5


# --------------------------------------------------------------------------- kernel
def make_block2_kernel(K, Le, Lo):
    """Fused Block2 kernel for stride-2, odd-K conv + 1x1 identity conv.

    Le = L_out = ceil(L/2) (number of even input columns),
    Lo = floor(L/2)        (number of odd input columns).
    """
    pad = K // 2

    def kernel(xe_ref, xo_ref, w_ref, b_ref, sc_ref, sh_ref, sc2_ref, sh2_ref, o_ref):
        xe = xe_ref[...]                       # (C_in, B*Le)  even input columns
        xo = xo_ref[...]                       # (C_in, B*Le)  odd input columns (padded per sample)
        blen = xe.shape[-1]                    # B*Le (static)

        # Folded BatchNorm + ReLU -- applied BEFORE any conv zero-padding.
        ae = jnp.maximum(xe * sc_ref[...] + sh_ref[...], 0.0)     # main path, even cols
        ao = jnp.maximum(xo * sc_ref[...] + sh_ref[...], 0.0)     # main path, odd cols
        ai = jnp.maximum(xe * sc2_ref[...] + sh2_ref[...], 0.0)   # identity path, even cols

        # Position-within-sample index of every lane (lane p = b*Le + j  ->  j).
        lane_j = jax.lax.broadcasted_iota(jnp.int32, (1, blen), 1) % Le

        taps = []
        for k in range(K):
            d = k - pad            # tap k reads x[:, 2*j + d]
            m = d // 2             # -> even/odd column index (j + m)
            use_odd = (d % 2) != 0
            src = ao if use_odd else ae
            limit = Lo if use_odd else Le            # number of valid columns per sample
            if m != 0:
                # global lane roll; per-sample boundary columns are masked below
                src = pltpu.roll(src, shift=(-m) % blen, axis=1)
            cond = None
            if m < 0:
                cond = lane_j + m >= 0
            if m > 0 or limit < Le:
                hi = lane_j + m < limit
                cond = hi if cond is None else jnp.logical_and(cond, hi)
            if cond is not None:
                # zero-padding of the *post-activation* signal (PyTorch conv padding)
                src = jnp.where(cond, src, 0.0)
            taps.append(src)
        taps.append(ai)                              # 1x1 identity conv == one extra "tap"

        t = jnp.concatenate(taps, axis=0).astype(w_ref.dtype)     # ((K+1)*C_in, B*Le)
        y = jnp.dot(w_ref[...], t, preferred_element_type=jnp.float32)
        o_ref[...] = y + b_ref[...]

    return kernel


def block2_pallas(xe, xo, w_all, bias, sc, sh, sc2, sh2, *, K, Le, Lo):
    C_in, blen = xe.shape
    C_out, kc = w_all.shape
    # 2-way C_out split marked "parallel": lets v7x's two TensorCores share the work.
    n_blk = 2 if C_out % 32 == 0 else 1
    cb = C_out // n_blk

    kernel = make_block2_kernel(K, Le, Lo)
    rep = lambda shape: pl.BlockSpec(shape, lambda i: (0, 0))   # same (full) block every step

    return pl.pallas_call(
        kernel,
        out_shape=jax.ShapeDtypeStruct((C_out, blen), jnp.float32),
        grid=(n_blk,),
        in_specs=[
            rep((C_in, blen)),                          # xe
            rep((C_in, blen)),                          # xo
            pl.BlockSpec((cb, kc), lambda i: (i, 0)),   # stacked weights (bf16)
            pl.BlockSpec((cb, 1), lambda i: (i, 0)),    # summed bias
            rep((C_in, 1)), rep((C_in, 1)),             # bn  scale / shift
            rep((C_in, 1)), rep((C_in, 1)),             # bn2 scale / shift
        ],
        out_specs=pl.BlockSpec((cb, blen), lambda i: (i, 0)),
        compiler_params=pltpu.CompilerParams(dimension_semantics=("parallel",)),
    )(xe, xo, w_all, bias, sc, sh, sc2, sh2)


# ------------------------------------------------------------------------ JAX glue
def block2_forward(x, params):
    """x: (B, C_in, L)  ->  (B, C_out, L_out)   with L_out = ceil(L/2)."""
    B, C, L = x.shape
    w, b = params["conv_w"], params["conv_b"]          # (C_out, C_in, K), (C_out,)
    w2, b2 = params["conv2_w"], params["conv2_b"]      # (C_out, C_in, 1), (C_out,)
    C_out, C_in, K = w.shape
    assert K % 2 == 1, "fused kernel implemented for odd kernel_size"
    Le = (L + 1) // 2          # = L_out of both stride-2 convs
    Lo = L // 2

    # Even / odd de-interleave (pure permutation -- no K-fold im2col expansion),
    # then merge the batch into the lane axis -> lane-dense (C, B*L_out) layout.
    xe = x[:, :, 0::2]
    xo = x[:, :, 1::2]
    if Lo < Le:
        xo = jnp.pad(xo, ((0, 0), (0, 0), (0, Le - Lo)))   # padded column is always masked
    xe = jnp.transpose(xe, (1, 0, 2)).reshape(C, B * Le)
    xo = jnp.transpose(xo, (1, 0, 2)).reshape(C, B * Le)

    # Stack all conv taps + the 1x1 identity conv into ONE weight matrix.
    # bf16 operands (halves weight DMA, full MXU rate on v6e/v7x), f32 accumulate.
    w_all = jnp.concatenate([w[:, :, k] for k in range(K)] + [w2[:, :, 0]], axis=1)
    w_all = w_all.astype(jnp.bfloat16)                  # (C_out, (K+1)*C_in)
    bias = (b + b2).reshape(C_out, 1).astype(jnp.float32)

    y = block2_pallas(
        xe, xo, w_all, bias,
        params["bn_scale"].reshape(C, 1), params["bn_shift"].reshape(C, 1),
        params["bn2_scale"].reshape(C, 1), params["bn2_shift"].reshape(C, 1),
        K=K, Le=Le, Lo=Lo)
    return jnp.transpose(y.reshape(C_out, B, Le), (1, 0, 2))    # (B, C_out, L_out)


# ------------------------------------------------------------------------ params
def _fold_bn(gamma, beta, mean, var):
    scale = gamma / jnp.sqrt(var + EPS)
    return scale, beta - mean * scale


def init_params(key, inplanes=320, outplanes=320, kernel_size=3):
    ks = list(jax.random.split(key, 12))
    nrm = lambda k, shape, s: s * jax.random.normal(k, shape, jnp.float32)
    g1 = 1.0 + nrm(ks[0], (inplanes,), 0.1)
    be1 = nrm(ks[1], (inplanes,), 0.1)
    m1 = nrm(ks[2], (inplanes,), 0.1)
    v1 = 0.5 + jax.random.uniform(ks[3], (inplanes,), jnp.float32)
    g2 = 1.0 + nrm(ks[4], (inplanes,), 0.1)
    be2 = nrm(ks[5], (inplanes,), 0.1)
    m2 = nrm(ks[6], (inplanes,), 0.1)
    v2 = 0.5 + jax.random.uniform(ks[7], (inplanes,), jnp.float32)
    s1, sh1 = _fold_bn(g1, be1, m1, v1)
    s2, sh2 = _fold_bn(g2, be2, m2, v2)
    return {
        "bn_scale": s1, "bn_shift": sh1,
        "bn2_scale": s2, "bn2_shift": sh2,
        "conv_w": nrm(ks[8], (outplanes, inplanes, kernel_size), 0.02),
        "conv_b": nrm(ks[9], (outplanes,), 0.02),
        "conv2_w": nrm(ks[10], (outplanes, inplanes, 1), 0.02),
        "conv2_b": nrm(ks[11], (outplanes,), 0.02),
    }


# --------------------------------------------------------------- pure-JAX reference
def _ref_conv1d(a, w, b, stride, pad):
    Bn, Cc, L = a.shape
    C_out, _, K = w.shape
    ap = jnp.pad(a, ((0, 0), (0, 0), (pad, pad)))
    L_out = (L + 2 * pad - K) // stride + 1
    cols = jnp.stack(
        [ap[:, :, k:k + stride * (L_out - 1) + 1:stride] for k in range(K)], axis=1)
    return jnp.einsum("ock,bkcl->bol", w, cols) + b[None, :, None]


def block2_reference(x, params):
    s1 = params["bn_scale"][None, :, None]
    h1 = params["bn_shift"][None, :, None]
    s2 = params["bn2_scale"][None, :, None]
    h2 = params["bn2_shift"][None, :, None]
    a = jnp.maximum(x * s1 + h1, 0.0)
    a2 = jnp.maximum(x * s2 + h2, 0.0)
    K = params["conv_w"].shape[-1]
    out = _ref_conv1d(a, params["conv_w"], params["conv_b"], 2, K // 2)
    ident = _ref_conv1d(a2, params["conv2_w"], params["conv2_b"], 2, 0)
    return out + ident


if __name__ == "__main__":
    root = jax.random.PRNGKey(0)
    pkey, xkey = jax.random.split(root)
    # Block2 defaults: inplanes=outplanes=320, kernel_size=3, stride=2.
    # Small batch / sequence: B=4, L=64  ->  B*L_out = 128 (lane-dense output).
    B, C, L, K = 4, 320, 64, 3
    params = init_params(pkey, inplanes=C, outplanes=C, kernel_size=K)
    x = jax.random.normal(xkey, (B, C, L), jnp.float32)

    fwd = jax.jit(block2_forward)
    out = jax.block_until_ready(fwd(x, params))
    assert out.shape == (B, C, (L + 1) // 2) and out.dtype == jnp.float32
    assert bool(jnp.all(jnp.isfinite(out)))

    # Loose-tolerance check vs. f32 reference (kernel uses bf16 MXU operands).
    ref = block2_reference(x, params)
    err = float(jnp.max(jnp.abs(out - ref)))
    assert err < 5e-2, f"max abs error {err}"
    print("KERNEL_OK")
</pallas_src>

<mosaic_0001>
module attributes {stable_mosaic.version = 11 : i64} {
  func.func @kernel(%arg0: i32, %arg1: memref<320x128xf32, #tpu.memory_space<vmem>>, %arg2: memref<320x128xf32, #tpu.memory_space<vmem>>, %arg3: memref<160x1280xbf16, #tpu.memory_space<vmem>>, %arg4: memref<160x1xf32, #tpu.memory_space<vmem>>, %arg5: memref<320x1xf32, #tpu.memory_space<vmem>>, %arg6: memref<320x1xf32, #tpu.memory_space<vmem>>, %arg7: memref<320x1xf32, #tpu.memory_space<vmem>>, %arg8: memref<320x1xf32, #tpu.memory_space<vmem>>, %arg9: memref<160x128xf32, #tpu.memory_space<vmem>>) attributes {dimension_semantics = [#tpu.dimension_semantics<parallel>], iteration_bounds = array<i64: 2>, scalar_prefetch = 0 : i64, scratch_operands = 0 : i64, tpu.core_type = #tpu.core_type<tc>, window_params = [{pipeline_mode = #tpu.pipeline_mode<synchronous>, transform_indices = @transform_0, window_bounds = array<i64: 320, 128>}, {pipeline_mode = #tpu.pipeline_mode<synchronous>, transform_indices = @transform_1, window_bounds = array<i64: 320, 128>}, {transform_indices = @transform_2, window_bounds = array<i64: 160, 1280>}, {transform_indices = @transform_3, window_bounds = array<i64: 160, 1>}, {pipeline_mode = #tpu.pipeline_mode<synchronous>, transform_indices = @transform_4, window_bounds = array<i64: 320, 1>}, {pipeline_mode = #tpu.pipeline_mode<synchronous>, transform_indices = @transform_5, window_bounds = array<i64: 320, 1>}, {pipeline_mode = #tpu.pipeline_mode<synchronous>, transform_indices = @transform_6, window_bounds = array<i64: 320, 1>}, {pipeline_mode = #tpu.pipeline_mode<synchronous>, transform_indices = @transform_7, window_bounds = array<i64: 320, 1>}, {transform_indices = @transform_8, window_bounds = array<i64: 160, 128>}]} {
    %c0 = arith.constant 0 : index
    %c0_0 = arith.constant 0 : index
    %0 = vector.load %arg1[%c0, %c0_0] : memref<320x128xf32, #tpu.memory_space<vmem>>, vector<320x128xf32>
    %c0_1 = arith.constant 0 : index
    %c0_2 = arith.constant 0 : index
    %1 = vector.load %arg2[%c0_1, %c0_2] : memref<320x128xf32, #tpu.memory_space<vmem>>, vector<320x128xf32>
    %c0_3 = arith.constant 0 : index
    %c0_4 = arith.constant 0 : index
    %2 = vector.load %arg5[%c0_3, %c0_4] : memref<320x1xf32, #tpu.memory_space<vmem>>, vector<320x1xf32>
    %3 = vector.broadcast %2 : vector<320x1xf32> to vector<320x128xf32>
    %4 = arith.mulf %0, %3 : vector<320x128xf32>
    %c0_5 = arith.constant 0 : index
    %c0_6 = arith.constant 0 : index
    %5 = vector.load %arg6[%c0_5, %c0_6] : memref<320x1xf32, #tpu.memory_space<vmem>>, vector<320x1xf32>
    %6 = vector.broadcast %5 : vector<320x1xf32> to vector<320x128xf32>
    %7 = arith.addf %4, %6 : vector<320x128xf32>
    %cst = arith.constant 0.000000e+00 : f32
    %8 = vector.broadcast %cst : f32 to vector<320x128xf32>
    %9 = arith.maximumf %7, %8 : vector<320x128xf32>
    %c0_7 = arith.constant 0 : index
    %c0_8 = arith.constant 0 : index
    %10 = vector.load %arg5[%c0_7, %c0_8] : memref<320x1xf32, #tpu.memory_space<vmem>>, vector<320x1xf32>
    %11 = vector.broadcast %10 : vector<320x1xf32> to vector<320x128xf32>
    %12 = arith.mulf %1, %11 : vector<320x128xf32>
    %c0_9 = arith.constant 0 : index
    %c0_10 = arith.constant 0 : index
    %13 = vector.load %arg6[%c0_9, %c0_10] : memref<320x1xf32, #tpu.memory_space<vmem>>, vector<320x1xf32>
    %14 = vector.broadcast %13 : vector<320x1xf32> to vector<320x128xf32>
    %15 = arith.addf %12, %14 : vector<320x128xf32>
    %cst_11 = arith.constant 0.000000e+00 : f32
    %16 = vector.broadcast %cst_11 : f32 to vector<320x128xf32>
    %17 = arith.maximumf %15, %16 : vector<320x128xf32>
    %c0_12 = arith.constant 0 : index
    %c0_13 = arith.constant 0 : index
    %18 = vector.load %arg7[%c0_12, %c0_13] : memref<320x1xf32, #tpu.memory_space<vmem>>, vector<320x1xf32>
    %19 = vector.broadcast %18 : vector<320x1xf32> to vector<320x128xf32>
    %20 = arith.mulf %0, %19 : vector<320x128xf32>
    %c0_14 = arith.constant 0 : index
    %c0_15 = arith.constant 0 : index
    %21 = vector.load %arg8[%c0_14, %c0_15] : memref<320x1xf32, #tpu.memory_space<vmem>>, vector<320x1xf32>
    %22 = vector.broadcast %21 : vector<320x1xf32> to vector<320x128xf32>
    %23 = arith.addf %20, %22 : vector<320x128xf32>
    %cst_16 = arith.constant 0.000000e+00 : f32
    %24 = vector.broadcast %cst_16 : f32 to vector<320x128xf32>
    %25 = arith.maximumf %23, %24 : vector<320x128xf32>
    %26 = tpu.iota {dimensions = array<i32: 1>} : vector<1x128xi32>
    %c32_i32 = arith.constant 32 : i32
    %c0_i32 = arith.constant 0 : i32
    %27 = arith.cmpi eq, %c32_i32, %c0_i32 : i32
    %c1_i32 = arith.constant 1 : i32
    %28 = arith.select %27, %c1_i32, %c32_i32 : i32
    %29 = vector.broadcast %28 : i32 to vector<1x128xi32>
    %30 = arith.remsi %26, %29 : vector<1x128xi32>
    %c0_i32_17 = arith.constant 0 : i32
    %31 = vector.broadcast %c0_i32_17 : i32 to vector<1x128xi32>
    %32 = arith.cmpi ne, %30, %31 : vector<1x128xi32>
    %c0_i32_18 = arith.constant 0 : i32
    %33 = vector.broadcast %c0_i32_18 : i32 to vector<1x128xi32>
    %34 = arith.cmpi slt, %30, %33 : vector<1x128xi32>
    %c0_i32_19 = arith.constant 0 : i32
    %35 = arith.cmpi slt, %28, %c0_i32_19 : i32
    %36 = vector.broadcast %35 : i1 to vector<1x128xi1>
    %37 = vector.broadcast %36 : vector<1x128xi1> to vector<1x128xi1>
    %38 = arith.xori %34, %37 : vector<1x128xi1>
    %39 = arith.andi %38, %32 : vector<1x128xi1>
    %40 = vector.broadcast %28 : i32 to vector<1x128xi32>
    %41 = arith.addi %30, %40 : vector<1x128xi32>
    %42 = arith.select %39, %41, %30 : vector<1x128xi1>, vector<1x128xi32>
    %c1_i32_20 = arith.constant 1 : i32
    %43 = tpu.dynamic_rotate %17 by %c1_i32_20 dim 1 : vector<320x128xf32>, i32 -> vector<320x128xf32>
    %c-1_i32 = arith.constant -1 : i32
    %44 = vector.broadcast %c-1_i32 : i32 to vector<1x128xi32>
    %45 = arith.addi %42, %44 : vector<1x128xi32>
    %c0_i32_21 = arith.constant 0 : i32
    %46 = vector.broadcast %c0_i32_21 : i32 to vector<1x128xi32>
    %47 = arith.cmpi sge, %45, %46 : vector<1x128xi32>
    %cst_22 = arith.constant 0.000000e+00 : f32
    %48 = vector.shape_cast %47 : vector<1x128xi1> to vector<1x128xi1>
    %49 = vector.broadcast %48 : vector<1x128xi1> to vector<320x128xi1>
    %50 = vector.broadcast %cst_22 : f32 to vector<320x128xf32>
    %51 = arith.select %49, %43, %50 : vector<320x128xi1>, vector<320x128xf32>
    %52 = tpu.concatenate %51, %9, %17, %25 in 0 : vector<320x128xf32>, vector<320x128xf32>, vector<320x128xf32>, vector<320x128xf32> -> vector<1280x128xf32>
    %53 = arith.truncf %52 : vector<1280x128xf32> to vector<1280x128xbf16>
    %c0_23 = arith.constant 0 : index
    %c0_24 = arith.constant 0 : index
    %54 = vector.load %arg3[%c0_23, %c0_24] : memref<160x1280xbf16, #tpu.memory_space<vmem>>, vector<160x1280xbf16>
    %cst_25 = arith.constant dense<0.000000e+00> : vector<160x128xf32>
    %55 = tpu.matmul %54, %53, %cst_25 {dimension_numbers = #tpu.dot_dimension_numbers<[1], [0], [0], [1], [0, 0, 1, 1], [], []>} : vector<160x1280xbf16>, vector<1280x128xbf16>, vector<160x128xf32> -> vector<160x128xf32>
    %c0_26 = arith.constant 0 : index
    %c0_27 = arith.constant 0 : index
    %56 = vector.load %arg4[%c0_26, %c0_27] : memref<160x1xf32, #tpu.memory_space<vmem>>, vector<160x1xf32>
    %57 = vector.broadcast %56 : vector<160x1xf32> to vector<160x128xf32>
    %58 = arith.addf %55, %57 : vector<160x128xf32>
    %c0_28 = arith.constant 0 : index
    %c0_29 = arith.constant 0 : index
    %59 = vector.load %arg9[%c0_28, %c0_29] : memref<160x128xf32, #tpu.memory_space<vmem>>, vector<160x128xf32>
    tpu.vector_store %arg9[%c0_28, %c0_29], %58 {strides = array<i32>} : memref<160x128xf32, #tpu.memory_space<vmem>>, vector<160x128xf32>,
    return
  }
  func.func @transform_0(%arg0: i32) -> (i32, i32) {
    %c0_i32 = arith.constant 0 : i32
    %c0_i32_0 = arith.constant 0 : i32
    %c0_i32_1 = arith.constant 0 : i32
    return %c0_i32, %c0_i32_0 : i32, i32
  }
  func.func @transform_1(%arg0: i32) -> (i32, i32) {
    %c0_i32 = arith.constant 0 : i32
    %c0_i32_0 = arith.constant 0 : i32
    %c0_i32_1 = arith.constant 0 : i32
    return %c0_i32, %c0_i32_0 : i32, i32
  }
  func.func @transform_2(%arg0: i32) -> (i32, i32) {
    %c0_i32 = arith.constant 0 : i32
    %c0_i32_0 = arith.constant 0 : i32
    return %arg0, %c0_i32 : i32, i32
  }
  func.func @transform_3(%arg0: i32) -> (i32, i32) {
    %c0_i32 = arith.constant 0 : i32
    %c0_i32_0 = arith.constant 0 : i32
    return %arg0, %c0_i32 : i32, i32
  }
  func.func @transform_4(%arg0: i32) -> (i32, i32) {
    %c0_i32 = arith.constant 0 : i32
    %c0_i32_0 = arith.constant 0 : i32
    %c0_i32_1 = arith.constant 0 : i32
    return %c0_i32, %c0_i32_0 : i32, i32
  }
  func.func @transform_5(%arg0: i32) -> (i32, i32) {
    %c0_i32 = arith.constant 0 : i32
    %c0_i32_0 = arith.constant 0 : i32
    %c0_i32_1 = arith.constant 0 : i32
    return %c0_i32, %c0_i32_0 : i32, i32
  }
  func.func @transform_6(%arg0: i32) -> (i32, i32) {
    %c0_i32 = arith.constant 0 : i32
    %c0_i32_0 = arith.constant 0 : i32
    %c0_i32_1 = arith.constant 0 : i32
    return %c0_i32, %c0_i32_0 : i32, i32
  }
  func.func @transform_7(%arg0: i32) -> (i32, i32) {
    %c0_i32 = arith.constant 0 : i32
    %c0_i32_0 = arith.constant 0 : i32
    %c0_i32_1 = arith.constant 0 : i32
    return %c0_i32, %c0_i32_0 : i32, i32
  }
  func.func @transform_8(%arg0: i32) -> (i32, i32) {
    %c0_i32 = arith.constant 0 : i32
    %c0_i32_0 = arith.constant 0 : i32
    return %arg0, %c0_i32 : i32, i32
  }
}

</mosaic_0001>

<bundles_post_ra>
// kernel: block2_forward.1
= control target key start
LH: loop header
LB: loop body
LE: loop exit
PB: predicated region body
PF: predicated region fallthrough
CT: control target
= control target key end

     0   :  { %s4131_s27 = smov 0   ;;  %s6164_s0 = inlined_call_operand.vmem [shape: f32[320,128], index: 0, kind: input, shape index: {}]   ;;  %s6165_s1 = inlined_call_operand.vmem [shape: f32[320,128], index: 1, kind: input, shape index: {}]   ;;  %s6166_s2 = inlined_call_operand.vmem [shape: bf16[320,1280], index: 2, kind: input, shape index: {}]   ;;  %s6167_s3 = inlined_call_operand.vmem [shape: f32[320,1], index: 3, kind: input, shape index: {}]   ;;  %s6168_s4 = inlined_call_operand.vmem [shape: f32[320,1], index: 4, kind: input, shape index: {}]   ;;  %s6169_s5 = inlined_call_operand.vmem [shape: f32[320,1], index: 5, kind: input, shape index: {}]   ;;  %s6170_s6 = inlined_call_operand.vmem [shape: f32[320,1], index: 6, kind: input, shape index: {}]   ;;  %s6171_s7 = inlined_call_operand.vmem [shape: f32[320,1], index: 7, kind: input, shape index: {}]   ;;  %s6172_s8 = inlined_call_operand.vmem [shape: f32[320,128], index: 8, kind: output, shape index: {}]  }
   0x1 LB: > { %s3350_s28 = sadd.s32 4294967295, %s4082_s27   ;;  %p3354_p0 = scmp.ge.s32.totalorder %s4082_s27, 1  ;;  %s4082_s27 = sphi %s4131_s27, %s18_s27  }
   0x2   : > { %p275_p1 = scmp.lt.s32.totalorder %s4082_s27, 3 }
   0x4   : > { %p276_p2 = pnand %p3354_p0, %p275_p1 }
   0x6   : > { %279 = sbr.rel (%p276_p2) target bundleno = 1007 (0x3ef), region = 52 }
   0xb   : > { %v418_v0 = vld [vmem:[%s6168_s4 + $0x20] sm:$0xff]  ;;  %v416_v1 = vld [vmem:[%s6168_s4 + $0x10] sm:$0xff]  ;;  %v4084_v3 = vmov 0   ;;  %v419_v4 = vld [vmem:[%s6168_s4 + $0x28] sm:$0xff]  ;;  %s4085_s19 = smov 1   ;;  %s315_s26 = smul.u32 20, %s3350_s28 }
   0xc   : > { %v414_v2 = vld [vmem:[%s6168_s4] sm:$0xff]  ;;  %3949 = vset.pattern.permute.xlu2 %v4084_v3  ;;  %3948 = vset.pattern.permute.xlu1 %v4084_v3  ;;  %v417_v5 = vld [vmem:[%s6168_s4 + $0x18] sm:$0xff]  ;;  %v415_v6 = vld [vmem:[%s6168_s4 + $0x8] sm:$0xff] }
   0xd   : > { %3947 = vset.pattern.permute.xlu0 %v4084_v3  ;;  %476 = vperm.xlu2 %3949, %v418_v0   ;;  %v422_v7 = vld [vmem:[%s6168_s4 + $0x40] sm:$0xff]  ;;  %v421_v8 = vld [vmem:[%s6168_s4 + $0x38] sm:$0xff]  ;;  %v420_v9 = vld [vmem:[%s6168_s4 + $0x30] sm:$0xff]  ;;  %p316_p3 = scmp.lt.s32.totalorder %s315_s26, 39 }
   0xe   : > { %466 = vperm.xlu1 %3948, %v416_v1   ;;  %456 = vperm.xlu0 %3947, %v414_v2   ;;  %v425_v10 = vld [vmem:[%s6168_s4 + $0x58] sm:$0xff]  ;;  %v424_v11 = vld [vmem:[%s6168_s4 + $0x50] sm:$0xff]  ;;  %v423_v12 = vld [vmem:[%s6168_s4 + $0x48] sm:$0xff] }
   0xf   : > { %v428_v13 = vld [vmem:[%s6168_s4 + $0x70] sm:$0xff]  ;;  %v427_v14 = vld [vmem:[%s6168_s4 + $0x68] sm:$0xff]  ;;  %v426_v15 = vld [vmem:[%s6168_s4 + $0x60] sm:$0xff]  ;;  %s6366_s26 = smov (!%p316_p3, %s315_s26), 39 }
  0x10   : > { %v431_v16 = vld [vmem:[%s6168_s4 + $0x88] sm:$0xff]  ;;  %v430_v17 = vld [vmem:[%s6168_s4 + $0x80] sm:$0xff]  ;;  %v429_v18 = vld [vmem:[%s6168_s4 + $0x78] sm:$0xff]  ;;  %s3936_s22 = smul.u32 40, %s6366_s26  ;;  %s3356_s9 = sshll.u32 %s6366_s26, 3 }
  0x11   : > { %v434_v19 = vld [vmem:[%s6168_s4 + $0xa0] sm:$0xff]  ;;  %v433_v20 = vld [vmem:[%s6168_s4 + $0x98] sm:$0xff]  ;;  %v432_v21 = vld [vmem:[%s6168_s4 + $0x90] sm:$0xff]  ;;  %s5604_s12 = scalar_lea.vmem %s6167_s3, %s3356_s9  ;;  %s6116_s24 = scalar_lea.vmem %s6172_s8, %s3356_s9 }
  0x12   : > { %v437_v22 = vld [vmem:[%s6168_s4 + $0xb8] sm:$0xff]  ;;  %v436_v23 = vld [vmem:[%s6168_s4 + $0xb0] sm:$0xff]  ;;  %v435_v24 = vld [vmem:[%s6168_s4 + $0xa8] sm:$0xff]  ;;  %s5335_s10 = scalar_lea.vmem %s6166_s2, %s3936_s22 }
  0x13   : > { %v440_v25 = vld [vmem:[%s6168_s4 + $0xd0] sm:$0xff]  ;;  %v439_v26 = vld [vmem:[%s6168_s4 + $0xc8] sm:$0xff]  ;;  %v438_v27 = vld [vmem:[%s6168_s4 + $0xc0] sm:$0xff] }
  0x14   : > { %v443_v28 = vld [vmem:[%s6168_s4 + $0xe8] sm:$0xff]  ;;  %v442_v29 = vld [vmem:[%s6168_s4 + $0xe0] sm:$0xff]  ;;  %v441_v30 = vld [vmem:[%s6168_s4 + $0xd8] sm:$0xff] }
  0x15   : > { %481 = vperm.xlu2 %3949, %v419_v4   ;;  %v446_v31 = vld [vmem:[%s6168_s4 + $0x100] sm:$0xff]  ;;  %v445_v32 = vld [vmem:[%s6168_s4 + $0xf8] sm:$0xff]  ;;  %v444_v33 = vld [vmem:[%s6168_s4 + $0xf0] sm:$0xff] }
  0x16   : > { %471 = vperm.xlu1 %3948, %v417_v5   ;;  %461 = vperm.xlu0 %3947, %v415_v6   ;;  %v449_v34 = vld [vmem:[%s6168_s4 + $0x118] sm:$0xff]  ;;  %v448_v35 = vld [vmem:[%s6168_s4 + $0x110] sm:$0xff]  ;;  %v447_v36 = vld [vmem:[%s6168_s4 + $0x108] sm:$0xff] }
  0x17   : > { %v452_v38 = vld [vmem:[%s6168_s4 + $0x130] sm:$0xff]  ;;  %v451_v39 = vld [vmem:[%s6168_s4 + $0x128] sm:$0xff]  ;;  %v450_v40 = vld [vmem:[%s6168_s4 + $0x120] sm:$0xff] }
  0x18   : > { %v695_v42 = vld [vmem:[%s6169_s5 + $0x8] sm:$0xff]  ;;  %v694_v43 = vld [vmem:[%s6169_s5] sm:$0xff]  ;;  %v453_v44 = vld [vmem:[%s6168_s4 + $0x138] sm:$0xff] }
  0x19   : > { %v698_v46 = vld [vmem:[%s6169_s5 + $0x20] sm:$0xff]  ;;  %v697_v47 = vld [vmem:[%s6169_s5 + $0x18] sm:$0xff]  ;;  %v696_v48 = vld [vmem:[%s6169_s5 + $0x10] sm:$0xff] }
  0x1a   : > { %v701_v52 = vld [vmem:[%s6169_s5 + $0x38] sm:$0xff]  ;;  %v700_v53 = vld [vmem:[%s6169_s5 + $0x30] sm:$0xff]  ;;  %v699_v54 = vld [vmem:[%s6169_s5 + $0x28] sm:$0xff] }
  0x1b   : > { %v704_v58 = vld [vmem:[%s6169_s5 + $0x50] sm:$0xff]  ;;  %v703_v59 = vld [vmem:[%s6169_s5 + $0x48] sm:$0xff]  ;;  %v702_v60 = vld [vmem:[%s6169_s5 + $0x40] sm:$0xff] }
  0x1c   : > { %v707_v0 = vld [vmem:[%s6169_s5 + $0x68] sm:$0xff]  ;;  %v706_v1 = vld [vmem:[%s6169_s5 + $0x60] sm:$0xff]  ;;  %v705_v2 = vld [vmem:[%s6169_s5 + $0x58] sm:$0xff] }
  0x1d   : > { %496 = vperm.xlu2 %3949, %v422_v7   ;;  %v710_v6 = vld [vmem:[%s6169_s5 + $0x80] sm:$0xff]  ;;  %v709_v7 = vld [vmem:[%s6169_s5 + $0x78] sm:$0xff] }
  0x1e   : > { %491 = vperm.xlu1 %3948, %v421_v8   ;;  %486 = vperm.xlu0 %3947, %v420_v9   ;;  %v708_v8 = vld [vmem:[%s6169_s5 + $0x70] sm:$0xff] }
  0x25   : > { %511 = vperm.xlu2 %3949, %v425_v10  }
  0x26   : > { %506 = vperm.xlu1 %3948, %v424_v11   ;;  %501 = vperm.xlu0 %3947, %v423_v12   ;;  %v713_v12 = vld [vmem:[%s6169_s5 + $0x98] sm:$0xff] }
  0x2d   : > { %526 = vperm.xlu2 %3949, %v428_v13   ;;  %v712_v13 = vld [vmem:[%s6169_s5 + $0x90] sm:$0xff] }
  0x2e   : > { %521 = vperm.xlu1 %3948, %v427_v14   ;;  %516 = vperm.xlu0 %3947, %v426_v15   ;;  %v711_v14 = vld [vmem:[%s6169_s5 + $0x88] sm:$0xff] }
  0x35   : > { %541 = vperm.xlu2 %3949, %v431_v16  }
  0x36   : > { %536 = vperm.xlu1 %3948, %v430_v17   ;;  %531 = vperm.xlu0 %3947, %v429_v18   ;;  %v716_v18 = vld [vmem:[%s6169_s5 + $0xb0] sm:$0xff] }
  0x3d   : > { %556 = vperm.xlu2 %3949, %v434_v19   ;;  %v715_v19 = vld [vmem:[%s6169_s5 + $0xa8] sm:$0xff] }
  0x3e   : > { %551 = vperm.xlu1 %3948, %v433_v20   ;;  %546 = vperm.xlu0 %3947, %v432_v21   ;;  %v714_v20 = vld [vmem:[%s6169_s5 + $0xa0] sm:$0xff] }
  0x45   : > { %571 = vperm.xlu2 %3949, %v437_v22  }
  0x46   : > { %566 = vperm.xlu1 %3948, %v436_v23   ;;  %561 = vperm.xlu0 %3947, %v435_v24   ;;  %v719_v24 = vld [vmem:[%s6169_s5 + $0xc8] sm:$0xff] }
  0x4d   : > { %586 = vperm.xlu2 %3949, %v440_v25   ;;  %v718_v25 = vld [vmem:[%s6169_s5 + $0xc0] sm:$0xff] }
  0x4e   : > { %581 = vperm.xlu1 %3948, %v439_v26   ;;  %576 = vperm.xlu0 %3947, %v438_v27   ;;  %v717_v26 = vld [vmem:[%s6169_s5 + $0xb8] sm:$0xff] }
  0x55   : > { %601 = vperm.xlu2 %3949, %v443_v28  }
  0x56   : > { %596 = vperm.xlu1 %3948, %v442_v29   ;;  %591 = vperm.xlu0 %3947, %v441_v30   ;;  %v722_v30 = vld [vmem:[%s6169_s5 + $0xe0] sm:$0xff] }
  0x5d   : > { %616 = vperm.xlu2 %3949, %v446_v31   ;;  %v721_v31 = vld [vmem:[%s6169_s5 + $0xd8] sm:$0xff] }
  0x5e   : > { %611 = vperm.xlu1 %3948, %v445_v32   ;;  %606 = vperm.xlu0 %3947, %v444_v33   ;;  %v720_v32 = vld [vmem:[%s6169_s5 + $0xd0] sm:$0xff] }
  0x65   : > { %631 = vperm.xlu2 %3949, %v449_v34  }
  0x66   : > { %626 = vperm.xlu1 %3948, %v448_v35   ;;  %621 = vperm.xlu0 %3947, %v447_v36   ;;  %v725_v36 = vld [vmem:[%s6169_s5 + $0xf8] sm:$0xff] }
  0x67   : > { %v4247_v37 = vpop.permute.xlu2 %476 }
  0x68   : > { %6220 = vst [vmem:[#allocation2_spill] sm:$0xff] %v4247_v37 }
  0x6d   : > { %646 = vperm.xlu2 %3949, %v452_v38   ;;  %v724_v38 = vld [vmem:[%s6169_s5 + $0xf0] sm:$0xff] }
  0x6e   : > { %641 = vperm.xlu1 %3948, %v451_v39   ;;  %636 = vperm.xlu0 %3947, %v450_v40   ;;  %v723_v39 = vld [vmem:[%s6169_s5 + $0xe8] sm:$0xff] }
  0x6f   : > { %v4258_v41 = vpop.permute.xlu2 %481 }
  0x70   : > { %6221 = vst [vmem:[#allocation3_spill] sm:$0xff] %v4258_v41 }
  0x75   : > { %741 = vperm.xlu2 %3949, %v695_v42  }
  0x76   : > { %736 = vperm.xlu1 %3948, %v694_v43   ;;  %651 = vperm.xlu0 %3947, %v453_v44   ;;  %v728_v44 = vld [vmem:[%s6169_s5 + $0x110] sm:$0xff] }
  0x77   : > { %v4269_v45 = vpop.permute.xlu2 %496 }
  0x78   : > { %6222 = vst [vmem:[#allocation4_spill] sm:$0xff] %v4269_v45 }
  0x7d   : > { %756 = vperm.xlu2 %3949, %v698_v46   ;;  %v727_v46 = vld [vmem:[%s6169_s5 + $0x108] sm:$0xff] }
  0x7e   : > { %751 = vperm.xlu1 %3948, %v697_v47   ;;  %746 = vperm.xlu0 %3947, %v696_v48   ;;  %v726_v47 = vld [vmem:[%s6169_s5 + $0x100] sm:$0xff] }
  0x7f   : > { %v4280_v49 = vpop.permute.xlu2 %511 }
  0x80   : > { %6223 = vst [vmem:[#allocation5_spill] sm:$0xff] %v4280_v49  ;;  %v4282_v50 = vpop.permute.xlu1 %466  ;;  %v4284_v51 = vpop.permute.xlu0 %456 }
  0x81   : > { %6224 = vst [vmem:[#allocation6_spill] sm:$0xff] %v4282_v50 }
  0x82   : > { %6225 = vst [vmem:[#allocation7_spill] sm:$0xff] %v4284_v51 }
  0x85   : > { %771 = vperm.xlu2 %3949, %v701_v52  }
  0x86   : > { %766 = vperm.xlu1 %3948, %v700_v53   ;;  %761 = vperm.xlu0 %3947, %v699_v54   ;;  %v731_v54 = vld [vmem:[%s6169_s5 + $0x128] sm:$0xff] }
  0x87   : > { %v4295_v55 = vpop.permute.xlu2 %526 }
  0x88   : > { %v4297_v56 = vpop.permute.xlu1 %471  ;;  %v4299_v57 = vpop.permute.xlu0 %461 }
  0x89   : > { %6226 = vst [vmem:[#allocation8_spill] sm:$0xff] %v4297_v56 }
  0x8a   : > { %6227 = vst [vmem:[#allocation9_spill] sm:$0xff] %v4299_v57 }
  0x8d   : > { %786 = vperm.xlu2 %3949, %v704_v58   ;;  %v730_v58 = vld [vmem:[%s6169_s5 + $0x120] sm:$0xff] }
  0x8e   : > { %781 = vperm.xlu1 %3948, %v703_v59   ;;  %776 = vperm.xlu0 %3947, %v702_v60   ;;  %v729_v59 = vld [vmem:[%s6169_s5 + $0x118] sm:$0xff] }
  0x8f   : > { %v4310_v61 = vpop.permute.xlu2 %541 }
  0x90   : > { %v4312_v62 = vpop.permute.xlu1 %491  ;;  %v4314_v63 = vpop.permute.xlu0 %486 }
  0x91   : > { %6228 = vst [vmem:[#allocation10_spill] sm:$0xff] %v4312_v62 }
  0x92   : > { %6229 = vst [vmem:[#allocation11_spill] sm:$0xff] %v4314_v63 }
  0x95   : > { %801 = vperm.xlu2 %3949, %v707_v0  }
  0x96   : > { %796 = vperm.xlu1 %3948, %v706_v1   ;;  %791 = vperm.xlu0 %3947, %v705_v2   ;;  %v1134_v2 = vld [vmem:[%s6170_s6] sm:$0xff] }
  0x97   : > { %v4325_v3 = vpop.permute.xlu2 %556 }
  0x98   : > { %v4327_v4 = vpop.permute.xlu1 %506  ;;  %v4329_v5 = vpop.permute.xlu0 %501 }
  0x99   : > { %6230 = vst [vmem:[#allocation12_spill] sm:$0xff] %v4327_v4 }
  0x9a   : > { %6231 = vst [vmem:[#allocation13_spill] sm:$0xff] %v4329_v5 }
  0x9d   : > { %816 = vperm.xlu2 %3949, %v710_v6   ;;  %v733_v6 = vld [vmem:[%s6169_s5 + $0x138] sm:$0xff] }
  0x9e   : > { %811 = vperm.xlu1 %3948, %v709_v7   ;;  %806 = vperm.xlu0 %3947, %v708_v8   ;;  %v732_v7 = vld [vmem:[%s6169_s5 + $0x130] sm:$0xff] }
  0x9f   : > { %v4340_v9 = vpop.permute.xlu2 %571 }
  0xa0   : > { %v4342_v10 = vpop.permute.xlu1 %521  ;;  %v4344_v11 = vpop.permute.xlu0 %516 }
  0xa1   : > { %6232 = vst [vmem:[#allocation14_spill] sm:$0xff] %v4342_v10 }
  0xa2   : > { %6233 = vst [vmem:[#allocation15_spill] sm:$0xff] %v4344_v11 }
  0xa5   : > { %831 = vperm.xlu2 %3949, %v713_v12  }
  0xa6   : > { %826 = vperm.xlu1 %3948, %v712_v13   ;;  %821 = vperm.xlu0 %3947, %v711_v14   ;;  %v375_v14 = vld [vmem:[%s6165_s1 + $0x8] sm:$0xff] }
  0xa7   : > { %v4355_v15 = vpop.permute.xlu2 %586 }
  0xa8   : > { %v4357_v16 = vpop.permute.xlu1 %536  ;;  %v4359_v17 = vpop.permute.xlu0 %531 }
  0xad   : > { %846 = vperm.xlu2 %3949, %v716_v18   ;;  %v1137_v18 = vld [vmem:[%s6170_s6 + $0x18] sm:$0xff] }
  0xae   : > { %841 = vperm.xlu1 %3948, %v715_v19   ;;  %836 = vperm.xlu0 %3947, %v714_v20   ;;  %v1136_v19 = vld [vmem:[%s6170_s6 + $0x10] sm:$0xff]  ;;  %v1135_v20 = vld [vmem:[%s6170_s6 + $0x8] sm:$0xff] }
  0xaf   : > { %v4370_v21 = vpop.permute.xlu2 %601 }
  0xb0   : > { %v4372_v22 = vpop.permute.xlu1 %551  ;;  %v4374_v23 = vpop.permute.xlu0 %546 }
  0xb5   : > { %861 = vperm.xlu2 %3949, %v719_v24   ;;  %v374_v24 = vld [vmem:[%s6165_s1] sm:$0xff] }
  0xb6   : > { %856 = vperm.xlu1 %3948, %v718_v25   ;;  %851 = vperm.xlu0 %3947, %v717_v26   ;;  %v1015_v25 = vmul.f32 %v4299_v57, %v375_v14  ;;  %v1014_v26 = vmul.f32 %v4284_v51, %v374_v24  ;;  %v378_v24 = vld [vmem:[%s6165_s1 + $0x20] sm:$0xff] }
  0xb7   : > { %v4385_v27 = vpop.permute.xlu2 %616 }
  0xb8   : > { %v4387_v28 = vpop.permute.xlu1 %566  ;;  %v4389_v29 = vpop.permute.xlu0 %561 }
  0xbd   : > { %876 = vperm.xlu2 %3949, %v722_v30  }
  0xbe   : > { %871 = vperm.xlu1 %3948, %v721_v31   ;;  %866 = vperm.xlu0 %3947, %v720_v32  }
  0xbf   : > { %v4400_v33 = vpop.permute.xlu2 %631 }
  0xc0   : > { %v4402_v34 = vpop.permute.xlu1 %581  ;;  %v4404_v35 = vpop.permute.xlu0 %576 }
  0xc5   : > { %891 = vperm.xlu2 %3949, %v725_v36  }
  0xc6   : > { %886 = vperm.xlu1 %3948, %v724_v38   ;;  %881 = vperm.xlu0 %3947, %v723_v39   ;;  %v1140_v39 = vld [vmem:[%s6170_s6 + $0x30] sm:$0xff] }
  0xc7   : > { %v4415_v40 = vpop.permute.xlu2 %646 }
  0xc8   : > { %v4417_v42 = vpop.permute.xlu1 %596  ;;  %v4419_v43 = vpop.permute.xlu0 %591 }
  0xcd   : > { %906 = vperm.xlu2 %3949, %v728_v44  }
  0xce   : > { %901 = vperm.xlu1 %3948, %v727_v46   ;;  %896 = vperm.xlu0 %3947, %v726_v47   ;;  %v1139_v47 = vld [vmem:[%s6170_s6 + $0x28] sm:$0xff] }
  0xcf   : > { %v4430_v48 = vpop.permute.xlu2 %741 }
  0xd0   : > { %6234 = vst [vmem:[#allocation16_spill] sm:$0xff] %v4430_v48  ;;  %v4432_v52 = vpop.permute.xlu1 %611  ;;  %v4434_v53 = vpop.permute.xlu0 %606  ;;  %v4484_v30 = vadd.f32 %v1015_v25, %v4430_v48  ;;  %v1143_v25 = vld [vmem:[%s6170_s6 + $0x48] sm:$0xff] }
  0xd2   : > { %v6173_v44 = vmax.f32 %v4484_v30, 0.0 }
  0xd5   : > { %921 = vperm.xlu2 %3949, %v731_v54   ;;  %v1138_v54 = vld [vmem:[%s6170_s6 + $0x20] sm:$0xff] }
  0xd6   : > { %916 = vperm.xlu1 %3948, %v730_v58   ;;  %911 = vperm.xlu0 %3947, %v729_v59   ;;  %v376_v58 = vld [vmem:[%s6165_s1 + $0x10] sm:$0xff]  ;;  %v377_v59 = vld [vmem:[%s6165_s1 + $0x18] sm:$0xff] }
  0xd7   : > { %v4445_v60 = vpop.permute.xlu2 %756 }
  0xd8   : > { %6235 = vst [vmem:[#allocation17_spill] sm:$0xff] %v4445_v60  ;;  %v4447_v0 = vpop.permute.xlu1 %626  ;;  %v4449_v1 = vpop.permute.xlu0 %621 }
  0xdd   : > { %1176 = vperm.xlu2 %3949, %v1134_v2  }
  0xde   : > { %931 = vperm.xlu1 %3948, %v733_v6   ;;  %926 = vperm.xlu0 %3947, %v732_v7   ;;  %v1016_v6 = vmul.f32 %v4282_v50, %v376_v58  ;;  %v1017_v7 = vmul.f32 %v4297_v56, %v377_v59  ;;  %v1142_v58 = vld [vmem:[%s6170_s6 + $0x40] sm:$0xff]  ;;  %v1141_v59 = vld [vmem:[%s6170_s6 + $0x38] sm:$0xff] }
  0xdf   : > { %v4460_v8 = vpop.permute.xlu2 %771 }
  0xe0   : > { %6236 = vst [vmem:[#allocation18_spill] sm:$0xff] %v4460_v8  ;;  %v4462_v12 = vpop.permute.xlu1 %641  ;;  %v4464_v13 = vpop.permute.xlu0 %636 }
  0xe5   : > { %1191 = vperm.xlu2 %3949, %v1137_v18  }
  0xe6   : > { %1186 = vperm.xlu1 %3948, %v1136_v19   ;;  %1181 = vperm.xlu0 %3947, %v1135_v20  }
  0xe7   : > { %v4490_v36 = vpop.permute.xlu2 %786 }
  0xe8   : > { %v4486_v31 = vpop.permute.xlu1 %736  ;;  %v4488_v32 = vpop.permute.xlu0 %651  ;;  %6238 = vst [vmem:[#allocation20_spill] sm:$0xff] %v4490_v36 }
  0xe9   : > { %6237 = vst [vmem:[#allocation19_spill] sm:$0xff] %v4486_v31  ;;  %v4493_v38 = vadd.f32 %v1014_v26, %v4486_v31  ;;  %v381_v26 = vld [vmem:[%s6165_s1 + $0x38] sm:$0xff] }
  0xeb   : > { %v6174_v46 = vmax.f32 %v4493_v38, 0.0 }
  0xed   : > { %1206 = vperm.xlu2 %3949, %v1140_v39   ;;  %v4516_v2 = vpack.c.bf16 %v6173_v44, %v6174_v46  ;;  %v1018_v46 = vmul.f32 %v4247_v37, %v378_v24 }
  0xee   : > { %1201 = vperm.xlu1 %3948, %v1139_v47   ;;  %1196 = vperm.xlu0 %3947, %v1138_v54  }
  0xef   : > { %6239 = vst [vmem:[#allocation21_spill] sm:$0xff] %v4516_v2  ;;  %v4539_v39 = vpop.permute.xlu2 %801  ;;  %v1021_v2 = vmul.f32 %v4312_v62, %v381_v26  ;;  %v4566_v57 = vadd.f32 %v1018_v46, %v4445_v60 }
  0xf0   : > { %v4520_v14 = vpop.permute.xlu1 %751  ;;  %v4522_v18 = vpop.permute.xlu0 %746  ;;  %6243 = vst [vmem:[#allocation25_spill] sm:$0xff] %v4539_v39 }
  0xf1   : > { %6240 = vst [vmem:[#allocation22_spill] sm:$0xff] %v4520_v14  ;;  %v4525_v19 = vadd.f32 %v1017_v7, %v4520_v14  ;;  %v4528_v20 = vadd.f32 %v1016_v6, %v4522_v18  ;;  %v379_v6 = vld [vmem:[%s6165_s1 + $0x28] sm:$0xff]  ;;  %v380_v7 = vld [vmem:[%s6165_s1 + $0x30] sm:$0xff] }
  0xf2   : > { %6241 = vst [vmem:[#allocation23_spill] sm:$0xff] %v4522_v18  ;;  %v1019_v48 = vmul.f32 %v4258_v41, %v379_v6  ;;  %v1020_v31 = vmul.f32 %v4314_v63, %v380_v7  ;;  %v383_v6 = vld [vmem:[%s6165_s1 + $0x48] sm:$0xff]  ;;  %v6187_v7 = vmax.f32 %v4566_v57, 0.0 }
  0xf3   : > { %6242 = vst [vmem:[#allocation24_spill] sm:$0xff] %v4525_v19  ;;  %v6179_v47 = vmax.f32 %v4525_v19, 0.0  ;;  %v6180_v54 = vmax.f32 %v4528_v20, 0.0  ;;  %v1023_v50 = vmul.f32 %v4329_v5, %v383_v6 }
  0xf5   : > { %1221 = vperm.xlu2 %3949, %v1143_v25   ;;  %v4559_v44 = vpack.c.bf16 %v6179_v47, %v6180_v54  ;;  %v4569_v25 = vadd.f32 %v1021_v2, %v4460_v8  ;;  %v1145_v2 = vld [vmem:[%s6170_s6 + $0x58] sm:$0xff] }
  0xf6   : > { %1216 = vperm.xlu1 %3948, %v1142_v58   ;;  %1211 = vperm.xlu0 %3947, %v1141_v59   ;;  %v1146_v58 = vld [vmem:[%s6170_s6 + $0x60] sm:$0xff] }
  0xf7   : > { %6244 = vst [vmem:[#allocation26_spill] sm:$0xff] %v4559_v44  ;;  %v6186_v54 = vmax.f32 %v4569_v25, 0.0  ;;  %v4600_v59 = vpop.permute.xlu2 %816 }
  0xf8   : > { %v4571_v51 = vpop.permute.xlu1 %766  ;;  %v4573_v47 = vpop.permute.xlu0 %761 }
  0xf9   : > { %6245 = vst [vmem:[#allocation27_spill] sm:$0xff] %v4571_v51  ;;  %v4576_v24 = vadd.f32 %v1020_v31, %v4571_v51  ;;  %v4579_v26 = vadd.f32 %v1019_v48, %v4573_v47  ;;  %v1144_v31 = vld [vmem:[%s6170_s6 + $0x50] sm:$0xff]  ;;  %v382_v48 = vld [vmem:[%s6165_s1 + $0x40] sm:$0xff] }
  0xfa   : > { %6246 = vst [vmem:[#allocation28_spill] sm:$0xff] %v4573_v47  ;;  %v1022_v60 = vmul.f32 %v4269_v45, %v382_v48  ;;  %v1149_v48 = vld [vmem:[%s6170_s6 + $0x78] sm:$0xff] }
  0xfb   : > { %v6188_v46 = vmax.f32 %v4576_v24, 0.0  ;;  %v6248_v14 = vmax.f32 %v4579_v26, 0.0 }
  0xfd   : > { %1236 = vperm.xlu2 %3949, %v1146_v58   ;;  %v4606_v44 = vpack.c.bf16 %v6186_v54, %v6188_v46  ;;  %v4612_v18 = vpack.c.bf16 %v6248_v14, %v6187_v7  ;;  %v384_v54 = vld [vmem:[%s6165_s1 + $0x50] sm:$0xff]  ;;  %v387_v14 = vld [vmem:[%s6165_s1 + $0x68] sm:$0xff]  ;;  %v385_v46 = vld [vmem:[%s6165_s1 + $0x58] sm:$0xff] }
  0xfe   : > { %1231 = vperm.xlu1 %3948, %v1145_v2   ;;  %1226 = vperm.xlu0 %3947, %v1144_v31   ;;  %v1147_v7 = vld [vmem:[%s6170_s6 + $0x68] sm:$0xff]  ;;  %v1024_v6 = vmul.f32 %v4327_v4, %v384_v54  ;;  %v1025_v45 = vmul.f32 %v4280_v49, %v385_v46  ;;  %v1152_v46 = vld [vmem:[%s6170_s6 + $0x90] sm:$0xff] }
  0xff   : > { %6247 = vst [vmem:[#allocation29_spill] sm:$0xff] %v4606_v44 }
 0x100   : > { %6249 = vst [vmem:[#allocation30_spill] sm:$0xff] %v4612_v18  ;;  %v4616_v56 = vpop.permute.xlu1 %781  ;;  %v4618_v58 = vpop.permute.xlu0 %776  ;;  %v386_v18 = vld [vmem:[%s6165_s1 + $0x60] sm:$0xff]  ;;  %v4660_v47 = vadd.f32 %v1024_v6, %v4490_v36  ;;  %v389_v36 = vld [vmem:[%s6165_s1 + $0x78] sm:$0xff] }
 0x101   : > { %6250 = vst [vmem:[#allocation31_spill] sm:$0xff] %v4616_v56  ;;  %v4621_v2 = vadd.f32 %v1023_v50, %v4616_v56  ;;  %v4624_v31 = vadd.f32 %v1022_v60, %v4618_v58  ;;  %v1148_v60 = vld [vmem:[%s6170_s6 + $0x70] sm:$0xff]  ;;  %v1027_v50 = vmul.f32 %v4342_v10, %v387_v14  ;;  %v1026_v5 = vmul.f32 %v4344_v11, %v386_v18  ;;  %v832_v14 = vpop.permute.xlu2 %831 }
 0x102   : > { %6251 = vst [vmem:[#allocation32_spill] sm:$0xff] %v4618_v58  ;;  %v388_v18 = vld [vmem:[%s6165_s1 + $0x70] sm:$0xff] }
 0x103   : > { %v6252_v56 = vmax.f32 %v4624_v31, 0.0  ;;  %v6253_v58 = vmax.f32 %v4621_v2, 0.0  ;;  %v4663_v54 = vadd.f32 %v1027_v50, %v4539_v39  ;;  %v6258_v39 = vmax.f32 %v4660_v47, 0.0 }
 0x104   : > { %v1028_v10 = vmul.f32 %v4295_v55, %v388_v18 }
 0x105   : > { %1251 = vperm.xlu2 %3949, %v1149_v48   ;;  %v4655_v44 = vpack.c.bf16 %v6253_v58, %v6252_v56  ;;  %v6202_v6 = vmax.f32 %v4663_v54, 0.0  ;;  %v349_v58 = vld [vmem:[%s6164_s0 + $0x78] sm:$0xff] }
 0x106   : > { %1246 = vperm.xlu1 %3948, %v1148_v60   ;;  %1241 = vperm.xlu0 %3947, %v1147_v7   ;;  %v1150_v60 = vld [vmem:[%s6170_s6 + $0x80] sm:$0xff] }
 0x107   : > { %6254 = vst [vmem:[#allocation33_spill] sm:$0xff] %v4655_v44 }
 0x108   : > { %v4665_v48 = vpop.permute.xlu1 %796  ;;  %v4667_v4 = vpop.permute.xlu0 %791 }
 0x109   : > { %6255 = vst [vmem:[#allocation34_spill] sm:$0xff] %v4665_v48  ;;  %v4670_v56 = vadd.f32 %v1026_v5, %v4665_v48  ;;  %v4673_v7 = vadd.f32 %v1025_v45, %v4667_v4  ;;  %v1151_v45 = vld [vmem:[%s6170_s6 + $0x88] sm:$0xff]  ;;  %v348_v5 = vld [vmem:[%s6164_s0 + $0x70] sm:$0xff]  ;;  %v1029_v48 = vmul.f32 %v4359_v17, %v389_v36 }
 0x10a   : > { %6256 = vst [vmem:[#allocation35_spill] sm:$0xff] %v4667_v4  ;;  %v668_v11 = vmul.f32 %v4295_v55, %v348_v5  ;;  %v353_v55 = vld [vmem:[%s6164_s0 + $0x98] sm:$0xff]  ;;  %v391_v5 = vld [vmem:[%s6165_s1 + $0x88] sm:$0xff] }
 0x10b   : > { %v6203_v50 = vmax.f32 %v4670_v56, 0.0  ;;  %v6259_v44 = vmax.f32 %v4673_v7, 0.0  ;;  %v1031_v63 = vmul.f32 %v4310_v61, %v391_v5  ;;  %v394_v5 = vld [vmem:[%s6165_s1 + $0xa0] sm:$0xff] }
 0x10d   : > { %1266 = vperm.xlu2 %3949, %v1152_v46   ;;  %v4704_v4 = vpack.c.bf16 %v6202_v6, %v6203_v50  ;;  %v4710_v49 = vpack.c.bf16 %v6259_v44, %v6258_v39  ;;  %v669_v46 = vmul.f32 %v4359_v17, %v349_v58  ;;  %v390_v6 = vld [vmem:[%s6165_s1 + $0x80] sm:$0xff]  ;;  %v393_v44 = vld [vmem:[%s6165_s1 + $0x98] sm:$0xff]  ;;  %v4722_v39 = vpop.permute.xlu2 %846 }
 0x10e   : > { %1261 = vperm.xlu1 %3948, %v1151_v45   ;;  %1256 = vperm.xlu0 %3947, %v1150_v60   ;;  %v350_v17 = vld [vmem:[%s6164_s0 + $0x80] sm:$0xff]  ;;  %v1030_v8 = vmul.f32 %v4357_v16, %v390_v6  ;;  %v1033_v41 = vmul.f32 %v4372_v22, %v393_v44 }
 0x10f   : > { %6257 = vst [vmem:[#allocation36_spill] sm:$0xff] %v4704_v4 }
 0x110   : > { %6260 = vst [vmem:[#allocation37_spill] sm:$0xff] %v4710_v49  ;;  %v812_v50 = vpop.permute.xlu1 %811  ;;  %v807_v4 = vpop.permute.xlu0 %806 }
 0x111   : > { %v1069_v45 = vadd.f32 %v1029_v48, %v812_v50  ;;  %v1068_v18 = vadd.f32 %v1028_v10, %v807_v4  ;;  %v948_v36 = vadd.f32 %v807_v4, %v668_v11  ;;  %v949_v58 = vadd.f32 %v812_v50, %v669_v46  ;;  %v1153_v10 = vld [vmem:[%s6170_s6 + $0x98] sm:$0xff]  ;;  %v392_v4 = vld [vmem:[%s6165_s1 + $0x90] sm:$0xff]  ;;  %v351_v50 = vld [vmem:[%s6164_s0 + $0x88] sm:$0xff] }
 0x112   : > { %v352_v11 = vld [vmem:[%s6164_s0 + $0x90] sm:$0xff]  ;;  %v670_v46 = vmul.f32 %v4357_v16, %v350_v17  ;;  %v1032_v19 = vmul.f32 %v4374_v23, %v392_v4 }
 0x113   : > { %v1109_v60 = vmax.f32 %v1069_v45, 0.0  ;;  %v1108_v49 = vmax.f32 %v1068_v18, 0.0  ;;  %v988_v48 = vmax.f32 %v948_v36, 0.0  ;;  %v989_v37 = vmax.f32 %v949_v58, 0.0 }
 0x114   : > { %v673_v45 = vmul.f32 %v4372_v22, %v353_v55  ;;  %v1070_v36 = vadd.f32 %v1030_v8, %v4600_v59  ;;  %v1073_v58 = vadd.f32 %v1033_v41, %v832_v14  ;;  %v950_v62 = vadd.f32 %v4600_v59, %v670_v46 }
 0x115   : > { %v3950_v18 = vpack.i.bf16 %v1109_v60, %v1108_v49  ;;  %v4749_v6 = vpack.c.bf16 %v1109_v60, %v1108_v49  ;;  %v4751_v44 = vpack.c.bf16 %v989_v37, %v988_v48  ;;  %v672_v16 = vmul.f32 %v4374_v23, %v352_v11  ;;  %v862_v48 = vpop.permute.xlu2 %861 }
 0x116   : > { %1271 = vperm.xlu0 %3947, %v1153_v10   ;;  %v953_v51 = vadd.f32 %v832_v14, %v673_v45  ;;  %v671_v49 = vmul.f32 %v4310_v61, %v351_v50  ;;  %v1110_v14 = vmax.f32 %v1070_v36, 0.0  ;;  %v1113_v60 = vmax.f32 %v1073_v58, 0.0  ;;  %v355_v61 = vld [vmem:[%s6164_s0 + $0xa8] sm:$0xff]  ;;  %v354_v50 = vld [vmem:[%s6164_s0 + $0xa0] sm:$0xff] }
 0x117   : > { %3951 = vrot.lane.b32.xlu1 %v3950_v18, %s4085_s19  ;;  %v990_v10 = vmax.f32 %v950_v62, 0.0  ;;  %v6262_v62 = vmax.f32 %v4663_v54, 0.0  ;;  %v1034_v54 = vmul.f32 %v4325_v3, %v394_v5  ;;  %v399_v5 = vld [vmem:[%s6165_s1 + $0xc8] sm:$0xff] }
 0x118   : > { %v827_v37 = vpop.permute.xlu1 %826  ;;  %v822_v22 = vpop.permute.xlu0 %821  ;;  %v993_v59 = vmax.f32 %v953_v51, 0.0  ;;  %v6261_v51 = vmax.f32 %v4670_v56, 0.0 }
 0x119   : > { %v1072_v17 = vadd.f32 %v1032_v19, %v827_v37  ;;  %v1071_v8 = vadd.f32 %v1031_v63, %v822_v22  ;;  %v952_v41 = vadd.f32 %v827_v37, %v672_v16  ;;  %v951_v55 = vadd.f32 %v822_v22, %v671_v49  ;;  %v395_v63 = vld [vmem:[%s6165_s1 + $0xa8] sm:$0xff] }
 0x11a   : > { %v3960_v19 = vpack.i.bf16 %v6262_v62, %v6261_v51  ;;  %v675_v49 = vmul.f32 %v4389_v29, %v355_v61  ;;  %v1035_v37 = vmul.f32 %v4389_v29, %v395_v63  ;;  %v674_v22 = vmul.f32 %v4325_v3, %v354_v50  ;;  %v357_v3 = vld [vmem:[%s6164_s0 + $0xb8] sm:$0xff]  ;;  %v396_v29 = vld [vmem:[%s6165_s1 + $0xb0] sm:$0xff]  ;;  %v398_v63 = vld [vmem:[%s6165_s1 + $0xc0] sm:$0xff] }
 0x11b   : > { %v1112_v4 = vmax.f32 %v1072_v17, 0.0  ;;  %v1111_v46 = vmax.f32 %v1071_v8, 0.0  ;;  %v992_v23 = vmax.f32 %v952_v41, 0.0  ;;  %v991_v11 = vmax.f32 %v951_v55, 0.0  ;;  %v397_v61 = vld [vmem:[%s6165_s1 + $0xb8] sm:$0xff] }
 0x11d   : > { %v4776_v45 = vpack.i.bf16 %v1113_v60, %v1112_v4  ;;  %v4778_v18 = vpack.i.bf16 %v1111_v46, %v1110_v14  ;;  %v4780_v36 = vpack.c.bf16 %v993_v59, %v992_v23  ;;  %v4782_v58 = vpack.c.bf16 %v991_v11, %v990_v10  ;;  %v4825_v50 = vpop.permute.xlu2 %876 }
 0x11e   : > { %3961 = vrot.lane.b32.xlu0 %v3960_v19, %s4085_s19  ;;  %v4785_v16 = vpack.c.bf16 %v1113_v60, %v1112_v4  ;;  %v4787_v56 = vpack.c.bf16 %v1111_v46, %v1110_v14  ;;  %v356_v14 = vld [vmem:[%s6164_s0 + $0xb0] sm:$0xff]  ;;  %v359_v60 = vld [vmem:[%s6164_s0 + $0xc8] sm:$0xff]  ;;  %v358_v19 = vld [vmem:[%s6164_s0 + $0xc0] sm:$0xff] }
 0x11f   : > { %v676_v51 = vmul.f32 %v4387_v28, %v356_v14  ;;  %v679_v62 = vmul.f32 %v4402_v34, %v359_v60  ;;  %v1037_v14 = vmul.f32 %v4340_v9, %v397_v61  ;;  %v1038_v60 = vmul.f32 %v4404_v35, %v398_v63  ;;  %v361_v63 = vld [vmem:[%s6164_s0 + $0xd8] sm:$0xff] }
 0x120   : > { %6263 = vst [vmem:[#allocation38_spill] sm:$0xff] %v4785_v16  ;;  %v842_v17 = vpop.permute.xlu1 %841  ;;  %v837_v8 = vpop.permute.xlu0 %836 }
 0x121   : > { %6264 = vst [vmem:[#allocation39_spill] sm:$0xff] %v4787_v56  ;;  %v955_v41 = vadd.f32 %v842_v17, %v675_v49  ;;  %v4793_v55 = vadd.f32 %v1035_v37, %v842_v17  ;;  %v4795_v59 = vadd.f32 %v1034_v54, %v837_v8  ;;  %v954_v10 = vadd.f32 %v837_v8, %v674_v22  ;;  %v403_v56 = vld [vmem:[%s6165_s1 + $0xe8] sm:$0xff] }
 0x122   : > { %v1036_v37 = vmul.f32 %v4387_v28, %v396_v29  ;;  %v1039_v22 = vmul.f32 %v4402_v34, %v399_v5  ;;  %v956_v17 = vadd.f32 %v4722_v39, %v676_v51  ;;  %v959_v8 = vadd.f32 %v862_v48, %v679_v62 }
 0x123   : > { %v995_v4 = vmax.f32 %v955_v41, 0.0  ;;  %v6211_v46 = vmax.f32 %v4793_v55, 0.0  ;;  %v6216_v23 = vmax.f32 %v4795_v59, 0.0  ;;  %v994_v11 = vmax.f32 %v954_v10, 0.0 }
 0x124   : > { %v677_v41 = vmul.f32 %v4340_v9, %v357_v3  ;;  %v678_v10 = vmul.f32 %v4404_v35, %v358_v19  ;;  %v996_v3 = vmax.f32 %v956_v17, 0.0  ;;  %v999_v62 = vmax.f32 %v959_v8, 0.0  ;;  %v400_v9 = vld [vmem:[%s6165_s1 + $0xd0] sm:$0xff] }
 0x125   : > { %v4827_v54 = vpack.c.bf16 %v995_v4, %v994_v11  ;;  %v4833_v49 = vpack.c.bf16 %v6211_v46, %v6216_v23  ;;  %v4843_v4 = vadd.f32 %v1036_v37, %v4722_v39  ;;  %v4845_v11 = vadd.f32 %v1039_v22, %v862_v48  ;;  %v360_v22 = vld [vmem:[%s6164_s0 + $0xd0] sm:$0xff] }
 0x127   : > { %6265 = vst [vmem:[#allocation40_spill] sm:$0xff] %v4833_v49  ;;  %v6213_v19 = vmax.f32 %v4843_v4, 0.0  ;;  %v6214_v37 = vmax.f32 %v4845_v11, 0.0 }
 0x128   : > { %v857_v46 = vpop.permute.xlu1 %856  ;;  %v852_v28 = vpop.permute.xlu0 %851 }
 0x129   : > { %v4847_v29 = vadd.f32 %v1038_v60, %v857_v46  ;;  %v957_v34 = vadd.f32 %v852_v28, %v677_v41  ;;  %v4849_v5 = vadd.f32 %v1037_v14, %v852_v28  ;;  %v958_v51 = vadd.f32 %v857_v46, %v678_v10  ;;  %v401_v46 = vld [vmem:[%s6165_s1 + $0xd8] sm:$0xff] }
 0x12a   : > { %v1040_v60 = vmul.f32 %v4355_v15, %v400_v9  ;;  %v681_v10 = vmul.f32 %v4419_v43, %v361_v63  ;;  %v1041_v28 = vmul.f32 %v4419_v43, %v401_v46  ;;  %v405_v9 = vld [vmem:[%s6165_s1 + $0xf8] sm:$0xff] }
 0x12b   : > { %v6215_v35 = vmax.f32 %v4847_v29, 0.0  ;;  %v997_v39 = vmax.f32 %v957_v34, 0.0  ;;  %v6212_v48 = vmax.f32 %v4849_v5, 0.0  ;;  %v998_v61 = vmax.f32 %v958_v51, 0.0  ;;  %v892_v34 = vpop.permute.xlu2 %891 }
 0x12c   : > { %v680_v51 = vmul.f32 %v4355_v15, %v360_v22  ;;  %v363_v15 = vld [vmem:[%s6164_s0 + $0xe8] sm:$0xff] }
 0x12d   : > { %v4867_v17 = vpack.c.bf16 %v997_v39, %v996_v3  ;;  %v4869_v8 = vpack.c.bf16 %v999_v62, %v998_v61  ;;  %v4875_v41 = vpack.c.bf16 %v6214_v37, %v6215_v35  ;;  %v4881_v14 = vpack.c.bf16 %v6212_v48, %v6213_v19  ;;  %v402_v39 = vld [vmem:[%s6165_s1 + $0xe0] sm:$0xff]  ;;  %v365_v61 = vld [vmem:[%s6164_s0 + $0xf8] sm:$0xff] }
 0x12e   : > { %v362_v35 = vld [vmem:[%s6164_s0 + $0xe0] sm:$0xff] }
 0x130   : > { %v872_v3 = vpop.permute.xlu1 %871  ;;  %v867_v62 = vpop.permute.xlu0 %866 }
 0x131   : > { %v961_v63 = vadd.f32 %v872_v3, %v681_v10  ;;  %v1081_v48 = vadd.f32 %v1041_v28, %v872_v3  ;;  %v1080_v43 = vadd.f32 %v1040_v60, %v867_v62  ;;  %v960_v46 = vadd.f32 %v867_v62, %v680_v51  ;;  %v404_v51 = vld [vmem:[%s6165_s1 + $0xf0] sm:$0xff] }
 0x132   : > { %v1042_v10 = vmul.f32 %v4417_v42, %v402_v39  ;;  %v685_v60 = vmul.f32 %v4432_v52, %v365_v61  ;;  %v1045_v28 = vmul.f32 %v4432_v52, %v405_v9  ;;  %v682_v61 = vmul.f32 %v4417_v42, %v362_v35 }
 0x133   : > { %v1001_v22 = vmax.f32 %v961_v63, 0.0  ;;  %v1121_v19 = vmax.f32 %v1081_v48, 0.0  ;;  %v1120_v37 = vmax.f32 %v1080_v43, 0.0  ;;  %v1000_v23 = vmax.f32 %v960_v46, 0.0  ;;  %v364_v48 = vld [vmem:[%s6164_s0 + $0xf0] sm:$0xff] }
 0x134   : > { %v1082_v43 = vadd.f32 %v1042_v10, %v4825_v50  ;;  %v965_v39 = vadd.f32 %v892_v34, %v685_v60  ;;  %v1085_v46 = vadd.f32 %v1045_v28, %v892_v34  ;;  %v683_v52 = vmul.f32 %v4370_v21, %v363_v15 }
 0x135   : > { %v3975_v3 = vpack.i.bf16 %v1121_v19, %v1120_v37  ;;  %v4914_v62 = vpack.c.bf16 %v1001_v22, %v1000_v23  ;;  %v4916_v63 = vpack.c.bf16 %v1121_v19, %v1120_v37  ;;  %v1043_v9 = vmul.f32 %v4370_v21, %v403_v56  ;;  %v4926_v37 = vpop.permute.xlu2 %906  ;;  %v366_v21 = vld [vmem:[%s6164_s0 + $0x100] sm:$0xff] }
 0x136   : > { %v684_v16 = vmul.f32 %v4434_v53, %v364_v48  ;;  %v1044_v49 = vmul.f32 %v4434_v53, %v404_v51  ;;  %v962_v19 = vadd.f32 %v4825_v50, %v682_v61  ;;  %v1122_v35 = vmax.f32 %v1082_v43, 0.0  ;;  %v406_v50 = vld [vmem:[%s6165_s1 + $0x100] sm:$0xff] }
 0x137   : > { %3976 = vrot.lane.b32.xlu0 %v3975_v3, %s4085_s19  ;;  %v1005_v15 = vmax.f32 %v965_v39, 0.0  ;;  %v1125_v28 = vmax.f32 %v1085_v46, 0.0 }
 0x138   : > { %v887_v23 = vpop.permute.xlu1 %886  ;;  %v882_v22 = vpop.permute.xlu0 %881  ;;  %v1002_v3 = vmax.f32 %v962_v19, 0.0 }
 0x139   : > { %v964_v10 = vadd.f32 %v887_v23, %v684_v16  ;;  %v1084_v34 = vadd.f32 %v1044_v49, %v887_v23  ;;  %v963_v60 = vadd.f32 %v882_v22, %v683_v52  ;;  %v1083_v42 = vadd.f32 %v1043_v9, %v882_v22  ;;  %v367_v16 = vld [vmem:[%s6164_s0 + $0x108] sm:$0xff] }
 0x13a   : > { %v407_v49 = vld [vmem:[%s6165_s1 + $0x108] sm:$0xff]  ;;  %v686_v52 = vmul.f32 %v4385_v27, %v366_v21  ;;  %v6266_v9 = vmax.f32 %v4576_v24, 0.0  ;;  %v6267_v23 = vmax.f32 %v4569_v25, 0.0  ;;  %v687_v19 = vmul.f32 %v4449_v1, %v367_v16  ;;  %v369_v24 = vld [vmem:[%s6164_s0 + $0x118] sm:$0xff] }
 0x13b   : > { %v1004_v53 = vmax.f32 %v964_v10, 0.0  ;;  %v1124_v56 = vmax.f32 %v1084_v34, 0.0  ;;  %v1003_v48 = vmax.f32 %v963_v60, 0.0  ;;  %v1123_v51 = vmax.f32 %v1083_v42, 0.0 }
 0x13c   : > { %v3990_v22 = vpack.i.bf16 %v6267_v23, %v6266_v9  ;;  %v1046_v60 = vmul.f32 %v4385_v27, %v406_v50  ;;  %v1047_v42 = vmul.f32 %v4449_v1, %v407_v49  ;;  %v368_v27 = vld [vmem:[%s6164_s0 + $0x110] sm:$0xff] }
 0x13d   : > { %v4940_v43 = vpack.c.bf16 %v1125_v28, %v1124_v56  ;;  %v3955_v39 = vpack.i.bf16 %v1125_v28, %v1124_v56  ;;  %v3965_v46 = vpack.i.bf16 %v1123_v51, %v1122_v35  ;;  %v4942_v61 = vpack.c.bf16 %v1005_v15, %v1004_v53  ;;  %v408_v1 = vld [vmem:[%s6165_s1 + $0x110] sm:$0xff] }
 0x13e   : > { %v4949_v10 = vpack.c.bf16 %v1003_v48, %v1002_v3  ;;  %v4951_v34 = vpack.c.bf16 %v1123_v51, %v1122_v35  ;;  %v371_v35 = vld [vmem:[%s6164_s0 + $0x128] sm:$0xff]  ;;  %v922_v51 = vpop.permute.xlu2 %921  ;;  %v1048_v9 = vmul.f32 %v4447_v0, %v408_v1 }
 0x13f   : > { %3956 = vrot.lane.b32.xlu2 %v3955_v39, %s4085_s19  ;;  %3966 = vrot.lane.b32.xlu1 %v3965_v46, %s4085_s19  ;;  %v411_v48 = vld [vmem:[%s6165_s1 + $0x128] sm:$0xff]  ;;  %v409_v39 = vld [vmem:[%s6165_s1 + $0x118] sm:$0xff]  ;;  %v689_v46 = vmul.f32 %v4400_v33, %v369_v24  ;;  %v691_v23 = vmul.f32 %v4462_v12, %v371_v35  ;;  %v6270_v24 = vmax.f32 %v4624_v31, 0.0  ;;  %v6274_v31 = vmax.f32 %v4793_v55, 0.0 }
 0x140   : > { %3991 = vrot.lane.b32.xlu0 %v3990_v22, %s4085_s19  ;;  %v902_v25 = vpop.permute.xlu1 %901  ;;  %v897_v15 = vpop.permute.xlu0 %896  ;;  %v370_v22 = vld [vmem:[%s6164_s0 + $0x120] sm:$0xff]  ;;  %v1051_v35 = vmul.f32 %v4462_v12, %v411_v48  ;;  %v5021_v12 = vadd.f32 %v1048_v9, %v4926_v37  ;;  %v373_v9 = vld [vmem:[%s6164_s0 + $0x138] sm:$0xff] }
 0x141   : > { %v967_v28 = vadd.f32 %v902_v25, %v687_v19  ;;  %v4971_v21 = vadd.f32 %v1047_v42, %v902_v25  ;;  %v966_v53 = vadd.f32 %v897_v15, %v686_v52  ;;  %v4973_v56 = vadd.f32 %v1046_v60, %v897_v15  ;;  %v410_v60 = vld [vmem:[%s6165_s1 + $0x120] sm:$0xff] }
 0x142   : > { %v688_v52 = vmul.f32 %v4447_v0, %v368_v27  ;;  %v6268_v19 = vmax.f32 %v4660_v47, 0.0  ;;  %v6269_v42 = vmax.f32 %v4673_v7, 0.0  ;;  %v6271_v15 = vmax.f32 %v4621_v2, 0.0 }
 0x143   : > { %v1007_v50 = vmax.f32 %v967_v28, 0.0  ;;  %v1127_v16 = vmax.f32 %v4971_v21, 0.0  ;;  %v1006_v49 = vmax.f32 %v966_v53, 0.0  ;;  %v1126_v3 = vmax.f32 %v4973_v56, 0.0  ;;  %v1156_v56 = vld [vmem:[%s6170_s6 + $0xb0] sm:$0xff]  ;;  %v1158_v21 = vld [vmem:[%s6170_s6 + $0xc0] sm:$0xff] }
 0x144   : > { %v3970_v25 = vpack.i.bf16 %v6269_v42, %v6268_v19  ;;  %v3980_v0 = vpack.i.bf16 %v6271_v15, %v6270_v24  ;;  %v968_v47 = vadd.f32 %v4926_v37, %v688_v52  ;;  %v971_v28 = vadd.f32 %v922_v51, %v691_v23 }
 0x145   : > { %v5001_v27 = vpack.c.bf16 %v1007_v50, %v1006_v49  ;;  %v5007_v1 = vpack.c.bf16 %v1127_v16, %v1126_v3  ;;  %v6273_v7 = vmax.f32 %v4795_v59, 0.0  ;;  %v1049_v2 = vmul.f32 %v4400_v33, %v409_v39 }
 0x146   : > { %v690_v50 = vmul.f32 %v4464_v13, %v370_v22  ;;  %v1050_v49 = vmul.f32 %v4464_v13, %v410_v60  ;;  %v1091_v48 = vadd.f32 %v1051_v35, %v922_v51  ;;  %v1008_v39 = vmax.f32 %v968_v47, 0.0  ;;  %v372_v13 = vld [vmem:[%s6164_s0 + $0x130] sm:$0xff] }
 0x147   : > { %6272 = vst [vmem:[#allocation41_spill] sm:$0xff] %v5007_v1  ;;  %v4005_v53 = vpack.i.bf16 %v6274_v31, %v6273_v7  ;;  %3971 = vrot.lane.b32.xlu2 %v3970_v25, %s4085_s19  ;;  %3981 = vrot.lane.b32.xlu1 %v3980_v0, %s4085_s19  ;;  %v1011_v22 = vmax.f32 %v971_v28, 0.0  ;;  %v412_v51 = vld [vmem:[%s6165_s1 + $0x130] sm:$0xff]  ;;  %v1128_v24 = vmax.f32 %v5021_v12, 0.0  ;;  %v6275_v0 = vmax.f32 %v4847_v29, 0.0 }
 0x148   : > { %v917_v59 = vpop.permute.xlu1 %916  ;;  %v912_v52 = vpop.permute.xlu0 %911  ;;  %v1131_v15 = vmax.f32 %v1091_v48, 0.0  ;;  %v6276_v35 = vmax.f32 %v4845_v11, 0.0  ;;  %v6277_v28 = vmax.f32 %v4843_v4, 0.0  ;;  %v6278_v7 = vmax.f32 %v4849_v5, 0.0  ;;  %v6308_v1 = vld [vmem:[#allocation28_spill] sm:$0xff] }
 0x149   : > { %4006 = vrot.lane.b32.xlu0 %v4005_v53, %s4085_s19  ;;  %v970_v55 = vadd.f32 %v917_v59, %v690_v50  ;;  %v1090_v23 = vadd.f32 %v1050_v49, %v917_v59  ;;  %v969_v19 = vadd.f32 %v912_v52, %v689_v46  ;;  %v1089_v33 = vadd.f32 %v1049_v2, %v912_v52  ;;  %v413_v46 = vld [vmem:[%s6165_s1 + $0x138] sm:$0xff] }
 0x14a   : > { %v3985_v47 = vpack.i.bf16 %v6276_v35, %v6275_v0  ;;  %v3995_v31 = vpack.i.bf16 %v6278_v7, %v6277_v28  ;;  %v692_v50 = vmul.f32 %v4415_v40, %v372_v13  ;;  %v6279_v49 = vmax.f32 %v4493_v38, 0.0  ;;  %v5064_v13 = vpop.permute.xlu2 %1176 }
 0x14b   : > { %v1010_v60 = vmax.f32 %v970_v55, 0.0  ;;  %v1130_v42 = vmax.f32 %v1090_v23, 0.0  ;;  %v1009_v25 = vmax.f32 %v969_v19, 0.0  ;;  %v1129_v37 = vmax.f32 %v1089_v33, 0.0 }
 0x14c   : > { %v6280_v12 = vmax.f32 %v4484_v30, 0.0  ;;  %v1052_v4 = vmul.f32 %v4415_v40, %v412_v51  ;;  %v693_v5 = vmul.f32 %v4488_v32, %v373_v9  ;;  %v1053_v59 = vmul.f32 %v4488_v32, %v413_v46  ;;  %v6286_v9 = vld [vmem:[#allocation24_spill] sm:$0xff] }
 0x14d   : > { %v5045_v53 = vpack.c.bf16 %v1011_v22, %v1010_v60  ;;  %v5047_v2 = vpack.c.bf16 %v1009_v25, %v1008_v39  ;;  %v5054_v29 = vpack.c.bf16 %v1131_v15, %v1130_v42  ;;  %v5056_v11 = vpack.c.bf16 %v1129_v37, %v1128_v24 }
 0x14e   : > { %v4020_v48 = vpack.i.bf16 %v6280_v12, %v6279_v49  ;;  %v6283_v32 = vmax.f32 %v4566_v57, 0.0  ;;  %v6284_v60 = vmax.f32 %v4579_v26, 0.0  ;;  %v6285_v51 = vmax.f32 %v4528_v20, 0.0  ;;  %v1154_v20 = vld [vmem:[%s6170_s6 + $0xa0] sm:$0xff]  ;;  %v1157_v49 = vld [vmem:[%s6170_s6 + $0xb8] sm:$0xff] }
 0x14f   : > { %6281 = vst [vmem:[#allocation42_spill] sm:$0xff] %v5054_v29  ;;  %3986 = vrot.lane.b32.xlu2 %v3985_v47, %s4085_s19  ;;  %3996 = vrot.lane.b32.xlu1 %v3995_v31, %s4085_s19  ;;  %v6287_v46 = vmax.f32 %v6286_v9, 0.0  ;;  %v4035_v28 = vpack.i.bf16 %v1131_v15, %v1130_v42  ;;  %v6313_v29 = vld [vmem:[#allocation22_spill] sm:$0xff] }
 0x150   : > { %6282 = vst [vmem:[#allocation43_spill] sm:$0xff] %v5056_v11  ;;  %v932_v38 = vpop.permute.xlu1 %931  ;;  %v927_v52 = vpop.permute.xlu0 %926  ;;  %v4000_v25 = vpack.i.bf16 %v6284_v60, %v6283_v32  ;;  %v1162_v32 = vld [vmem:[%s6170_s6 + $0xe0] sm:$0xff]  ;;  %v1164_v60 = vld [vmem:[%s6170_s6 + $0xf0] sm:$0xff] }
 0x151   : > { %4021 = vrot.lane.b32.xlu0 %v4020_v48, %s4085_s19  ;;  %v973_v30 = vadd.f32 %v932_v38, %v693_v5  ;;  %v1093_v55 = vadd.f32 %v1053_v59, %v932_v38  ;;  %v972_v23 = vadd.f32 %v927_v52, %v692_v50  ;;  %v1092_v19 = vadd.f32 %v1052_v4, %v927_v52  ;;  %v1155_v48 = vld [vmem:[%s6170_s6 + $0xa8] sm:$0xff] }
 0x152   : > { %v4010_v0 = vpack.i.bf16 %v6287_v46, %v6285_v51  ;;  %v5088_v7 = vpop.permute.xlu2 %1191  ;;  %v4040_v50 = vpack.i.bf16 %v1129_v37, %v1128_v24  ;;  %v4045_v37 = vpack.i.bf16 %v1127_v16, %v1126_v3  ;;  %v1160_v24 = vld [vmem:[%s6170_s6 + $0xd0] sm:$0xff]  ;;  %v1163_v16 = vld [vmem:[%s6170_s6 + $0xe8] sm:$0xff]  ;;  %v1734_v52 = vlaneseq  ;;  %v1169_v51 = vld [vmem:[%s6170_s6 + $0x118] sm:$0xff] }
 0x153   : > { %v1013_v33 = vmax.f32 %v973_v30, 0.0  ;;  %v1133_v39 = vmax.f32 %v1093_v55, 0.0  ;;  %v1012_v22 = vmax.f32 %v972_v23, 0.0  ;;  %v1132_v40 = vmax.f32 %v1092_v19, 0.0  ;;  %v1159_v30 = vld [vmem:[%s6170_s6 + $0xc8] sm:$0xff]  ;;  %v1161_v55 = vld [vmem:[%s6170_s6 + $0xd8] sm:$0xff] }
 0x154   : > { %v1735_v23 = vand.u32 127, %v1734_v52 }
 0x155   : > { %v5074_v35 = vpack.c.bf16 %v1013_v33, %v1012_v22  ;;  %v5076_v47 = vpack.c.bf16 %v1133_v39, %v1132_v40  ;;  %v4030_v31 = vpack.i.bf16 %v1133_v39, %v1132_v40  ;;  %v1166_v33 = vld [vmem:[%s6170_s6 + $0x100] sm:$0xff] }
 0x156   : > { %v1740_v40 = vand.u32 31, %v1735_v23  ;;  %v1418_v23 = vld [vmem:[%s6171_s7 + $0x20] sm:$0xff] }
 0x157   : > { %4001 = vrot.lane.b32.xlu2 %v4000_v25, %s4085_s19  ;;  %4011 = vrot.lane.b32.xlu1 %v4010_v0, %s4085_s19 }
 0x158   : > { %v5081_v57 = vpop.permute.xlu1 %1186  ;;  %v5083_v26 = vpop.permute.xlu0 %1181  ;;  %v1828_v25 = vadd.s32 4294967295, %v1740_v40 }
 0x159   : > { %4036 = vrot.lane.b32.xlu0 %v4035_v28, %s4085_s19 }
 0x15a   : > { %vm1829_vm0 = vcmp.ge.s32.totalorder %v1828_v25, 0  ;;  %v1171_v25 = vld [vmem:[%s6170_s6 + $0x128] sm:$0xff] }
 0x15b   : > { %vm5167_vm1 = vmpackc.low %vm1829_vm0, %vm1829_vm0 }
 0x15f   : > { %4016 = vrot.lane.b32.xlu2 %v4776_v45, %s4085_s19  ;;  %4026 = vrot.lane.b32.xlu1 %v4778_v18, %s4085_s19  ;;  %v5107_v18 = vpop.permute.xlu2 %1206 }
 0x160   : > { %v5094_v42 = vpop.permute.xlu1 %1201  ;;  %v5096_v15 = vpop.permute.xlu0 %1196 }
 0x161   : > { %1276 = vperm.xlu0 %3947, %v1154_v20  }
 0x167   : > { %4031 = vrot.lane.b32.xlu2 %v4030_v31, %s4085_s19  ;;  %4041 = vrot.lane.b32.xlu1 %v4040_v50, %s4085_s19  ;;  %v5124_v59 = vpop.permute.xlu2 %1221  ;;  %v1442_v31 = vld [vmem:[%s6171_s7 + $0xe0] sm:$0xff] }
 0x168   : > { %v5103_v45 = vpop.permute.xlu1 %1216  ;;  %v5105_v12 = vpop.permute.xlu0 %1211  ;;  %6291 = vst [vmem:[#allocation46_spill] sm:$0xff] %v5124_v59  ;;  %v5328_v59 = vld [vmem:[%s6164_s0 + $0x20] sm:$0xff] }
 0x169   : > { %1291 = vperm.xlu0 %3947, %v1157_v49   ;;  %6288 = vst [vmem:[#allocation24_spill] sm:$0xff] %v5103_v45  ;;  %v1165_v49 = vld [vmem:[%s6170_s6 + $0xf8] sm:$0xff] }
 0x16f   : > { %4046 = vrot.lane.b32.xlu2 %v4045_v37, %s4085_s19  ;;  %1281 = vperm.xlu1 %3948, %v1155_v48   ;;  %v5145_v19 = vpop.permute.xlu2 %1236  ;;  %v1167_v48 = vld [vmem:[%s6170_s6 + $0x108] sm:$0xff]  ;;  %v1172_v37 = vld [vmem:[%s6170_s6 + $0x130] sm:$0xff] }
 0x170   : > { %v5120_v4 = vpop.permute.xlu1 %1231  ;;  %v5122_v5 = vpop.permute.xlu0 %1226  ;;  %6294 = vst [vmem:[#allocation49_spill] sm:$0xff] %v5145_v19 }
 0x171   : > { %1306 = vperm.xlu0 %3947, %v1160_v24   ;;  %6289 = vst [vmem:[#allocation44_spill] sm:$0xff] %v5120_v4 }
 0x172   : > { %6290 = vst [vmem:[#allocation45_spill] sm:$0xff] %v5122_v5 }
 0x177   : > { %1286 = vperm.xlu2 %3949, %v1156_v56   ;;  %1296 = vperm.xlu1 %3948, %v1158_v21   ;;  %v5163_v9 = vpop.permute.xlu2 %1251 }
 0x178   : > { %v5135_v3 = vpop.permute.xlu1 %1246  ;;  %v5137_v38 = vpop.permute.xlu0 %1241  ;;  %6297 = vst [vmem:[#allocation52_spill] sm:$0xff] %v5163_v9 }
 0x179   : > { %1321 = vperm.xlu0 %3947, %v1163_v16   ;;  %6292 = vst [vmem:[#allocation47_spill] sm:$0xff] %v5135_v3  ;;  %v6310_v3 = vld [vmem:[#allocation6_spill] sm:$0xff] }
 0x17a   : > { %6293 = vst [vmem:[#allocation48_spill] sm:$0xff] %v5137_v38  ;;  %v6307_v38 = vld [vmem:[#allocation2_spill] sm:$0xff] }
 0x17b   : > { %v658_v19 = vmul.f32 %v6307_v38, %v5328_v59  ;;  %v3825_v38 = vld [vmem:[%s5335_s10 + $0x24] sm:$0xf0] }
 0x17f   : > { %1301 = vperm.xlu2 %3949, %v1159_v30   ;;  %1311 = vperm.xlu1 %3948, %v1161_v55   ;;  %v5184_v56 = vpop.permute.xlu2 %1266  ;;  %v1168_v30 = vld [vmem:[%s6170_s6 + $0x110] sm:$0xff]  ;;  %v1170_v55 = vld [vmem:[%s6170_s6 + $0x120] sm:$0xff] }
 0x180   : > { %v5150_v39 = vpop.permute.xlu1 %1261  ;;  %v5152_v22 = vpop.permute.xlu0 %1256  ;;  %6301 = vst [vmem:[#allocation54_spill] sm:$0xff] %v5184_v56  ;;  %v5395_v56 = vld [vmem:[%s6164_s0 + $0x8] sm:$0xff] }
 0x181   : > { %1336 = vperm.xlu0 %3947, %v1166_v33   ;;  %6295 = vst [vmem:[#allocation50_spill] sm:$0xff] %v5150_v39 }
 0x182   : > { %6296 = vst [vmem:[#allocation51_spill] sm:$0xff] %v5152_v22 }
 0x187   : > { %1316 = vperm.xlu2 %3949, %v1162_v32   ;;  %1326 = vperm.xlu1 %3948, %v1164_v60  }
 0x188   : > { %v5165_v46 = vpop.permute.xlu0 %1271 }
 0x189   : > { %1351 = vperm.xlu0 %3947, %v1169_v51   ;;  %6298 = vst [vmem:[#allocation53_spill] sm:$0xff] %v5165_v46  ;;  %v3952_v0 = vpop.permute.xlu1 %3951  ;;  %v1420_v51 = vld [vmem:[%s6171_s7 + $0x30] sm:$0xff] }
 0x18a   : > { %v3954_v28 = vunpack.i.h.bf16 %v3952_v0  ;;  %v3953_v20 = vunpack.i.l.bf16 %v3952_v0  ;;  %v1416_v0 = vld [vmem:[%s6171_s7 + $0x10] sm:$0xff] }
 0x18c   : > { %v3759_v50 = vpack.c.bf16 %v3954_v28, %v3953_v20 }
 0x18e   : > { %3760 = vmatpush.bf16.msk.msra.mxu0 %vm5167_vm1, %v3759_v50  ;;  %3920 = vmatpush.bf16.msk.msra.mxu2 %vm5167_vm1, %v3759_v50 }
 0x18f   : > { %1331 = vperm.xlu2 %3949, %v1165_v49   ;;  %1341 = vperm.xlu1 %3948, %v1167_v48   ;;  %v1421_v48 = vld [vmem:[%s6171_s7 + $0x38] sm:$0xff] }
 0x190   : > { %v3962_v24 = vpop.permute.xlu0 %3961 }
 0x191   : > { %1366 = vperm.xlu0 %3947, %v1172_v37   ;;  %v3964_v21 = vunpack.i.h.bf16 %v3962_v24  ;;  %v3963_v16 = vunpack.i.l.bf16 %v3962_v24  ;;  %v1419_v37 = vld [vmem:[%s6171_s7 + $0x28] sm:$0xff]  ;;  %v1437_v24 = vld [vmem:[%s6171_s7 + $0xb8] sm:$0xff] }
 0x193   : > { %v3762_v52 = vpack.c.bf16 %v3964_v21, %v3963_v16 }
 0x195   : > { %3763 = vmatpush.bf16.msk.msra.mxu0 %vm5167_vm1, %v3762_v52  ;;  %3921 = vmatpush.bf16.msk.msra.mxu2 %vm5167_vm1, %v3762_v52  ;;  %v1173_v52 = vld [vmem:[%s6170_s6 + $0x138] sm:$0xff] }
 0x197   : > { %1346 = vperm.xlu2 %3949, %v1168_v30   ;;  %1356 = vperm.xlu1 %3948, %v1170_v55   ;;  %v1417_v30 = vld [vmem:[%s6171_s7 + $0x18] sm:$0xff]  ;;  %v1414_v55 = vld [vmem:[%s6171_s7] sm:$0xff] }
 0x199   : > { %1476 = vperm.xlu0 %3947, %v1418_v23   ;;  %v3957_v33 = vpop.permute.xlu2 %3956 }
 0x19a   : > { %v3959_v40 = vunpack.i.h.bf16 %v3957_v33  ;;  %v3958_v32 = vunpack.i.l.bf16 %v3957_v33 }
 0x19c   : > { %v3783_v60 = vpack.c.bf16 %v3959_v40, %v3958_v32 }
 0x19e   : > { %3784 = vmatpush.bf16.msk.msra.mxu1 %vm5167_vm1, %v3783_v60  ;;  %3928 = vmatpush.bf16.msk.msra.mxu3 %vm5167_vm1, %v3783_v60 }
 0x19f   : > { %1361 = vperm.xlu2 %3949, %v1171_v25   ;;  %1486 = vperm.xlu1 %3948, %v1420_v51  }
 0x1a1   : > { %1466 = vperm.xlu0 %3947, %v1416_v0   ;;  %v3972_v28 = vpop.permute.xlu2 %3971 }
 0x1a2   : > { %v3974_v20 = vunpack.i.h.bf16 %v3972_v28  ;;  %v3973_v50 = vunpack.i.l.bf16 %v3972_v28  ;;  %v1436_v28 = vld [vmem:[%s6171_s7 + $0xb0] sm:$0xff] }
 0x1a4   : > { %v3765_v49 = vpack.c.bf16 %v3974_v20, %v3973_v50  ;;  %v1452_v20 = vld [vmem:[%s6171_s7 + $0x130] sm:$0xff]  ;;  %v1435_v50 = vld [vmem:[%s6171_s7 + $0xa8] sm:$0xff] }
 0x1a6   : > { %3766 = vmatpush.bf16.msk.msra.mxu0 %vm5167_vm1, %v3765_v49  ;;  %3922 = vmatpush.bf16.msk.msra.mxu2 %vm5167_vm1, %v3765_v49 }
 0x1a7   : > { %1491 = vperm.xlu2 %3949, %v1421_v48   ;;  %1481 = vperm.xlu1 %3948, %v1419_v37  }
 0x1a9   : > { %1571 = vperm.xlu0 %3947, %v1437_v24   ;;  %v3977_v21 = vpop.permute.xlu0 %3976  ;;  %v3987_v16 = vpop.permute.xlu2 %3986 }
 0x1aa   : > { %v3979_v25 = vunpack.i.h.bf16 %v3977_v21  ;;  %v3978_v51 = vunpack.i.l.bf16 %v3977_v21  ;;  %v3989_v48 = vunpack.i.h.bf16 %v3987_v16  ;;  %v3988_v37 = vunpack.i.l.bf16 %v3987_v16  ;;  %v1453_v16 = vld [vmem:[%s6171_s7 + $0x138] sm:$0xff] }
 0x1ac   : > { %v3789_v49 = vpack.c.bf16 %v3979_v25, %v3978_v51  ;;  %v3792_v25 = vpack.c.bf16 %v3989_v48, %v3988_v37  ;;  %v1415_v51 = vld [vmem:[%s6171_s7 + $0x8] sm:$0xff] }
 0x1af   : > { %1371 = vperm.xlu2 %3949, %v1173_v52   ;;  %1471 = vperm.xlu1 %3948, %v1417_v30  }
 0x1b1   : > { %1456 = vperm.xlu0 %3947, %v1414_v55   ;;  %v3967_v23 = vpop.permute.xlu1 %3966  ;;  %v4002_v33 = vpop.permute.xlu2 %4001 }
 0x1b2   : > { %v3969_v40 = vunpack.i.h.bf16 %v3967_v23  ;;  %v3968_v32 = vunpack.i.l.bf16 %v3967_v23  ;;  %v3992_v60 = vpop.permute.xlu0 %3991 }
 0x1b3   : > { %v3994_v23 = vunpack.i.h.bf16 %v3992_v60 }
 0x1b4   : > { %v3786_v0 = vpack.c.bf16 %v3969_v40, %v3968_v32  ;;  %v3993_v40 = vunpack.i.l.bf16 %v3992_v60  ;;  %v1432_v60 = vld [vmem:[%s6171_s7 + $0x90] sm:$0xff] }
 0x1b6   : > { %3787 = vmatpush.bf16.msk.msra.mxu1 %vm5167_vm1, %v3786_v0  ;;  %3929 = vmatpush.bf16.msk.msra.mxu3 %vm5167_vm1, %v3786_v0  ;;  %v3771_v0 = vpack.c.bf16 %v3994_v23, %v3993_v40  ;;  %v5291_v23 = vld [vmem:[%s6164_s0 + $0x38] sm:$0xff] }
 0x1b7   : > { %1566 = vperm.xlu2 %3949, %v1436_v28   ;;  %1646 = vperm.xlu1 %3948, %v1452_v20   ;;  %v4004_v28 = vunpack.i.h.bf16 %v4002_v33  ;;  %v4003_v20 = vunpack.i.l.bf16 %v4002_v33  ;;  %v5286_v33 = vld [vmem:[%s6164_s0 + $0x30] sm:$0xff] }
 0x1b9   : > { %1561 = vperm.xlu0 %3947, %v1435_v50   ;;  %v3982_v24 = vpop.permute.xlu1 %3981  ;;  %v5247_v21 = vpop.permute.xlu2 %4016 }
 0x1ba   : > { %v3984_v52 = vunpack.i.h.bf16 %v3982_v24  ;;  %v3983_v30 = vunpack.i.l.bf16 %v3982_v24  ;;  %3790 = vmatpush.bf16.msk.msra.mxu1 %vm5167_vm1, %v3789_v49  ;;  %3930 = vmatpush.bf16.msk.msra.mxu3 %vm5167_vm1, %v3789_v49 }
 0x1bb   : > { %v4007_v55 = vpop.permute.xlu0 %4006 }
 0x1bc   : > { %v3768_v32 = vpack.c.bf16 %v3984_v52, %v3983_v30  ;;  %v3774_v52 = vpack.c.bf16 %v4004_v28, %v4003_v20  ;;  %v4009_v40 = vunpack.i.h.bf16 %v4007_v55  ;;  %v6303_v28 = vld [vmem:[#allocation10_spill] sm:$0xff] }
 0x1bd   : > { %v661_v20 = vmul.f32 %v6303_v28, %v5291_v23 }
 0x1be   : > { %3769 = vmatpush.bf16.msk.msra.mxu0 %vm5167_vm1, %v3768_v32  ;;  %3923 = vmatpush.bf16.msk.msra.mxu2 %vm5167_vm1, %v3768_v32  ;;  %v4008_v32 = vunpack.i.l.bf16 %v4007_v55  ;;  %v6302_v55 = vld [vmem:[#allocation11_spill] sm:$0xff] }
 0x1bf   : > { %3793 = vmatpush.bf16.msk.msra.mxu1 %vm5167_vm1, %v3792_v25  ;;  %3931 = vmatpush.bf16.msk.msra.mxu3 %vm5167_vm1, %v3792_v25  ;;  %v1434_v25 = vld [vmem:[%s6171_s7 + $0xa0] sm:$0xff] }
 0x1c0   : > { %1651 = vperm.xlu2 %3949, %v1453_v16   ;;  %1461 = vperm.xlu1 %3948, %v1415_v51   ;;  %v1450_v16 = vld [vmem:[%s6171_s7 + $0x120] sm:$0xff]  ;;  %v1449_v51 = vld [vmem:[%s6171_s7 + $0x118] sm:$0xff] }
 0x1c1   : > { %1546 = vperm.xlu0 %3947, %v1432_v60   ;;  %v3997_v50 = vpop.permute.xlu1 %3996  ;;  %v5272_v49 = vpop.permute.xlu2 %4031  ;;  %v660_v60 = vmul.f32 %v6302_v55, %v5286_v33 }
 0x1c2   : > { %v3999_v48 = vunpack.i.h.bf16 %v3997_v50  ;;  %v3998_v37 = vunpack.i.l.bf16 %v3997_v50  ;;  %3772 = vmatpush.bf16.msk.msra.mxu0 %vm5167_vm1, %v3771_v0  ;;  %3924 = vmatpush.bf16.msk.msra.mxu2 %vm5167_vm1, %v3771_v0  ;;  %v5316_v0 = vld [vmem:[%s6164_s0 + $0x28] sm:$0xff]  ;;  %v3798_v50 = vpack.c.bf16 %v4009_v40, %v4008_v32  ;;  %v5345_v40 = vld [vmem:[%s6164_s0 + $0x10] sm:$0xff] }
 0x1c3   : > { %v5274_v24 = vpop.permute.xlu0 %4021  ;;  %v6305_v32 = vld [vmem:[#allocation3_spill] sm:$0xff]  ;;  %v656_v39 = vmul.f32 %v6310_v3, %v5345_v40  ;;  %v5388_v3 = vld [vmem:[%s6164_s0] sm:$0xff] }
 0x1c4   : > { %v3795_v30 = vpack.c.bf16 %v3999_v48, %v3998_v37  ;;  %v4019_v48 = vunpack.i.h.bf16 %v5247_v21  ;;  %v4018_v37 = vunpack.i.l.bf16 %v5247_v21  ;;  %v5340_v21 = vld [vmem:[%s6164_s0 + $0x18] sm:$0xff] }
 0x1c6   : > { %3775 = vmatpush.bf16.msk.msra.mxu0 %vm5167_vm1, %v3774_v52  ;;  %3925 = vmatpush.bf16.msk.msra.mxu2 %vm5167_vm1, %v3774_v52  ;;  %v3801_v9 = vpack.c.bf16 %v4019_v48, %v4018_v37  ;;  %v3560_v48 = vld [vmem:[%s5335_s10 + $0x190] sm:$0xf]  ;;  %v3875_v37 = vld [vmem:[%s5335_s10 + $0x1b4] sm:$0xf0] }
 0x1c7   : > { %3796 = vmatpush.bf16.msk.msra.mxu1 %vm5167_vm1, %v3795_v30  ;;  %3932 = vmatpush.bf16.msk.msra.mxu3 %vm5167_vm1, %v3795_v30  ;;  %v6304_v30 = vld [vmem:[#allocation27_spill] sm:$0xff] }
 0x1c8   : > { %1556 = vperm.xlu2 %3949, %v1434_v25   ;;  %1636 = vperm.xlu1 %3948, %v1450_v16   ;;  %v940_v5 = vadd.f32 %v6304_v30, %v660_v60  ;;  %v659_v16 = vmul.f32 %v6305_v32, %v5316_v0  ;;  %v4023_v30 = vunpack.i.l.bf16 %v5274_v24  ;;  %v1451_v32 = vld [vmem:[%s6171_s7 + $0x128] sm:$0xff] }
 0x1c9   : > { %1631 = vperm.xlu0 %3947, %v1449_v51   ;;  %v5322_v52 = vpop.permute.xlu2 %4046  ;;  %v4012_v55 = vpop.permute.xlu1 %4011  ;;  %v6306_v51 = vld [vmem:[#allocation18_spill] sm:$0xff] }
 0x1ca   : > { %v4014_v4 = vunpack.i.h.bf16 %v4012_v55  ;;  %v4013_v28 = vunpack.i.l.bf16 %v4012_v55  ;;  %v941_v60 = vadd.f32 %v6306_v51, %v661_v20  ;;  %v4024_v55 = vunpack.i.h.bf16 %v5274_v24  ;;  %v1433_v20 = vld [vmem:[%s6171_s7 + $0x98] sm:$0xff]  ;;  %v3360_v24 = vld [vmem:[%s5335_s10] sm:$0xf] }
 0x1cb   : > { %v5330_v25 = vpop.permute.xlu0 %4036  ;;  %3799 = vmatpush.bf16.msk.msra.mxu1 %vm5167_vm1, %v3798_v50  ;;  %3933 = vmatpush.bf16.msk.msra.mxu3 %vm5167_vm1, %v3798_v50  ;;  %v1446_v50 = vld [vmem:[%s6171_s7 + $0x100] sm:$0xff]  ;;  %v980_v51 = vmax.f32 %v940_v5, 0.0  ;;  %v6311_v5 = vld [vmem:[#allocation17_spill] sm:$0xff] }
 0x1cc   : > { %v3777_v45 = vpack.c.bf16 %v4014_v4, %v4013_v28  ;;  %v939_v4 = vadd.f32 %v6308_v1, %v659_v16  ;;  %v6309_v28 = vld [vmem:[#allocation8_spill] sm:$0xff]  ;;  %v981_v1 = vmax.f32 %v941_v60, 0.0  ;;  %v938_v16 = vadd.f32 %v6311_v5, %v658_v19 }
 0x1cd   : > { %v657_v22 = vmul.f32 %v6309_v28, %v5340_v21  ;;  %v3780_v28 = vpack.c.bf16 %v4024_v55, %v4023_v30  ;;  %v3361_v5 = vor.u32 %v3825_v38, %v3360_v24  ;;  %v3561_v55 = vor.u32 %v3875_v37, %v3560_v48  ;;  %v3362_v24 = vld [vmem:[%s5335_s10 + $0x28] sm:$0xf0]  ;;  %v3870_v37 = vld [vmem:[%s5335_s10 + $0x194] sm:$0xf] }
 0x1ce   : > { %3778 = vmatpush.bf16.msk.msra.mxu0 %vm5167_vm1, %v3777_v45  ;;  %3926 = vmatpush.bf16.msk.msra.mxu2 %vm5167_vm1, %v3777_v45  ;;  %v6312_v45 = vld [vmem:[#allocation23_spill] sm:$0xff]  ;;  %v1895_v60 = vpack.c.bf16 %v981_v1, %v980_v51  ;;  %v979_v30 = vmax.f32 %v939_v4, 0.0  ;;  %v3820_v51 = vld [vmem:[%s5335_s10 + $0x4] sm:$0xf]  ;;  %v6315_v4 = vld [vmem:[#allocation9_spill] sm:$0xff] }
 0x1cf   : > { %3802 = vmatpush.bf16.msk.msra.mxu1 %vm5167_vm1, %v3801_v9  ;;  %3934 = vmatpush.bf16.msk.msra.mxu3 %vm5167_vm1, %v3801_v9  ;;  %v936_v11 = vadd.f32 %v6312_v45, %v656_v39  ;;  %v937_v46 = vadd.f32 %v6313_v29, %v657_v22  ;;  %v6314_v22 = vld [vmem:[#allocation7_spill] sm:$0xff]  ;;  %v655_v38 = vmul.f32 %v6315_v4, %v5395_v56  ;;  %v3562_v1 = vld [vmem:[%s5335_s10 + $0x1b8] sm:$0xf0]  ;;  %v1430_v45 = vld [vmem:[%s6171_s7 + $0x80] sm:$0xff]  ;;  %v4034_v4 = vunpack.i.h.bf16 %v5272_v49 }
 0x1d0   : > { %1641 = vperm.xlu2 %3949, %v1451_v32   ;;  %1551 = vperm.xlu1 %3948, %v1433_v20   ;;  %v654_v20 = vmul.f32 %v6314_v22, %v5388_v3 }
 0x1d1   : > { %1616 = vperm.xlu0 %3947, %v1446_v50   ;;  %v5397_v19 = vpop.permute.xlu2 %1286  ;;  %v4027_v9 = vpop.permute.xlu1 %4026  ;;  %v978_v50 = vmax.f32 %v938_v16, 0.0  ;;  %v976_v16 = vmax.f32 %v936_v11, 0.0 }
 0x1d2   : > { %v4029_v39 = vunpack.i.h.bf16 %v4027_v9  ;;  %v4028_v32 = vunpack.i.l.bf16 %v4027_v9  ;;  %3781 = vmatpush.bf16.msk.msra.mxu0 %vm5167_vm1, %v3780_v28  ;;  %3927 = vmatpush.bf16.msk.msra.mxu2 %vm5167_vm1, %v3780_v28  ;;  %v1448_v28 = vld [vmem:[%s6171_s7 + $0x110] sm:$0xff]  ;;  %v977_v9 = vmax.f32 %v937_v46, 0.0 }
 0x1d3   : > { %v5399_v29 = vpop.permute.xlu0 %1276 }
 0x1d4   : > { %v3804_v48 = vpack.c.bf16 %v4029_v39, %v4028_v32  ;;  %v3565_v39 = vor.u32 %v3870_v37, %v3562_v1  ;;  %v1426_v1 = vld [vmem:[%s6171_s7 + $0x60] sm:$0xff] }
 0x1d5   : > { %2680 = vmatmul.bf16.vlgmr.msra.gmra.mxu0 %v3361_v5  ;;  %2705 = vmatmul.bf16.vlgmr.msra.gmra.mxu2 %v3561_v55  ;;  %v1429_v5 = vld [vmem:[%s6171_s7 + $0x78] sm:$0xff]  ;;  %v3365_v55 = vor.u32 %v3820_v51, %v3362_v24  ;;  %v6319_v24 = vld [vmem:[#allocation36_spill] sm:$0xff] }
 0x1d6   : > { %2790 = vmatpush.bf16.msrb.mxu2 %v1895_v60  ;;  %2908 = vmatpush.bf16.msrb.mxu0 %v5074_v35  ;;  %v1894_v35 = vpack.c.bf16 %v979_v30, %v978_v50  ;;  %v6316_v60 = vld [vmem:[#allocation19_spill] sm:$0xff]  ;;  %v6317_v30 = vld [vmem:[#allocation16_spill] sm:$0xff] }
 0x1d7   : > { %v934_v22 = vadd.f32 %v6316_v60, %v654_v20  ;;  %3805 = vmatpush.bf16.msk.msra.mxu1 %vm5167_vm1, %v3804_v48  ;;  %3935 = vmatpush.bf16.msk.msra.mxu3 %vm5167_vm1, %v3804_v48  ;;  %v935_v11 = vadd.f32 %v6317_v30, %v655_v38  ;;  %v1893_v20 = vpack.c.bf16 %v977_v9, %v976_v16  ;;  %v1431_v38 = vld [vmem:[%s6171_s7 + $0x88] sm:$0xff]  ;;  %v6323_v60 = vld [vmem:[#allocation37_spill] sm:$0xff] }
 0x1d8   : > { %1626 = vperm.xlu2 %3949, %v1448_v28   ;;  %1536 = vperm.xlu1 %3948, %v1430_v45   ;;  %v1447_v48 = vld [vmem:[%s6171_s7 + $0x108] sm:$0xff]  ;;  %v3400_v28 = vld [vmem:[%s5335_s10 + $0x50] sm:$0xf]  ;;  %v3835_v45 = vld [vmem:[%s5335_s10 + $0x74] sm:$0xf0] }
 0x1d9   : > { %1531 = vperm.xlu0 %3947, %v1429_v5   ;;  %v5431_v46 = vpop.permute.xlu2 %1301  ;;  %v5433_v32 = vpop.permute.xlu1 %4041  ;;  %v974_v50 = vmax.f32 %v934_v22, 0.0  ;;  %v5466_v9 = vld [vmem:[%s6164_s0 + $0x68] sm:$0xff] }
 0x1da   : > { %2791 = vmatpush.bf16.msrb.mxu2 %v1894_v35  ;;  %6318 = vst [vmem:[#allocation11_spill] sm:$0xff] %v5431_v46  ;;  %2909 = vmatpush.bf16.msrb.mxu0 %v5045_v53  ;;  %v4033_v53 = vunpack.i.l.bf16 %v5272_v49  ;;  %v3885_v49 = vld [vmem:[%s5335_s10 + $0x204] sm:$0xf0] }
 0x1db   : > { %2967 = vmatpush.bf16.msrb.mxu1 %v4749_v6  ;;  %2849 = vmatpush.bf16.msrb.mxu3 %v4867_v17  ;;  %v5436_v51 = vpop.permute.xlu0 %1291  ;;  %v975_v6 = vmax.f32 %v935_v11, 0.0  ;;  %v5442_v17 = vld [vmem:[%s6164_s0 + $0x60] sm:$0xff]  ;;  %v6321_v35 = vld [vmem:[#allocation15_spill] sm:$0xff]  ;;  %6322 = vst [vmem:[#allocation27_spill] sm:$0xff] %v5466_v9  ;;  %v5485_v11 = vld [vmem:[%s6164_s0 + $0x50] sm:$0xff] }
 0x1dc   : > { %2739 = vmatmul.bf16.vlgmr.msra.gmra.mxu1 %v3365_v55  ;;  %2764 = vmatmul.bf16.vlgmr.msra.gmra.mxu3 %v3565_v39  ;;  %6320 = vst [vmem:[#allocation10_spill] sm:$0xff] %v5442_v17  ;;  %v666_v16 = vmul.f32 %v6321_v35, %v5442_v17  ;;  %v3401_v55 = vor.u32 %v3835_v45, %v3400_v28  ;;  %v5476_v39 = vld [vmem:[%s6164_s0 + $0x58] sm:$0xff]  ;;  %v1444_v45 = vld [vmem:[%s6171_s7 + $0xf0] sm:$0xff]  ;;  %v5515_v35 = vld [vmem:[%s6164_s0 + $0x40] sm:$0xff] }
 0x1dd   : > { %v1892_v37 = vpack.c.bf16 %v975_v6, %v974_v50  ;;  %6324 = vst [vmem:[#allocation3_spill] sm:$0xff] %v5476_v39  ;;  %v6326_v50 = vld [vmem:[#allocation34_spill] sm:$0xff]  ;;  %v6329_v28 = vld [vmem:[#allocation33_spill] sm:$0xff] }
 0x1de   : > { %2792 = vmatpush.bf16.msrb.mxu2 %v1893_v20  ;;  %2910 = vmatpush.bf16.msrb.mxu0 %v5047_v2  ;;  %v3807_v2 = vpack.c.bf16 %v4034_v4, %v4033_v53  ;;  %v946_v6 = vadd.f32 %v6326_v50, %v666_v16  ;;  %v4038_v4 = vunpack.i.l.bf16 %v5330_v25  ;;  %v1428_v53 = vld [vmem:[%s6171_s7 + $0x70] sm:$0xff]  ;;  %v1443_v16 = vld [vmem:[%s6171_s7 + $0xe8] sm:$0xff] }
 0x1df   : > { %2968 = vmatpush.bf16.msrb.mxu1 %v6319_v24  ;;  %2850 = vmatpush.bf16.msrb.mxu3 %v4827_v54  ;;  %v3600_v54 = vld [vmem:[%s5335_s10 + $0x1e0] sm:$0xf] }
 0x1e0   : > { %1541 = vperm.xlu2 %3949, %v1431_v38   ;;  %1621 = vperm.xlu1 %3948, %v1447_v48   ;;  %v3601_v20 = vor.u32 %v3885_v49, %v3600_v54  ;;  %v6327_v24 = vld [vmem:[#allocation14_spill] sm:$0xff]  ;;  %v3830_v38 = vld [vmem:[%s5335_s10 + $0x54] sm:$0xf]  ;;  %v3402_v48 = vld [vmem:[%s5335_s10 + $0x78] sm:$0xf0] }
 0x1e1   : > { %1516 = vperm.xlu0 %3947, %v1426_v1   ;;  %v5469_v22 = vpop.permute.xlu2 %1316  ;;  %v5471_v5 = vpop.permute.xlu1 %1281  ;;  %v3880_v54 = vld [vmem:[%s5335_s10 + $0x1e4] sm:$0xf]  ;;  %v3602_v49 = vld [vmem:[%s5335_s10 + $0x208] sm:$0xf0] }
 0x1e2   : > { %2793 = vmatpush.bf16.msrb.mxu2 %v1892_v37  ;;  %2911 = vmatpush.bf16.msrb.mxu0 %v5001_v27  ;;  %v4039_v27 = vunpack.i.h.bf16 %v5330_v25  ;;  %v6328_v37 = vld [vmem:[#allocation5_spill] sm:$0xff]  ;;  %v5510_v25 = vld [vmem:[%s6164_s0 + $0x48] sm:$0xff] }
 0x1e3   : > { %2969 = vmatpush.bf16.msrb.mxu1 %v6323_v60  ;;  %2851 = vmatpush.bf16.msrb.mxu3 %v4780_v36  ;;  %v5480_v30 = vpop.permute.xlu0 %1306  ;;  %v667_v36 = vmul.f32 %v6327_v24, %v5466_v9  ;;  %v665_v1 = vmul.f32 %v6328_v37, %v5476_v39  ;;  %v3405_v24 = vor.u32 %v3830_v38, %v3402_v48  ;;  %v986_v37 = vmax.f32 %v946_v6, 0.0  ;;  %v6333_v9 = vld [vmem:[#allocation13_spill] sm:$0xff]  ;;  %v6337_v38 = vld [vmem:[#allocation32_spill] sm:$0xff] }
 0x1e4   : > { %6325 = vst [vmem:[#allocation18_spill] sm:$0xff] %v5480_v30  ;;  %v3810_v30 = vpack.c.bf16 %v4039_v27, %v4038_v4  ;;  %v4044_v39 = vunpack.i.h.bf16 %v5433_v32  ;;  %v663_v17 = vmul.f32 %v6333_v9, %v5510_v25  ;;  %v6336_v4 = vld [vmem:[#allocation20_spill] sm:$0xff] }
 0x1e5   : > { %2685 = vmatmul.bf16.gmra.mxu0 %v3401_v55  ;;  %v6331_v55 = vld [vmem:[#allocation12_spill] sm:$0xff]  ;;  %2710 = vmatmul.bf16.gmra.mxu2 %v3601_v20 }
 0x1e6   : > { %3808 = vmatpush.bf16.msk.msrb.mxu2 %vm5167_vm1, %v3807_v2  ;;  %2912 = vmatpush.bf16.msrb.mxu0 %v4942_v61  ;;  %v6330_v2 = vld [vmem:[#allocation25_spill] sm:$0xff]  ;;  %v664_v50 = vmul.f32 %v6331_v55, %v5485_v11  ;;  %v3605_v61 = vor.u32 %v3880_v54, %v3602_v49  ;;  %v4049_v54 = vunpack.i.h.bf16 %v5322_v52 }
 0x1e7   : > { %2970 = vmatpush.bf16.msrb.mxu1 %v6329_v28  ;;  %2852 = vmatpush.bf16.msrb.mxu3 %v4782_v58  ;;  %v947_v60 = vadd.f32 %v6330_v2, %v667_v36  ;;  %v6332_v28 = vld [vmem:[#allocation35_spill] sm:$0xff]  ;;  %v4043_v58 = vunpack.i.l.bf16 %v5433_v32  ;;  %v6334_v36 = vld [vmem:[#allocation4_spill] sm:$0xff]  ;;  %v6335_v55 = vld [vmem:[#allocation29_spill] sm:$0xff] }
 0x1e8   : > { %v945_v46 = vadd.f32 %v6332_v28, %v665_v1  ;;  %1526 = vperm.xlu2 %3949, %v1428_v53   ;;  %1606 = vperm.xlu1 %3948, %v1444_v45   ;;  %v662_v2 = vmul.f32 %v6334_v36, %v5515_v35  ;;  %v944_v9 = vadd.f32 %v6336_v4, %v664_v50  ;;  %v6338_v1 = vld [vmem:[#allocation31_spill] sm:$0xff] }
 0x1e9   : > { %1601 = vperm.xlu0 %3947, %v1443_v16   ;;  %v5533_v20 = vpop.permute.xlu2 %1331  ;;  %v5535_v6 = vpop.permute.xlu1 %1296  ;;  %v987_v27 = vmax.f32 %v947_v60, 0.0  ;;  %v943_v45 = vadd.f32 %v6338_v1, %v663_v17  ;;  %v6339_v16 = vld [vmem:[#allocation30_spill] sm:$0xff]  ;;  %v3845_v60 = vld [vmem:[%s5335_s10 + $0xc4] sm:$0xf0]  ;;  %v3890_v1 = vld [vmem:[%s5335_s10 + $0x234] sm:$0xf] }
 0x1ea   : > { %3811 = vmatpush.bf16.msk.msrb.mxu2 %vm5167_vm1, %v3810_v30  ;;  %2913 = vmatpush.bf16.msrb.mxu0 %v4949_v10  ;;  %v985_v53 = vmax.f32 %v945_v46, 0.0  ;;  %v942_v48 = vadd.f32 %v6337_v38, %v662_v2  ;;  %v4048_v30 = vunpack.i.l.bf16 %v5322_v52  ;;  %v1445_v10 = vld [vmem:[%s6171_s7 + $0xf8] sm:$0xff]  ;;  %v1427_v46 = vld [vmem:[%s6171_s7 + $0x68] sm:$0xff]  ;;  %v1440_v52 = vld [vmem:[%s6171_s7 + $0xd0] sm:$0xff]  ;;  %v984_v17 = vmax.f32 %v944_v9, 0.0 }
 0x1eb   : > { %2971 = vmatpush.bf16.msrb.mxu1 %v6335_v55  ;;  %2853 = vmatpush.bf16.msrb.mxu3 %v4751_v44  ;;  %v5540_v32 = vpop.permute.xlu0 %1321  ;;  %v3813_v44 = vpack.c.bf16 %v4044_v39, %v4043_v58  ;;  %v1898_v49 = vpack.c.bf16 %v987_v27, %v986_v37  ;;  %v3440_v39 = vld [vmem:[%s5335_s10 + $0xa0] sm:$0xf]  ;;  %v983_v28 = vmax.f32 %v943_v45, 0.0  ;;  %v3640_v55 = vld [vmem:[%s5335_s10 + $0x230] sm:$0xf] }
 0x1ec   : > { %2744 = vmatmul.bf16.gmra.mxu1 %v3405_v24  ;;  %2769 = vmatmul.bf16.gmra.mxu3 %v3605_v61  ;;  %v3816_v50 = vpack.c.bf16 %v4049_v54, %v4048_v30  ;;  %v1897_v24 = vpack.c.bf16 %v985_v53, %v984_v17  ;;  %v982_v37 = vmax.f32 %v942_v48, 0.0  ;;  %v6340_v58 = vld [vmem:[#allocation26_spill] sm:$0xff]  ;;  %v3441_v2 = vor.u32 %v3845_v60, %v3440_v39  ;;  %v3442_v38 = vld [vmem:[%s5335_s10 + $0xc8] sm:$0xf0]  ;;  %v6341_v48 = vld [vmem:[#allocation21_spill] sm:$0xff] }
 0x1ed   : > { %v3840_v53 = vld [vmem:[%s5335_s10 + $0xa4] sm:$0xf]  ;;  %v3642_v45 = vld [vmem:[%s5335_s10 + $0x258] sm:$0xf0] }
 0x1ee   : > { %3814 = vmatpush.bf16.msk.msrb.mxu2 %vm5167_vm1, %v3813_v44  ;;  %2914 = vmatpush.bf16.msrb.mxu0 %v4914_v62  ;;  %v3895_v62 = vld [vmem:[%s5335_s10 + $0x254] sm:$0xf0]  ;;  %v1896_v4 = vpack.c.bf16 %v983_v28, %v982_v37  ;;  %v3445_v54 = vor.u32 %v3840_v53, %v3442_v38  ;;  %v3645_v30 = vor.u32 %v3890_v1, %v3642_v45  ;;  %v6342_v53 = vld [vmem:[#allocation40_spill] sm:$0xff]  ;;  %v6343_v45 = vld [vmem:[#allocation38_spill] sm:$0xff] }
 0x1ef   : > { %2972 = vmatpush.bf16.msrb.mxu1 %v6339_v16  ;;  %2854 = vmatpush.bf16.msrb.mxu3 %v1898_v49  ;;  %v3641_v9 = vor.u32 %v3895_v62, %v3640_v55  ;;  %v3900_v55 = vld [vmem:[%s5335_s10 + $0x284] sm:$0xf]  ;;  %v3682_v62 = vld [vmem:[%s5335_s10 + $0x2a8] sm:$0xf0] }
 0x1f0   : > { %1611 = vperm.xlu2 %3949, %v1445_v10   ;;  %1521 = vperm.xlu1 %3948, %v1427_v46   ;;  %v1441_v10 = vld [vmem:[%s6171_s7 + $0xd8] sm:$0xff]  ;;  %v3480_v46 = vld [vmem:[%s5335_s10 + $0xf0] sm:$0xf]  ;;  %v3685_v38 = vor.u32 %v3900_v55, %v3682_v62  ;;  %v3910_v62 = vld [vmem:[%s5335_s10 + $0x2d4] sm:$0xf] }
 0x1f1   : > { %1586 = vperm.xlu0 %3947, %v1440_v52   ;;  %v5564_v61 = vpop.permute.xlu2 %1346  ;;  %v5566_v36 = vpop.permute.xlu1 %1311  ;;  %v3855_v52 = vld [vmem:[%s5335_s10 + $0x114] sm:$0xf0]  ;;  %v2054_v55 = vld [vmem:[%s5604_s12 + $0x10] sm:$0xff] }
 0x1f2   : > { %3817 = vmatpush.bf16.msk.msrb.mxu2 %vm5167_vm1, %v3816_v50  ;;  %2915 = vmatpush.bf16.msrb.mxu0 %v4869_v8  ;;  %v1424_v8 = vld [vmem:[%s6171_s7 + $0x50] sm:$0xff]  ;;  %v3481_v60 = vor.u32 %v3855_v52, %v3480_v46  ;;  %v3680_v50 = vld [vmem:[%s5335_s10 + $0x280] sm:$0xf]  ;;  %v1380_v46 = vmul.f32 %v5107_v18, %v5286_v33  ;;  %v3860_v33 = vld [vmem:[%s5335_s10 + $0x144] sm:$0xf] }
 0x1f3   : > { %2973 = vmatpush.bf16.msrb.mxu1 %v6340_v58  ;;  %2855 = vmatpush.bf16.msrb.mxu3 %v1897_v24  ;;  %v5572_v27 = vpop.permute.xlu0 %1336  ;;  %v3905_v24 = vld [vmem:[%s5335_s10 + $0x2a4] sm:$0xf0]  ;;  %v3850_v58 = vld [vmem:[%s5335_s10 + $0xf4] sm:$0xf] }
 0x1f4   : > { %v3681_v28 = vor.u32 %v3905_v24, %v3680_v50  ;;  %v3915_v24 = vld [vmem:[%s5335_s10 + $0x2f4] sm:$0xf0] }
 0x1f5   : > { %2690 = vmatmul.bf16.gmra.mxu0 %v3441_v2  ;;  %2715 = vmatmul.bf16.gmra.mxu2 %v3641_v9  ;;  %v3482_v2 = vld [vmem:[%s5335_s10 + $0x118] sm:$0xf0] }
 0x1f6   : > { %3026 = vmatpush.bf16.msra.mxu2 %v4940_v43  ;;  %v1423_v43 = vld [vmem:[%s6171_s7 + $0x48] sm:$0xff]  ;;  %v2055_v9 = vld [vmem:[%s5604_s12 + $0x18] sm:$0xff] }
 0x1f7   : > { %2974 = vmatpush.bf16.msrb.mxu1 %v6341_v48  ;;  %2856 = vmatpush.bf16.msrb.mxu3 %v1896_v4  ;;  %v1438_v4 = vld [vmem:[%s6171_s7 + $0xc0] sm:$0xff] }
 0x1f8   : > { %1596 = vperm.xlu2 %3949, %v1442_v31   ;;  %1506 = vperm.xlu1 %3948, %v1424_v8   ;;  %v1439_v8 = vld [vmem:[%s6171_s7 + $0xc8] sm:$0xff] }
 0x1f9   : > { %1501 = vperm.xlu0 %3947, %v1423_v43   ;;  %v5592_v44 = vpop.permute.xlu2 %1361  ;;  %v5594_v49 = vpop.permute.xlu1 %1326  ;;  %v2053_v43 = vld [vmem:[%s5604_s12 + $0x8] sm:$0xff] }
 0x1fa   : > { %3027 = vmatpush.bf16.msra.mxu2 %v4951_v34  ;;  %v1425_v34 = vld [vmem:[%s6171_s7 + $0x58] sm:$0xff] }
 0x1fb   : > { %v5596_v16 = vpop.permute.xlu0 %1351 }
 0x1fc   : > { %2749 = vmatmul.bf16.gmra.mxu1 %v3445_v54  ;;  %2774 = vmatmul.bf16.gmra.mxu3 %v3645_v30  ;;  %v1381_v54 = vmul.f32 %v5105_v12, %v5291_v23  ;;  %v2058_v30 = vld [vmem:[%s5604_s12 + $0x30] sm:$0xff] }
 0x1fd   : > { %v3720_v23 = vld [vmem:[%s5335_s10 + $0x2d0] sm:$0xf] }
 0x1fe   : > { %3028 = vmatpush.bf16.msra.mxu2 %v4916_v63  ;;  %v2052_v63 = vld [vmem:[%s5604_s12] sm:$0xff]  ;;  %v3721_v18 = vor.u32 %v3915_v24, %v3720_v23  ;;  %v1376_v23 = vmul.f32 %v5081_v57, %v5345_v40  ;;  %v3368_v57 = vld [vmem:[%s5335_s10 + $0x8] sm:$0xf]  ;;  %v3826_v40 = vld [vmem:[%s5335_s10 + $0x2c] sm:$0xf0] }
 0x200   : > { %1511 = vperm.xlu2 %3949, %v1425_v34   ;;  %1591 = vperm.xlu1 %3948, %v1441_v10   ;;  %v3520_v34 = vld [vmem:[%s5335_s10 + $0x140] sm:$0xf]  ;;  %v3865_v10 = vld [vmem:[%s5335_s10 + $0x164] sm:$0xf0] }
 0x201   : > { %2074 = vperm.xlu0 %3947, %v2052_v63   ;;  %v1492_v17 = vpop.permute.xlu2 %1491  ;;  %v5616_v39 = vpop.permute.xlu1 %1341  ;;  %v6344_v63 = vld [vmem:[#allocation39_spill] sm:$0xff]  ;;  %v3521_v12 = vor.u32 %v3865_v10, %v3520_v34 }
 0x202   : > { %3029 = vmatpush.bf16.msra.mxu2 %v4875_v41  ;;  %v1422_v41 = vld [vmem:[%s6171_s7 + $0x40] sm:$0xff]  ;;  %v1661_v52 = vadd.f32 %v1492_v17, %v1381_v54  ;;  %v3522_v17 = vld [vmem:[%s5335_s10 + $0x168] sm:$0xf0]  ;;  %v1379_v54 = vmul.f32 %v5094_v42, %v5316_v0 }
 0x203   : > { %v5620_v37 = vpop.permute.xlu0 %1366 }
 0x205   : > { %2695 = vmatmul.bf16.gmra.mxu0 %v3481_v60  ;;  %2720 = vmatmul.bf16.gmra.mxu2 %v3681_v28 }
 0x206   : > { %3030 = vmatpush.bf16.msra.mxu2 %v4881_v14  ;;  %v3485_v14 = vor.u32 %v3850_v58, %v3482_v2  ;;  %v1701_v2 = vmax.f32 %v1661_v52, 0.0 }
 0x208   : > { %1496 = vperm.xlu2 %3949, %v1422_v41   ;;  %1576 = vperm.xlu1 %3948, %v1438_v4   ;;  %v3722_v4 = vld [vmem:[%s5335_s10 + $0x2f8] sm:$0xf0] }
 0x209   : > { %2089 = vperm.xlu0 %3947, %v2055_v9   ;;  %v5635_v48 = vpop.permute.xlu2 %1371  ;;  %v5637_v31 = vpop.permute.xlu1 %1356  ;;  %v1378_v9 = vmul.f32 %v5096_v15, %v5328_v59  ;;  %v3725_v34 = vor.u32 %v3910_v62, %v3722_v4  ;;  %v4051_v15 = vld [vmem:[%s6164_s0 + $0xb8] sm:$0xff] }
 0x20a   : > { %3031 = vmatpush.bf16.msra.mxu2 %v6342_v53  ;;  %v1397_v59 = vmul.f32 %v4051_v15, %v5436_v51  ;;  %v2062_v15 = vld [vmem:[%s5604_s12 + $0x50] sm:$0xff] }
 0x20b   : > { %v1477_v1 = vpop.permute.xlu0 %1476 }
 0x20c   : > { %2754 = vmatmul.bf16.gmra.mxu1 %v3485_v14  ;;  %2779 = vmatmul.bf16.gmra.mxu3 %v3685_v38  ;;  %v2056_v14 = vld [vmem:[%s5604_s12 + $0x20] sm:$0xff]  ;;  %v2061_v38 = vld [vmem:[%s5604_s12 + $0x48] sm:$0xff] }
 0x20e   : > { %3032 = vmatpush.bf16.msra.mxu2 %v6343_v45  ;;  %v4050_v45 = vld [vmem:[%s6164_s0 + $0xb0] sm:$0xff] }
 0x210   : > { %1581 = vperm.xlu2 %3949, %v1439_v8   ;;  %2079 = vperm.xlu1 %3948, %v2053_v43   ;;  %v1396_v8 = vmul.f32 %v4050_v45, %v5397_v19  ;;  %v3525_v43 = vor.u32 %v3860_v33, %v3522_v17  ;;  %v1377_v33 = vmul.f32 %v5088_v7, %v5340_v21  ;;  %v2060_v45 = vld [vmem:[%s5604_s12 + $0x40] sm:$0xff] }
 0x211   : > { %2104 = vperm.xlu0 %3947, %v2058_v30   ;;  %v1567_v60 = vpop.permute.xlu2 %1566  ;;  %v1487_v50 = vpop.permute.xlu1 %1486  ;;  %v1658_v30 = vadd.f32 %v1477_v1, %v1378_v9 }
 0x212   : > { %3033 = vmatpush.bf16.msra.mxu2 %v6344_v63  ;;  %v1660_v28 = vadd.f32 %v1487_v50, %v1380_v46  ;;  %v1676_v10 = vadd.f32 %v1567_v60, %v1396_v8  ;;  %v2057_v60 = vld [vmem:[%s5604_s12 + $0x28] sm:$0xff] }
 0x213   : > { %v1467_v58 = vpop.permute.xlu0 %1466  ;;  %v1698_v46 = vmax.f32 %v1658_v30, 0.0  ;;  %v3821_v8 = vld [vmem:[%s5335_s10 + $0xc] sm:$0xf] }
 0x214   : > { %v1700_v41 = vmax.f32 %v1660_v28, 0.0  ;;  %v1716_v50 = vmax.f32 %v1676_v10, 0.0  ;;  %v2064_v28 = vld [vmem:[%s5604_s12 + $0x60] sm:$0xff]  ;;  %v1656_v17 = vadd.f32 %v1467_v58, %v1376_v23 }
 0x215   : > { %2700 = vmatmul.bf16.gmra.mxu0 %v3521_v12  ;;  %2725 = vmatmul.bf16.gmra.mxu2 %v3721_v18  ;;  %v2059_v12 = vld [vmem:[%s5604_s12 + $0x38] sm:$0xff]  ;;  %v4053_v10 = vld [vmem:[%s6164_s0 + $0xa0] sm:$0xff] }
 0x216   : > { %v1935_v53 = vpack.c.bf16 %v1701_v2, %v1700_v41  ;;  %v3376_v2 = vld [vmem:[%s5335_s10 + $0x10] sm:$0xf]  ;;  %v3827_v41 = vld [vmem:[%s5335_s10 + $0x34] sm:$0xf0]  ;;  %v1696_v21 = vmax.f32 %v1656_v17, 0.0 }
 0x217   : > { %v3377_v62 = vor.u32 %v3827_v41, %v3376_v2  ;;  %v2063_v2 = vld [vmem:[%s5604_s12 + $0x58] sm:$0xff]  ;;  %v2065_v41 = vld [vmem:[%s5604_s12 + $0x68] sm:$0xff]  ;;  %v3416_v17 = vld [vmem:[%s5335_s10 + $0x60] sm:$0xf] }
 0x218   : > { %2084 = vperm.xlu2 %3949, %v2054_v55   ;;  %2094 = vperm.xlu1 %3948, %v2056_v14   ;;  %v3822_v14 = vld [vmem:[%s5335_s10 + $0x14] sm:$0xf] }
 0x219   : > { %2119 = vperm.xlu0 %3947, %v2061_v38   ;;  %v1482_v19 = vpop.permute.xlu1 %1481  ;;  %3085 = vmatpush.bf16.msra.mxu3 %v1935_v53  ;;  %v3369_v53 = vor.u32 %v3826_v40, %v3368_v57  ;;  %v3378_v38 = vld [vmem:[%s5335_s10 + $0x38] sm:$0xf0]  ;;  %v1374_v57 = vmul.f32 %v5064_v13, %v5388_v3 }
 0x21a   : > { %v1652_v42 = vpop.permute.xlu2 %1651  ;;  %v1659_v0 = vadd.f32 %v1482_v19, %v1379_v54  ;;  %v4052_v54 = vld [vmem:[%s6164_s0 + $0x138] sm:$0xff]  ;;  %v1394_v19 = vmul.f32 %v4053_v10, %v5399_v29 }
 0x21b   : > { %v1572_v1 = vpop.permute.xlu0 %1571  ;;  %v1413_v30 = vmul.f32 %v4052_v54, %v5635_v48 }
 0x21c   : > { %v1677_v63 = vadd.f32 %v1572_v1, %v1397_v59  ;;  %2759 = vmatmul.bf16.gmra.mxu1 %v3525_v43  ;;  %v1699_v52 = vmax.f32 %v1659_v0, 0.0  ;;  %2784 = vmatmul.bf16.gmra.mxu3 %v3725_v34  ;;  %v3370_v43 = vld [vmem:[%s5335_s10 + $0x30] sm:$0xf0]  ;;  %v2067_v59 = vld [vmem:[%s5604_s12 + $0x78] sm:$0xff]  ;;  %v3381_v0 = vor.u32 %v3822_v14, %v3378_v38 }
 0x21d   : > { %v4054_v1 = vld [vmem:[%s6164_s0 + $0x130] sm:$0xff]  ;;  %v3373_v48 = vor.u32 %v3821_v8, %v3370_v43  ;;  %v3832_v8 = vld [vmem:[%s5335_s10 + $0x64] sm:$0xf]  ;;  %v3418_v43 = vld [vmem:[%s5335_s10 + $0x88] sm:$0xf0] }
 0x21e   : > { %v1717_v51 = vmax.f32 %v1677_v63, 0.0  ;;  %v1934_v24 = vpack.c.bf16 %v1699_v52, %v1698_v46  ;;  %v1412_v63 = vmul.f32 %v4054_v1, %v5620_v37  ;;  %v1693_v46 = vadd.f32 %v1652_v42, %v1413_v30  ;;  %v4055_v52 = vld [vmem:[%s6164_s0 + $0xa8] sm:$0xff]  ;;  %v2068_v30 = vld [vmem:[%s5604_s12 + $0x80] sm:$0xff] }
 0x21f   : > { %v3421_v10 = vor.u32 %v3832_v8, %v3418_v43  ;;  %v3458_v8 = vld [vmem:[%s5335_s10 + $0xd8] sm:$0xf0] }
 0x220   : > { %v1943_v18 = vpack.c.bf16 %v1717_v51, %v1716_v50  ;;  %2099 = vperm.xlu2 %3949, %v2057_v60   ;;  %3086 = vmatpush.bf16.msra.mxu3 %v1934_v24  ;;  %v1395_v50 = vmul.f32 %v4055_v52, %v5471_v5  ;;  %v1733_v23 = vmax.f32 %v1693_v46, 0.0 }
 0x221   : > { %2109 = vperm.xlu1 %3948, %v2059_v12   ;;  %2134 = vperm.xlu0 %3947, %v2064_v28   ;;  %v1472_v55 = vpop.permute.xlu1 %1471 }
 0x222   : > { %3144 = vmatpush.bf16.msra.mxu0 %v1943_v18  ;;  %v1557_v4 = vpop.permute.xlu2 %1556  ;;  %v1657_v9 = vadd.f32 %v1472_v55, %v1377_v33  ;;  %v2070_v33 = vld [vmem:[%s5604_s12 + $0x90] sm:$0xff]  ;;  %v3837_v55 = vld [vmem:[%s5335_s10 + $0x84] sm:$0xf0] }
 0x223   : > { %v1457_v7 = vpop.permute.xlu0 %1456  ;;  %v1674_v51 = vadd.f32 %v1557_v4, %v1394_v19  ;;  %v4057_v19 = vld [vmem:[%s6164_s0 + $0x110] sm:$0xff] }
 0x224   : > { %v1697_v58 = vmax.f32 %v1657_v9, 0.0  ;;  %v1654_v4 = vadd.f32 %v1457_v7, %v1374_v57  ;;  %v3408_v9 = vld [vmem:[%s5335_s10 + $0x58] sm:$0xf]  ;;  %v3410_v7 = vld [vmem:[%s5335_s10 + $0x80] sm:$0xf0] }
 0x225   : > { %2916 = vmatmul.bf16.vlgmr.msrb.gmra.mxu0 %v3377_v62  ;;  %2798 = vmatmul.bf16.vlgmr.msrb.gmra.mxu2 %v3369_v53  ;;  %v1714_v28 = vmax.f32 %v1674_v51, 0.0  ;;  %v1375_v62 = vmul.f32 %v5083_v26, %v5395_v56  ;;  %v3831_v56 = vld [vmem:[%s5335_s10 + $0x5c] sm:$0xf] }
 0x226   : > { %v1933_v34 = vpack.c.bf16 %v1697_v58, %v1696_v21  ;;  %v3836_v21 = vld [vmem:[%s5335_s10 + $0x7c] sm:$0xf0]  ;;  %v3417_v58 = vor.u32 %v3837_v55, %v3416_v17  ;;  %v1694_v54 = vmax.f32 %v1654_v4, 0.0  ;;  %v3413_v1 = vor.u32 %v3831_v56, %v3410_v7  ;;  %v6346_v55 = vld [vmem:[#allocation53_spill] sm:$0xff]  ;;  %v3448_v4 = vld [vmem:[%s5335_s10 + $0xa8] sm:$0xf] }
 0x227   : > { %v3409_v38 = vor.u32 %v3836_v21, %v3408_v9  ;;  %v3846_v9 = vld [vmem:[%s5335_s10 + $0xcc] sm:$0xf0]  ;;  %v3450_v56 = vld [vmem:[%s5335_s10 + $0xd0] sm:$0xf0]  ;;  %v4062_v7 = vld [vmem:[%s6164_s0 + $0x88] sm:$0xff] }
 0x228   : > { %2114 = vperm.xlu2 %3949, %v2060_v45   ;;  %3087 = vmatpush.bf16.msra.mxu3 %v1933_v34  ;;  %v2066_v45 = vld [vmem:[%s5604_s12 + $0x70] sm:$0xff]  ;;  %v4056_v34 = vld [vmem:[%s6164_s0 + $0x128] sm:$0xff] }
 0x229   : > { %2124 = vperm.xlu1 %3948, %v2062_v15   ;;  %2149 = vperm.xlu0 %3947, %v2067_v59   ;;  %v1647_v29 = vpop.permute.xlu1 %1646  ;;  %v1411_v15 = vmul.f32 %v4056_v34, %v5592_v44  ;;  %v4059_v44 = vld [vmem:[%s6164_s0 + $0x118] sm:$0xff] }
 0x22a   : > { %v1642_v37 = vpop.permute.xlu2 %1641  ;;  %v1692_v42 = vadd.f32 %v1647_v29, %v1412_v63  ;;  %v4058_v63 = vld [vmem:[%s6164_s0 + $0x120] sm:$0xff] }
 0x22b   : > { %v1562_v60 = vpop.permute.xlu0 %1561  ;;  %v1410_v46 = vmul.f32 %v4058_v63, %v5637_v31  ;;  %v4064_v63 = vld [vmem:[%s6164_s0 + $0x80] sm:$0xff] }
 0x22c   : > { %v1675_v12 = vadd.f32 %v1562_v60, %v1395_v50  ;;  %2975 = vmatmul.bf16.vlgmr.msrb.gmra.mxu1 %v3381_v0  ;;  %v1732_v24 = vmax.f32 %v1692_v42, 0.0  ;;  %2857 = vmatmul.bf16.vlgmr.msrb.gmra.mxu3 %v3373_v48  ;;  %v1408_v0 = vmul.f32 %v4057_v19, %v5564_v61  ;;  %v1691_v48 = vadd.f32 %v1642_v37, %v1411_v15  ;;  %v6350_v19 = vld [vmem:[#allocation47_spill] sm:$0xff] }
 0x22d   : > { %v1409_v61 = vmul.f32 %v4059_v44, %v5596_v16 }
 0x22e   : > { %v1715_v5 = vmax.f32 %v1675_v12, 0.0  ;;  %v1951_v18 = vpack.c.bf16 %v1733_v23, %v1732_v24  ;;  %v1731_v37 = vmax.f32 %v1691_v48, 0.0  ;;  %v2069_v12 = vld [vmem:[%s5604_s12 + $0x88] sm:$0xff]  ;;  %v2071_v23 = vld [vmem:[%s5604_s12 + $0x98] sm:$0xff] }
 0x230   : > { %v1942_v40 = vpack.c.bf16 %v1715_v5, %v1714_v28  ;;  %2129 = vperm.xlu2 %3949, %v2063_v2   ;;  %3203 = vmatpush.bf16.msra.mxu1 %v1951_v18  ;;  %v3456_v28 = vld [vmem:[%s5335_s10 + $0xb0] sm:$0xf]  ;;  %v3847_v5 = vld [vmem:[%s5335_s10 + $0xd4] sm:$0xf0] }
 0x231   : > { %2139 = vperm.xlu1 %3948, %v2065_v41   ;;  %2164 = vperm.xlu0 %3947, %v2070_v33   ;;  %v4060_v2 = vld [vmem:[%s6164_s0 + $0x90] sm:$0xff]  ;;  %v6345_v41 = vld [vmem:[#allocation54_spill] sm:$0xff]  ;;  %v3457_v21 = vor.u32 %v3847_v5, %v3456_v28 }
 0x232   : > { %3145 = vmatpush.bf16.msra.mxu0 %v1942_v40  ;;  %v1627_v13 = vpop.permute.xlu2 %1626  ;;  %v1462_v3 = vpop.permute.xlu1 %1461  ;;  %v1392_v18 = vmul.f32 %v4060_v2, %v6345_v41  ;;  %v4066_v5 = vld [vmem:[%s6164_s0 + $0x100] sm:$0xff] }
 0x233   : > { %v1655_v53 = vadd.f32 %v1462_v3, %v1375_v62  ;;  %v1547_v14 = vpop.permute.xlu0 %1546  ;;  %v1688_v52 = vadd.f32 %v1627_v13, %v1408_v0  ;;  %v6347_v62 = vld [vmem:[#allocation42_spill] sm:$0xff]  ;;  %v1406_v2 = vmul.f32 %v4066_v5, %v5572_v27  ;;  %v6356_v5 = vld [vmem:[#allocation27_spill] sm:$0xff] }
 0x234   : > { %v1672_v40 = vadd.f32 %v1547_v14, %v1392_v18  ;;  %v3841_v14 = vld [vmem:[%s5335_s10 + $0xac] sm:$0xf]  ;;  %v3496_v18 = vld [vmem:[%s5335_s10 + $0x100] sm:$0xf] }
 0x235   : > { %v1695_v26 = vmax.f32 %v1655_v53, 0.0  ;;  %2921 = vmatmul.bf16.gmra.mxu0 %v3417_v58  ;;  %2803 = vmatmul.bf16.gmra.mxu2 %v3409_v38  ;;  %v1728_v24 = vmax.f32 %v1688_v52, 0.0  ;;  %v3449_v38 = vor.u32 %v3846_v9, %v3448_v4  ;;  %v4065_v52 = vld [vmem:[%s6164_s0 + $0x78] sm:$0xff] }
 0x236   : > { %v1712_v43 = vmax.f32 %v1672_v40, 0.0  ;;  %v3488_v40 = vld [vmem:[%s5335_s10 + $0xf8] sm:$0xf] }
 0x237   : > { %v1932_v59 = vpack.c.bf16 %v1695_v26, %v1694_v54  ;;  %v6348_v26 = vld [vmem:[#allocation43_spill] sm:$0xff] }
 0x238   : > { %2144 = vperm.xlu2 %3949, %v2066_v45   ;;  %v3842_v45 = vld [vmem:[%s5335_s10 + $0xb4] sm:$0xf] }
 0x239   : > { %2154 = vperm.xlu1 %3948, %v2068_v30   ;;  %3088 = vmatpush.bf16.msra.mxu3 %v1932_v59  ;;  %v6349_v30 = vld [vmem:[#allocation50_spill] sm:$0xff]  ;;  %v3461_v59 = vor.u32 %v3842_v45, %v3458_v8  ;;  %v3498_v45 = vld [vmem:[%s5335_s10 + $0x128] sm:$0xf0] }
 0x23a   : > { %v1542_v50 = vpop.permute.xlu2 %1541  ;;  %v1637_v51 = vpop.permute.xlu1 %1636  ;;  %v1391_v34 = vmul.f32 %v4062_v7, %v6349_v30  ;;  %v4069_v30 = vld [vmem:[%s6164_s0 + $0xe0] sm:$0xff] }
 0x23b   : > { %v1690_v29 = vadd.f32 %v1637_v51, %v1410_v46  ;;  %v1632_v42 = vpop.permute.xlu0 %1631  ;;  %v6351_v46 = vld [vmem:[#allocation51_spill] sm:$0xff]  ;;  %v6353_v51 = vld [vmem:[#allocation52_spill] sm:$0xff] }
 0x23c   : > { %2980 = vmatmul.bf16.gmra.mxu1 %v3421_v10  ;;  %v1689_v31 = vadd.f32 %v1632_v42, %v1409_v61  ;;  %2862 = vmatmul.bf16.gmra.mxu3 %v3413_v1  ;;  %v4063_v10 = vld [vmem:[%s6164_s0 + $0x70] sm:$0xff]  ;;  %v3453_v1 = vor.u32 %v3841_v14, %v3450_v56  ;;  %v1390_v48 = vmul.f32 %v4064_v63, %v6351_v46  ;;  %v6352_v61 = vld [vmem:[#allocation41_spill] sm:$0xff] }
 0x23d   : > { %v1730_v60 = vmax.f32 %v1690_v29, 0.0  ;;  %3089 = vmatpush.bf16.msra.mxu3 %v5076_v47  ;;  %v4061_v47 = vld [vmem:[%s6164_s0 + $0x98] sm:$0xff]  ;;  %v1388_v0 = vmul.f32 %v4063_v10, %v6350_v19  ;;  %v1671_v44 = vadd.f32 %v1542_v50, %v1391_v34  ;;  %v1389_v29 = vmul.f32 %v4065_v52, %v6353_v51  ;;  %v4070_v10 = vld [vmem:[%s6164_s0 + $0xf0] sm:$0xff] }
 0x23e   : > { %v1729_v16 = vmax.f32 %v1689_v31, 0.0  ;;  %v1393_v57 = vmul.f32 %v4061_v47, %v6346_v55  ;;  %v4067_v47 = vld [vmem:[%s6164_s0 + $0x108] sm:$0xff]  ;;  %v1402_v34 = vmul.f32 %v4069_v30, %v5469_v22 }
 0x23f   : > { %v1950_v33 = vpack.c.bf16 %v1731_v37, %v1730_v60  ;;  %v1711_v50 = vmax.f32 %v1671_v44, 0.0  ;;  %v1407_v55 = vmul.f32 %v4067_v47, %v5616_v39  ;;  %v3851_v39 = vld [vmem:[%s5335_s10 + $0xfc] sm:$0xf] }
 0x240   : > { %v1949_v17 = vpack.c.bf16 %v1729_v16, %v1728_v24  ;;  %2159 = vperm.xlu2 %3949, %v2069_v12  }
 0x241   : > { %2169 = vperm.xlu1 %3948, %v2071_v23   ;;  %3090 = vmatpush.bf16.msra.mxu3 %v6347_v62  ;;  %v3856_v62 = vld [vmem:[%s5335_s10 + $0x11c] sm:$0xf0] }
 0x242   : > { %3204 = vmatpush.bf16.msra.mxu1 %v1950_v33  ;;  %v1527_v58 = vpop.permute.xlu2 %1526  ;;  %v1552_v13 = vpop.permute.xlu1 %1551  ;;  %v3857_v33 = vld [vmem:[%s5335_s10 + $0x124] sm:$0xf0] }
 0x243   : > { %v1673_v3 = vadd.f32 %v1552_v13, %v1393_v57  ;;  %v1617_v53 = vpop.permute.xlu0 %1616  ;;  %v1668_v42 = vadd.f32 %v1527_v58, %v1388_v0  ;;  %v3497_v9 = vor.u32 %v3857_v33, %v3496_v18  ;;  %v4071_v0 = vld [vmem:[%s6164_s0 + $0xe8] sm:$0xff] }
 0x244   : > { %v1686_v57 = vadd.f32 %v1617_v53, %v1406_v2  ;;  %v3490_v53 = vld [vmem:[%s5335_s10 + $0x120] sm:$0xf0]  ;;  %v6357_v2 = vld [vmem:[#allocation48_spill] sm:$0xff]  ;;  %v3528_v33 = vld [vmem:[%s5335_s10 + $0x148] sm:$0xf] }
 0x245   : > { %v1713_v54 = vmax.f32 %v1673_v3, 0.0  ;;  %3091 = vmatpush.bf16.msra.mxu3 %v6348_v26  ;;  %2926 = vmatmul.bf16.gmra.mxu0 %v3457_v21  ;;  %v1708_v16 = vmax.f32 %v1668_v42, 0.0  ;;  %v3489_v3 = vor.u32 %v3856_v62, %v3488_v40 }
 0x246   : > { %3205 = vmatpush.bf16.msra.mxu1 %v1949_v17  ;;  %2808 = vmatmul.bf16.gmra.mxu2 %v3449_v38  ;;  %v3852_v38 = vld [vmem:[%s5335_s10 + $0x104] sm:$0xf]  ;;  %v1726_v8 = vmax.f32 %v1686_v57, 0.0 }
 0x247   : > { %v1941_v15 = vpack.c.bf16 %v1713_v54, %v1712_v43  ;;  %v4068_v54 = vld [vmem:[%s6164_s0 + $0xf8] sm:$0xff]  ;;  %v3501_v7 = vor.u32 %v3852_v38, %v3498_v45  ;;  %v3861_v45 = vld [vmem:[%s5335_s10 + $0x14c] sm:$0xf] }
 0x248   : > { %v1405_v26 = vmul.f32 %v4068_v54, %v5533_v20  ;;  %v1404_v20 = vmul.f32 %v4070_v10, %v5594_v49 }
 0x249   : > { %3092 = vmatpush.bf16.msra.mxu3 %v6352_v61  ;;  %3146 = vmatpush.bf16.msra.mxu0 %v1941_v15 }
 0x24a   : > { %v1612_v31 = vpop.permute.xlu2 %1611  ;;  %v1537_v37 = vpop.permute.xlu1 %1536 }
 0x24b   : > { %v1670_v60 = vadd.f32 %v1537_v37, %v1390_v48  ;;  %v1532_v12 = vpop.permute.xlu0 %1531  ;;  %v1685_v19 = vadd.f32 %v1612_v31, %v1405_v26  ;;  %v6355_v37 = vld [vmem:[#allocation49_spill] sm:$0xff]  ;;  %v6359_v26 = vld [vmem:[#allocation3_spill] sm:$0xff] }
 0x24c   : > { %2985 = vmatmul.bf16.gmra.mxu1 %v3461_v59  ;;  %v1669_v23 = vadd.f32 %v1532_v12, %v1389_v29  ;;  %2867 = vmatmul.bf16.gmra.mxu3 %v3453_v1  ;;  %v3493_v59 = vor.u32 %v3851_v39, %v3490_v53  ;;  %v1403_v1 = vmul.f32 %v4071_v0, %v5540_v32  ;;  %v6354_v32 = vld [vmem:[#allocation10_spill] sm:$0xff]  ;;  %v6358_v53 = vld [vmem:[#allocation24_spill] sm:$0xff] }
 0x24d   : > { %v1710_v24 = vmax.f32 %v1670_v60, 0.0  ;;  %v1725_v49 = vmax.f32 %v1685_v19, 0.0  ;;  %v1386_v60 = vmul.f32 %v6355_v37, %v6354_v32  ;;  %v1382_v54 = vmul.f32 %v6358_v53, %v5515_v35  ;;  %v6363_v32 = vld [vmem:[#allocation18_spill] sm:$0xff] }
 0x24e   : > { %v1709_v28 = vmax.f32 %v1669_v23, 0.0 }
 0x24f   : > { %v1940_v41 = vpack.c.bf16 %v1711_v50, %v1710_v24  ;;  %v3536_v50 = vld [vmem:[%s5335_s10 + $0x150] sm:$0xf]  ;;  %v3867_v24 = vld [vmem:[%s5335_s10 + $0x174] sm:$0xf0] }
 0x250   : > { %v1939_v17 = vpack.c.bf16 %v1709_v28, %v1708_v16  ;;  %v3537_v57 = vor.u32 %v3867_v24, %v3536_v50  ;;  %v3576_v24 = vld [vmem:[%s5335_s10 + $0x1a0] sm:$0xf] }
 0x251   : > { %3147 = vmatpush.bf16.msra.mxu0 %v1940_v41  ;;  %v1387_v41 = vmul.f32 %v6357_v2, %v6356_v5  ;;  %v3568_v5 = vld [vmem:[%s5335_s10 + $0x198] sm:$0xf]  ;;  %v3876_v2 = vld [vmem:[%s5335_s10 + $0x1bc] sm:$0xf0] }
 0x252   : > { %v1597_v4 = vpop.permute.xlu2 %1596  ;;  %v1622_v27 = vpop.permute.xlu1 %1621 }
 0x253   : > { %v1687_v21 = vadd.f32 %v1622_v27, %v1407_v55  ;;  %v1517_v58 = vpop.permute.xlu0 %1516  ;;  %v5790_v13 = vpop.f32.mrf.mxu0  ;;  %v1682_v63 = vadd.f32 %v1597_v4, %v1402_v34 }
 0x254   : > { %v1666_v18 = vadd.f32 %v1517_v58, %v1386_v60 }
 0x255   : > { %v1727_v43 = vmax.f32 %v1687_v21, 0.0  ;;  %3148 = vmatpush.bf16.msra.mxu0 %v1939_v17  ;;  %v1722_v29 = vmax.f32 %v1682_v63, 0.0  ;;  %v3866_v17 = vld [vmem:[%s5335_s10 + $0x16c] sm:$0xf0]  ;;  %v3538_v21 = vld [vmem:[%s5335_s10 + $0x178] sm:$0xf0] }
 0x256   : > { %2931 = vmatmul.bf16.gmra.mxu0 %v3497_v9  ;;  %2813 = vmatmul.bf16.gmra.mxu2 %v3489_v3  ;;  %v3529_v27 = vor.u32 %v3866_v17, %v3528_v33  ;;  %v3862_v9 = vld [vmem:[%s5335_s10 + $0x154] sm:$0xf]  ;;  %v1706_v3 = vmax.f32 %v1666_v18, 0.0 }
 0x257   : > { %v1948_v14 = vpack.c.bf16 %v1727_v43, %v1726_v8  ;;  %v3530_v8 = vld [vmem:[%s5335_s10 + $0x170] sm:$0xf0]  ;;  %v3541_v39 = vor.u32 %v3862_v9, %v3538_v21 }
 0x258   : > { %v5806_v15 = vpop.f32.mrf.mxu2  ;;  %v3533_v34 = vor.u32 %v3861_v45, %v3530_v8  ;;  %v3872_v45 = vld [vmem:[%s5335_s10 + $0x1a4] sm:$0xf]  ;;  %v3578_v8 = vld [vmem:[%s5335_s10 + $0x1c8] sm:$0xf0] }
 0x259   : > { %v5800_v56 = vpop.f32.mrf.mxu1  ;;  %3206 = vmatpush.bf16.msra.mxu1 %v1948_v14  ;;  %v6360_v14 = vld [vmem:[#allocation44_spill] sm:$0xff] }
 0x25a   : > { %v1512_v22 = vpop.permute.xlu2 %1511  ;;  %v1607_v46 = vpop.permute.xlu1 %1606 }
 0x25b   : > { %v1684_v48 = vadd.f32 %v1607_v46, %v1404_v20  ;;  %v1602_v44 = vpop.permute.xlu0 %1601  ;;  %v5816_v61 = vpop.f32.mrf.mxu0  ;;  %v6362_v20 = vld [vmem:[#allocation45_spill] sm:$0xff] }
 0x25c   : > { %2990 = vmatmul.bf16.gmra.mxu1 %v3501_v7  ;;  %v1683_v52 = vadd.f32 %v1602_v44, %v1403_v1  ;;  %2872 = vmatmul.bf16.gmra.mxu3 %v3493_v59  ;;  %v1385_v7 = vmul.f32 %v6360_v14, %v6359_v26  ;;  %v6361_v59 = vld [vmem:[#allocation46_spill] sm:$0xff]  ;;  %v1384_v19 = vmul.f32 %v6362_v20, %v5485_v11  ;;  %v6364_v14 = vld [vmem:[#allocation11_spill] sm:$0xff] }
 0x25d   : > { %v1724_v51 = vmax.f32 %v1684_v48, 0.0  ;;  %v1383_v10 = vmul.f32 %v6361_v59, %v5510_v25  ;;  %v3581_v26 = vor.u32 %v3872_v45, %v3578_v8 }
 0x25e   : > { %v1723_v42 = vmax.f32 %v1683_v52, 0.0  ;;  %v1665_v0 = vadd.f32 %v1512_v22, %v1385_v7 }
 0x25f   : > { %v5818_v31 = vpop.f32.mrf.mxu3  ;;  %v1947_v12 = vpack.c.bf16 %v1725_v49, %v1724_v51 }
 0x260   : > { %v1946_v16 = vpack.c.bf16 %v1723_v42, %v1722_v29  ;;  %v5826_v28 = vpop.f32.mrf.mxu2  ;;  %v1705_v25 = vmax.f32 %v1665_v0, 0.0  ;;  %v4072_v42 = vld [vmem:[%s6164_s0 + $0xd0] sm:$0xff] }
 0x261   : > { %v5822_v23 = vpop.f32.mrf.mxu1  ;;  %3207 = vmatpush.bf16.msra.mxu1 %v1947_v12  ;;  %v1400_v37 = vmul.f32 %v4072_v42, %v6363_v32  ;;  %v3616_v32 = vld [vmem:[%s5335_s10 + $0x1f0] sm:$0xf] }
 0x262   : > { %v1497_v47 = vpop.permute.xlu2 %1496  ;;  %v1522_v55 = vpop.permute.xlu1 %1521 }
 0x263   : > { %v1667_v40 = vadd.f32 %v1522_v55, %v1387_v41  ;;  %v1587_v62 = vpop.permute.xlu0 %1586  ;;  %v2686_v4 = vpop.f32.mrf.mxu0  ;;  %v1662_v1 = vadd.f32 %v1497_v47, %v1382_v54  ;;  %v4073_v41 = vld [vmem:[%s6164_s0 + $0xd8] sm:$0xff] }
 0x264   : > { %v1401_v18 = vmul.f32 %v4073_v41, %v5566_v36  ;;  %v1680_v33 = vadd.f32 %v1587_v62, %v1400_v37  ;;  %v3570_v36 = vld [vmem:[%s5335_s10 + $0x1c0] sm:$0xf0]  ;;  %v3887_v37 = vld [vmem:[%s5335_s10 + $0x214] sm:$0xf0] }
 0x265   : > { %v1707_v38 = vmax.f32 %v1667_v40, 0.0  ;;  %3208 = vmatpush.bf16.msra.mxu1 %v1946_v16  ;;  %v1702_v51 = vmax.f32 %v1662_v1, 0.0  ;;  %v3877_v16 = vld [vmem:[%s5335_s10 + $0x1c4] sm:$0xf0] }
 0x266   : > { %2936 = vmatmul.bf16.gmra.mxu0 %v3537_v57  ;;  %2818 = vmatmul.bf16.gmra.mxu2 %v3529_v27  ;;  %v3577_v27 = vor.u32 %v3877_v16, %v3576_v24  ;;  %v1720_v62 = vmax.f32 %v1680_v33, 0.0  ;;  %v3886_v24 = vld [vmem:[%s5335_s10 + $0x20c] sm:$0xf0] }
 0x267   : > { %v5836_v58 = vpop.f32.mrf.mxu3  ;;  %v1938_v43 = vpack.c.bf16 %v1707_v38, %v1706_v3  ;;  %v3569_v38 = vor.u32 %v3876_v2, %v3568_v5  ;;  %v3617_v5 = vor.u32 %v3887_v37, %v3616_v32 }
 0x268   : > { %v5846_v63 = vpop.f32.mrf.mxu2 }
 0x269   : > { %v2745_v30 = vpop.f32.mrf.mxu1  ;;  %3149 = vmatpush.bf16.msra.mxu0 %v1938_v43  ;;  %v3871_v43 = vld [vmem:[%s5335_s10 + $0x19c] sm:$0xf] }
 0x26a   : > { %v1582_v46 = vpop.permute.xlu2 %1581  ;;  %v1507_v48 = vpop.permute.xlu1 %1506  ;;  %v3573_v59 = vor.u32 %v3871_v43, %v3570_v36 }
 0x26b   : > { %v1502_v35 = vpop.permute.xlu0 %1501  ;;  %v1664_v44 = vadd.f32 %v1507_v48, %v1384_v19  ;;  %v2688_v49 = vpop.f32.mrf.mxu0 }
 0x26c   : > { %2995 = vmatmul.bf16.gmra.mxu1 %v3541_v39  ;;  %v1663_v52 = vadd.f32 %v1502_v35, %v1383_v10  ;;  %2877 = vmatmul.bf16.gmra.mxu3 %v3533_v34  ;;  %v4075_v10 = vld [vmem:[%s6164_s0 + $0xc0] sm:$0xff] }
 0x26d   : > { %v1704_v29 = vmax.f32 %v1664_v44, 0.0 }
 0x26e   : > { %v1703_v11 = vmax.f32 %v1663_v52, 0.0 }
 0x26f   : > { %v5848_v22 = vpop.f32.mrf.mxu3  ;;  %v1937_v60 = vpack.c.bf16 %v1705_v25, %v1704_v29 }
 0x270   : > { %v1936_v12 = vpack.c.bf16 %v1703_v11, %v1702_v51  ;;  %v5862_v17 = vpop.f32.mrf.mxu2 }
 0x271   : > { %v2747_v50 = vpop.f32.mrf.mxu1  ;;  %3150 = vmatpush.bf16.msra.mxu0 %v1937_v60 }
 0x272   : > { %v2085_v47 = vpop.permute.xlu2 %2084  ;;  %v1592_v55 = vpop.permute.xlu1 %1591 }
 0x273   : > { %v2687_v57 = vadd.f32 %v2686_v4, %v2085_v47  ;;  %v2075_v40 = vpop.permute.xlu0 %2074  ;;  %v1681_v9 = vadd.f32 %v1592_v55, %v1401_v18  ;;  %v5865_v3 = vpop.f32.mrf.mxu0  ;;  %v3882_v47 = vld [vmem:[%s5335_s10 + $0x1f4] sm:$0xf]  ;;  %v3618_v55 = vld [vmem:[%s5335_s10 + $0x218] sm:$0xf0] }
 0x274   : > { %v2682_v21 = vadd.f32 %v5790_v13, %v2075_v40  ;;  %v4074_v13 = vld [vmem:[%s6164_s0 + $0xc8] sm:$0xff]  ;;  %v3610_v40 = vld [vmem:[%s5335_s10 + $0x210] sm:$0xf0] }
 0x275   : > { %v5871_v39 = vadd.f32 %v2745_v30, %v2687_v57  ;;  %v1721_v53 = vmax.f32 %v1681_v9, 0.0  ;;  %3151 = vmatpush.bf16.msra.mxu0 %v1936_v12  ;;  %v1399_v7 = vmul.f32 %v4074_v13, %v6364_v14  ;;  %v3608_v12 = vld [vmem:[%s5335_s10 + $0x1e8] sm:$0xf]  ;;  %v3881_v57 = vld [vmem:[%s5335_s10 + $0x1ec] sm:$0xf] }
 0x276   : > { %v5874_v54 = vadd.f32 %v5800_v56, %v2682_v21  ;;  %2941 = vmatmul.bf16.gmra.mxu0 %v3577_v27  ;;  %2823 = vmatmul.bf16.gmra.mxu2 %v3569_v38  ;;  %v1398_v56 = vmul.f32 %v4075_v10, %v5535_v6  ;;  %v3609_v33 = vor.u32 %v3886_v24, %v3608_v12  ;;  %v3656_v10 = vld [vmem:[%s5335_s10 + $0x240] sm:$0xf] }
 0x277   : > { %v5876_v4 = vpop.f32.mrf.mxu3  ;;  %v1945_v34 = vpack.c.bf16 %v1721_v53, %v1720_v62  ;;  %v1679_v20 = vadd.f32 %v1582_v46, %v1399_v7  ;;  %v3621_v38 = vor.u32 %v3882_v47, %v3618_v55  ;;  %v3613_v8 = vor.u32 %v3881_v57, %v3610_v40 }
 0x278   : > { %v2716_v0 = vpop.f32.mrf.mxu2 }
 0x279   : > { %v2750_v30 = vpop.f32.mrf.mxu1  ;;  %3209 = vmatpush.bf16.msra.mxu1 %v1945_v34  ;;  %v1719_v25 = vmax.f32 %v1679_v20, 0.0  ;;  %v3896_v20 = vld [vmem:[%s5335_s10 + $0x25c] sm:$0xf0] }
 0x27a   : > { %v2100_v19 = vpop.permute.xlu2 %2099  ;;  %v1577_v1 = vpop.permute.xlu1 %1576 }
 0x27b   : > { %v1678_v48 = vadd.f32 %v1577_v1, %v1398_v56  ;;  %v2090_v35 = vpop.permute.xlu0 %2089  ;;  %v2693_v44 = vpop.f32.mrf.mxu0  ;;  %v3648_v56 = vld [vmem:[%s5335_s10 + $0x238] sm:$0xf] }
 0x27c   : > { %3000 = vmatmul.bf16.gmra.mxu1 %v3581_v26  ;;  %2882 = vmatmul.bf16.gmra.mxu3 %v3573_v59  ;;  %v2689_v52 = vadd.f32 %v2688_v49, %v2090_v35  ;;  %v2694_v6 = vadd.f32 %v2693_v44, %v2100_v19 }
 0x27d   : > { %v1718_v51 = vmax.f32 %v1678_v48, 0.0 }
 0x27e   : > { %v5886_v29 = vadd.f32 %v2747_v50, %v2689_v52  ;;  %v3649_v52 = vor.u32 %v3896_v20, %v3648_v56  ;;  %v3698_v56 = vld [vmem:[%s5335_s10 + $0x2b8] sm:$0xf0] }
 0x27f   : > { %v2775_v46 = vpop.f32.mrf.mxu3  ;;  %v1944_v11 = vpack.c.bf16 %v1719_v25, %v1718_v51  ;;  %v3892_v25 = vld [vmem:[%s5335_s10 + $0x244] sm:$0xf]  ;;  %v3658_v51 = vld [vmem:[%s5335_s10 + $0x268] sm:$0xf0] }
 0x280   : > { %v5894_v16 = vpop.f32.mrf.mxu2 }
 0x281   : > { %v2752_v42 = vpop.f32.mrf.mxu1  ;;  %3210 = vmatpush.bf16.msra.mxu1 %v1944_v11  ;;  %v3891_v11 = vld [vmem:[%s5335_s10 + $0x23c] sm:$0xf] }
 0x282   : > { %v5890_v60 = vadd.f32 %v2752_v42, %v2694_v6  ;;  %v2115_v49 = vpop.permute.xlu2 %2114  ;;  %v2080_v50 = vpop.permute.xlu1 %2079  ;;  %v3650_v42 = vld [vmem:[%s5335_s10 + $0x260] sm:$0xf0] }
 0x283   : > { %v2684_v2 = vadd.f32 %v5816_v61, %v2080_v50  ;;  %v2105_v41 = vpop.permute.xlu0 %2104  ;;  %v2696_v18 = vpop.f32.mrf.mxu0 }
 0x284   : > { %v2697_v9 = vadd.f32 %v2696_v18, %v2105_v41 }
 0x285   : > { %v5902_v27 = vadd.f32 %v5822_v23, %v2684_v2  ;;  %v3653_v2 = vor.u32 %v3891_v11, %v3650_v42 }
 0x286   : > { %2946 = vmatmul.bf16.gmra.mxu0 %v3617_v5  ;;  %2828 = vmatmul.bf16.gmra.mxu2 %v3609_v33 }
 0x287   : > { %v2777_v21 = vpop.f32.mrf.mxu3 }
 0x288   : > { %v5906_v36 = vpop.f32.mrf.mxu2 }
 0x289   : > { %v2755_v45 = vpop.f32.mrf.mxu1 }
 0x28a   : > { %v5904_v61 = vadd.f32 %v2755_v45, %v2697_v9  ;;  %v2130_v43 = vpop.permute.xlu2 %2129  ;;  %v2095_v23 = vpop.permute.xlu1 %2094 }
 0x28b   : > { %v2709_v62 = vadd.f32 %v5826_v28, %v2130_v43  ;;  %v2692_v53 = vadd.f32 %v5865_v3, %v2095_v23  ;;  %v2120_v26 = vpop.permute.xlu0 %2119  ;;  %v2698_v13 = vpop.f32.mrf.mxu0  ;;  %v3897_v28 = vld [vmem:[%s5335_s10 + $0x264] sm:$0xf0]  ;;  %v3696_v43 = vld [vmem:[%s5335_s10 + $0x290] sm:$0xf] }
 0x28c   : > { %3005 = vmatmul.bf16.gmra.mxu1 %v3621_v38  ;;  %2887 = vmatmul.bf16.gmra.mxu3 %v3613_v8  ;;  %v3657_v35 = vor.u32 %v3897_v28, %v3656_v10  ;;  %v3688_v23 = vld [vmem:[%s5335_s10 + $0x288] sm:$0xf] }
 0x28d   : > { %v5911_v14 = vadd.f32 %v5836_v58, %v2709_v62  ;;  %v5913_v7 = vadd.f32 %v2750_v30, %v2692_v53 }
 0x28f   : > { %v5915_v34 = vpop.f32.mrf.mxu3 }
 0x290   : > { %v2723_v19 = vpop.f32.mrf.mxu2 }
 0x291   : > { %v2757_v59 = vpop.f32.mrf.mxu1 }
 0x292   : > { %v2145_v3 = vpop.permute.xlu2 %2144 }
 0x293   : > { %v2717_v1 = vadd.f32 %v2716_v0, %v2145_v3  ;;  %v2110_v48 = vpop.permute.xlu1 %2109  ;;  %v2135_v44 = vpop.permute.xlu0 %2134  ;;  %v3661_v0 = vor.u32 %v3892_v25, %v3658_v51  ;;  %v3901_v3 = vld [vmem:[%s5335_s10 + $0x28c] sm:$0xf] }
 0x294   : > { %v2699_v58 = vadd.f32 %v2698_v13, %v2110_v48  ;;  %v2701_v30 = vpop.f32.mrf.mxu0  ;;  %v2712_v6 = vadd.f32 %v5846_v63, %v2135_v44 }
 0x295   : > { %v5926_v32 = vadd.f32 %v2775_v46, %v2717_v1  ;;  %v2702_v12 = vadd.f32 %v2701_v30, %v2115_v49 }
 0x296   : > { %v5928_v37 = vadd.f32 %v2757_v59, %v2699_v58  ;;  %2951 = vmatmul.bf16.gmra.mxu0 %v3657_v35  ;;  %v5931_v50 = vadd.f32 %v5848_v22, %v2712_v6  ;;  %2833 = vmatmul.bf16.gmra.mxu2 %v3649_v52 }
 0x297   : > { %v2782_v24 = vpop.f32.mrf.mxu3 }
 0x298   : > { %v2726_v63 = vpop.f32.mrf.mxu2 }
 0x299   : > { %v2760_v5 = vpop.f32.mrf.mxu1 }
 0x29a   : > { %v5933_v41 = vadd.f32 %v2760_v5, %v2702_v12  ;;  %v2160_v18 = vpop.permute.xlu2 %2159  ;;  %v3728_v5 = vld [vmem:[%s5335_s10 + $0x2d8] sm:$0xf] }
 0x29b   : > { %v2724_v46 = vadd.f32 %v2723_v19, %v2160_v18  ;;  %v2125_v33 = vpop.permute.xlu1 %2124  ;;  %v2150_v47 = vpop.permute.xlu0 %2149  ;;  %v3690_v19 = vld [vmem:[%s5335_s10 + $0x2b0] sm:$0xf0] }
 0x29c   : > { %3010 = vmatmul.bf16.gmra.mxu1 %v3661_v0  ;;  %v2707_v49 = vadd.f32 %v5806_v15, %v2125_v33  ;;  %2892 = vmatmul.bf16.gmra.mxu3 %v3653_v2  ;;  %v2703_v22 = vpop.f32.mrf.mxu0  ;;  %v2719_v55 = vadd.f32 %v5894_v16, %v2150_v47  ;;  %v3907_v15 = vld [vmem:[%s5335_s10 + $0x2b4] sm:$0xf0]  ;;  %v3906_v16 = vld [vmem:[%s5335_s10 + $0x2ac] sm:$0xf0]  ;;  %v3693_v44 = vor.u32 %v3901_v3, %v3690_v19  ;;  %v3917_v0 = vld [vmem:[%s5335_s10 + $0x304] sm:$0xf0] }
 0x29d   : > { %v5937_v57 = vadd.f32 %v2782_v24, %v2724_v46  ;;  %v2704_v38 = vadd.f32 %v2703_v22, %v2120_v26  ;;  %v3697_v59 = vor.u32 %v3907_v15, %v3696_v43  ;;  %v3689_v10 = vor.u32 %v3906_v16, %v3688_v23  ;;  %v3902_v26 = vld [vmem:[%s5335_s10 + $0x294] sm:$0xf]  ;;  %v3736_v24 = vld [vmem:[%s5335_s10 + $0x2e0] sm:$0xf]  ;;  %v3912_v47 = vld [vmem:[%s5335_s10 + $0x2e4] sm:$0xf] }
 0x29e   : > { %v5940_v40 = vadd.f32 %v5818_v31, %v2707_v49  ;;  %v5942_v9 = vadd.f32 %v2777_v21, %v2719_v55  ;;  %v3701_v35 = vor.u32 %v3902_v26, %v3698_v56  ;;  %v3916_v2 = vld [vmem:[%s5335_s10 + $0x2fc] sm:$0xf0]  ;;  %v3738_v22 = vld [vmem:[%s5335_s10 + $0x308] sm:$0xf0]  ;;  %v3384_v3 = vld [vmem:[%s5335_s10 + $0x18] sm:$0xf] }
 0x29f   : > { %v2785_v45 = vpop.f32.mrf.mxu3  ;;  %v3741_v15 = vor.u32 %v3912_v47, %v3738_v22  ;;  %v3392_v56 = vld [vmem:[%s5335_s10 + $0x20] sm:$0xf]  ;;  %v3424_v47 = vld [vmem:[%s5335_s10 + $0x68] sm:$0xf]  ;;  %v3838_v22 = vld [vmem:[%s5335_s10 + $0x8c] sm:$0xf0] }
 0x2a0   : > { %v2728_v53 = vpop.f32.mrf.mxu2  ;;  %v3828_v19 = vld [vmem:[%s5335_s10 + $0x3c] sm:$0xf0] }
 0x2a1   : > { %v2762_v8 = vpop.f32.mrf.mxu1 }
 0x2a2   : > { %v5946_v62 = vadd.f32 %v2762_v8, %v2704_v38  ;;  %v3911_v38 = vld [vmem:[%s5335_s10 + $0x2dc] sm:$0xf] }
 0x2a3   : > { %v2140_v13 = vpop.permute.xlu1 %2139  ;;  %v2165_v21 = vpop.permute.xlu0 %2164 }
 0x2a4   : > { %v2714_v31 = vadd.f32 %v5862_v17, %v2140_v13  ;;  %v2917_v28 = vpop.f32.mrf.mxu0  ;;  %v2727_v20 = vadd.f32 %v2726_v63, %v2165_v21 }
 0x2a6   : > { %v5956_v1 = vadd.f32 %v5876_v4, %v2714_v31  ;;  %2956 = vmatmul.bf16.gmra.mxu0 %v3697_v59  ;;  %v5958_v58 = vadd.f32 %v2785_v45, %v2727_v20  ;;  %2838 = vmatmul.bf16.gmra.mxu2 %v3689_v10  ;;  %v3730_v45 = vld [vmem:[%s5335_s10 + $0x300] sm:$0xf0]  ;;  %v3829_v20 = vld [vmem:[%s5335_s10 + $0x44] sm:$0xf0] }
 0x2a7   : > { %v2787_v48 = vpop.f32.mrf.mxu3  ;;  %v3733_v16 = vor.u32 %v3911_v38, %v3730_v45 }
 0x2a8   : > { %v2799_v30 = vpop.f32.mrf.mxu2 }
 0x2a9   : > { %v2976_v17 = vpop.f32.mrf.mxu1  ;;  %v2800_v25 = vadd.f32 %v2799_v30, %v5874_v54 }
 0x2ab   : > { %v2155_v52 = vpop.permute.xlu1 %2154 }
 0x2ac   : > { %3015 = vmatmul.bf16.gmra.mxu1 %v3701_v35  ;;  %v2722_v4 = vadd.f32 %v5906_v36, %v2155_v52  ;;  %2897 = vmatmul.bf16.gmra.mxu3 %v3693_v44  ;;  %v2919_v51 = vpop.f32.mrf.mxu0  ;;  %v3737_v36 = vor.u32 %v3917_v0, %v3736_v24  ;;  %v3385_v44 = vor.u32 %v3828_v19, %v3384_v3  ;;  %v3824_v52 = vld [vmem:[%s5335_s10 + $0x24] sm:$0xf] }
 0x2ae   : > { %v5963_v6 = vadd.f32 %v5915_v34, %v2722_v4  ;;  %v3729_v34 = vor.u32 %v3916_v2, %v3728_v5 }
 0x2af   : > { %v2858_v11 = vpop.f32.mrf.mxu3 }
 0x2b0   : > { %v2859_v42 = vadd.f32 %v2858_v11, %v2800_v25  ;;  %v2801_v54 = vpop.f32.mrf.mxu2  ;;  %v3394_v25 = vld [vmem:[%s5335_s10 + $0x48] sm:$0xf0]  ;;  %v3386_v11 = vld [vmem:[%s5335_s10 + $0x40] sm:$0xf0] }
 0x2b1   : > { %v2978_v12 = vpop.f32.mrf.mxu1  ;;  %v2802_v46 = vadd.f32 %v2801_v54, %v5902_v27 }
 0x2b2   : > { %v2918_v18 = vadd.f32 %v2917_v28, %v2859_v42 }
 0x2b3   : > { %v2170_v63 = vpop.permute.xlu1 %2169 }
 0x2b4   : > { %v2729_v33 = vadd.f32 %v2728_v53, %v2170_v63  ;;  %v2922_v49 = vpop.f32.mrf.mxu0  ;;  %v5972_v55 = vadd.f32 %v2976_v17, %v2918_v18  ;;  %v3393_v17 = vor.u32 %v3829_v20, %v3392_v56 }
 0x2b6   : > { %v5976_v8 = vadd.f32 %v2787_v48, %v2729_v33  ;;  %2961 = vmatmul.bf16.gmra.mxu0 %v3737_v36  ;;  %2843 = vmatmul.bf16.gmra.mxu2 %v3729_v34  ;;  %v3432_v34 = vld [vmem:[%s5335_s10 + $0x70] sm:$0xf] }
 0x2b7   : > { %v2860_v43 = vpop.f32.mrf.mxu3 }
 0x2b8   : > { %v2861_v23 = vadd.f32 %v2860_v43, %v2802_v46  ;;  %v2804_v13 = vpop.f32.mrf.mxu2 }
 0x2b9   : > { %v2981_v27 = vpop.f32.mrf.mxu1  ;;  %v2805_v59 = vadd.f32 %v2804_v13, %v5871_v39  ;;  %v3833_v13 = vld [vmem:[%s5335_s10 + $0x6c] sm:$0xf] }
 0x2ba   : > { %v2920_v53 = vadd.f32 %v2919_v51, %v2861_v23  ;;  %v3823_v51 = vld [vmem:[%s5335_s10 + $0x1c] sm:$0xf] }
 0x2bb   : > { %v3389_v5 = vor.u32 %v3823_v51, %v3386_v11 }
 0x2bc   : > { %3020 = vmatmul.bf16.gmra.mxu1 %v3741_v15  ;;  %2902 = vmatmul.bf16.gmra.mxu3 %v3733_v16  ;;  %v2924_v31 = vpop.f32.mrf.mxu0  ;;  %v5979_v21 = vadd.f32 %v2978_v12, %v2920_v53  ;;  %v3397_v12 = vor.u32 %v3824_v52, %v3394_v25  ;;  %v3425_v15 = vor.u32 %v3838_v22, %v3424_v47  ;;  %v3434_v16 = vld [vmem:[%s5335_s10 + $0x98] sm:$0xf0]  ;;  %v3464_v52 = vld [vmem:[%s5335_s10 + $0xb8] sm:$0xf]  ;;  %v3848_v25 = vld [vmem:[%s5335_s10 + $0xdc] sm:$0xf0] }
 0x2bf   : > { %v2863_v10 = vpop.f32.mrf.mxu3 }
 0x2c0   : > { %v2864_v28 = vadd.f32 %v2863_v10, %v2805_v59  ;;  %v2806_v35 = vpop.f32.mrf.mxu2  ;;  %v3426_v59 = vld [vmem:[%s5335_s10 + $0x90] sm:$0xf0] }
 0x2c1   : > { %v2983_v26 = vpop.f32.mrf.mxu1  ;;  %v2807_v39 = vadd.f32 %v2806_v35, %v5886_v29  ;;  %v3429_v56 = vor.u32 %v3833_v13, %v3426_v59 }
 0x2c2   : > { %v2923_v48 = vadd.f32 %v2922_v49, %v2864_v28  ;;  %v3839_v49 = vld [vmem:[%s5335_s10 + $0x94] sm:$0xf0] }
 0x2c3   : > { %v3433_v43 = vor.u32 %v3839_v49, %v3432_v34 }
 0x2c4   : > { %v2927_v30 = vpop.f32.mrf.mxu0  ;;  %v5988_v4 = vadd.f32 %v2981_v27, %v2923_v48  ;;  %v3834_v27 = vld [vmem:[%s5335_s10 + $0x74] sm:$0xf] }
 0x2c5   : > { %v3437_v10 = vor.u32 %v3834_v27, %v3434_v16  ;;  %v3504_v27 = vld [vmem:[%s5335_s10 + $0x108] sm:$0xf]  ;;  %v3858_v16 = vld [vmem:[%s5335_s10 + $0x12c] sm:$0xf0] }
 0x2c6   : > { %3152 = vmatmul.bf16.vlgmr.msra.gmra.mxu0 %v3393_v17  ;;  %3034 = vmatmul.bf16.vlgmr.msra.gmra.mxu2 %v3385_v44  ;;  %v3472_v44 = vld [vmem:[%s5335_s10 + $0xc0] sm:$0xf] }
 0x2c7   : > { %v2865_v42 = vpop.f32.mrf.mxu3 }
 0x2c8   : > { %v2866_v24 = vadd.f32 %v2865_v42, %v2807_v39 }
 0x2c9   : > { %v2986_v0 = vpop.f32.mrf.mxu1  ;;  %v2809_v2 = vpop.f32.mrf.mxu2 }
 0x2ca   : > { %v2925_v29 = vadd.f32 %v2924_v31, %v2866_v24  ;;  %v2810_v18 = vadd.f32 %v2809_v2, %v5913_v7  ;;  %v3843_v2 = vld [vmem:[%s5335_s10 + $0xbc] sm:$0xf] }
 0x2cc   : > { %3211 = vmatmul.bf16.vlgmr.msra.gmra.mxu1 %v3397_v12  ;;  %3093 = vmatmul.bf16.vlgmr.msra.gmra.mxu3 %v3389_v5  ;;  %v2929_v54 = vpop.f32.mrf.mxu0  ;;  %v5993_v63 = vadd.f32 %v2983_v26, %v2925_v29  ;;  %v3465_v12 = vor.u32 %v3848_v25, %v3464_v52  ;;  %v3474_v5 = vld [vmem:[%s5335_s10 + $0xe8] sm:$0xf0] }
 0x2cf   : > { %v2868_v36 = vpop.f32.mrf.mxu3 }
 0x2d0   : > { %v2869_v46 = vadd.f32 %v2868_v36, %v2810_v18  ;;  %v3466_v18 = vld [vmem:[%s5335_s10 + $0xe0] sm:$0xf0] }
 0x2d1   : > { %v2988_v33 = vpop.f32.mrf.mxu1  ;;  %v2811_v45 = vpop.f32.mrf.mxu2  ;;  %v3469_v34 = vor.u32 %v3843_v2, %v3466_v18 }
 0x2d2   : > { %v2928_v38 = vadd.f32 %v2927_v30, %v2869_v46  ;;  %v2812_v7 = vadd.f32 %v2811_v45, %v5890_v60  ;;  %v3849_v30 = vld [vmem:[%s5335_s10 + $0xe4] sm:$0xf0] }
 0x2d3   : > { %v3473_v42 = vor.u32 %v3849_v30, %v3472_v44 }
 0x2d4   : > { %v2932_v23 = vpop.f32.mrf.mxu0  ;;  %v6002_v53 = vadd.f32 %v2986_v0, %v2928_v38  ;;  %v3844_v0 = vld [vmem:[%s5335_s10 + $0xc4] sm:$0xf] }
 0x2d5   : > { %v3477_v36 = vor.u32 %v3844_v0, %v3474_v5  ;;  %v3544_v0 = vld [vmem:[%s5335_s10 + $0x158] sm:$0xf]  ;;  %v3868_v5 = vld [vmem:[%s5335_s10 + $0x17c] sm:$0xf0] }
 0x2d6   : > { %3157 = vmatmul.bf16.gmra.mxu0 %v3433_v43  ;;  %3039 = vmatmul.bf16.gmra.mxu2 %v3425_v15  ;;  %v3512_v15 = vld [vmem:[%s5335_s10 + $0x110] sm:$0xf] }
 0x2d7   : > { %v2870_v31 = vpop.f32.mrf.mxu3 }
 0x2d8   : > { %v2871_v28 = vadd.f32 %v2870_v31, %v2812_v7 }
 0x2d9   : > { %v2991_v26 = vpop.f32.mrf.mxu1  ;;  %v2814_v20 = vpop.f32.mrf.mxu2 }
 0x2da   : > { %v2930_v60 = vadd.f32 %v2929_v54, %v2871_v28  ;;  %v2815_v3 = vadd.f32 %v2814_v20, %v5904_v61  ;;  %v3853_v20 = vld [vmem:[%s5335_s10 + $0x10c] sm:$0xf] }
 0x2dc   : > { %3216 = vmatmul.bf16.gmra.mxu1 %v3437_v10  ;;  %3098 = vmatmul.bf16.gmra.mxu3 %v3429_v56  ;;  %v2934_v19 = vpop.f32.mrf.mxu0  ;;  %v6007_v48 = vadd.f32 %v2988_v33, %v2930_v60  ;;  %v3505_v10 = vor.u32 %v3858_v16, %v3504_v27  ;;  %v3514_v56 = vld [vmem:[%s5335_s10 + $0x138] sm:$0xf0] }
 0x2df   : > { %v2873_v35 = vpop.f32.mrf.mxu3 }
 0x2e0   : > { %v2874_v17 = vadd.f32 %v2873_v35, %v2815_v3  ;;  %v3506_v3 = vld [vmem:[%s5335_s10 + $0x130] sm:$0xf0] }
 0x2e1   : > { %v2993_v39 = vpop.f32.mrf.mxu1  ;;  %v2816_v11 = vpop.f32.mrf.mxu2  ;;  %v3509_v44 = vor.u32 %v3853_v20, %v3506_v3 }
 0x2e2   : > { %v2933_v51 = vadd.f32 %v2932_v23, %v2874_v17  ;;  %v2817_v61 = vadd.f32 %v2816_v11, %v5928_v37  ;;  %v3859_v23 = vld [vmem:[%s5335_s10 + $0x134] sm:$0xf0] }
 0x2e3   : > { %v3513_v31 = vor.u32 %v3859_v23, %v3512_v15 }
 0x2e4   : > { %v2937_v24 = vpop.f32.mrf.mxu0  ;;  %v6016_v29 = vadd.f32 %v2991_v26, %v2933_v51  ;;  %v3854_v26 = vld [vmem:[%s5335_s10 + $0x114] sm:$0xf] }
 0x2e5   : > { %v3517_v35 = vor.u32 %v3854_v26, %v3514_v56  ;;  %v3584_v26 = vld [vmem:[%s5335_s10 + $0x1a8] sm:$0xf]  ;;  %v3878_v56 = vld [vmem:[%s5335_s10 + $0x1cc] sm:$0xf0] }
 0x2e6   : > { %3162 = vmatmul.bf16.gmra.mxu0 %v3473_v42  ;;  %3044 = vmatmul.bf16.gmra.mxu2 %v3465_v12  ;;  %v3552_v12 = vld [vmem:[%s5335_s10 + $0x160] sm:$0xf] }
 0x2e7   : > { %v2875_v54 = vpop.f32.mrf.mxu3 }
 0x2e8   : > { %v2876_v46 = vadd.f32 %v2875_v54, %v2817_v61 }
 0x2e9   : > { %v2996_v33 = vpop.f32.mrf.mxu1  ;;  %v2819_v49 = vpop.f32.mrf.mxu2 }
 0x2ea   : > { %v2935_v37 = vadd.f32 %v2934_v19, %v2876_v46  ;;  %v2820_v47 = vadd.f32 %v2819_v49, %v5933_v41  ;;  %v3863_v49 = vld [vmem:[%s5335_s10 + $0x15c] sm:$0xf] }
 0x2ec   : > { %3221 = vmatmul.bf16.gmra.mxu1 %v3477_v36  ;;  %3103 = vmatmul.bf16.gmra.mxu3 %v3469_v34  ;;  %v2939_v22 = vpop.f32.mrf.mxu0  ;;  %v6021_v38 = vadd.f32 %v2993_v39, %v2935_v37  ;;  %v3545_v36 = vor.u32 %v3868_v5, %v3544_v0  ;;  %v3554_v34 = vld [vmem:[%s5335_s10 + $0x188] sm:$0xf0] }
 0x2ef   : > { %v2878_v45 = vpop.f32.mrf.mxu3 }
 0x2f0   : > { %v2879_v43 = vadd.f32 %v2878_v45, %v2820_v47  ;;  %v3546_v47 = vld [vmem:[%s5335_s10 + $0x180] sm:$0xf0] }
 0x2f1   : > { %v2998_v7 = vpop.f32.mrf.mxu1  ;;  %v2821_v59 = vpop.f32.mrf.mxu2  ;;  %v3549_v15 = vor.u32 %v3863_v49, %v3546_v47 }
 0x2f2   : > { %v2938_v13 = vadd.f32 %v2937_v24, %v2879_v43  ;;  %v2822_v41 = vadd.f32 %v2821_v59, %v5946_v62  ;;  %v3869_v24 = vld [vmem:[%s5335_s10 + $0x184] sm:$0xf0] }
 0x2f3   : > { %v3553_v54 = vor.u32 %v3869_v24, %v3552_v12 }
 0x2f4   : > { %v2942_v28 = vpop.f32.mrf.mxu0  ;;  %v6030_v60 = vadd.f32 %v2996_v33, %v2938_v13  ;;  %v3864_v33 = vld [vmem:[%s5335_s10 + $0x164] sm:$0xf] }
 0x2f5   : > { %v3557_v45 = vor.u32 %v3864_v33, %v3554_v34  ;;  %v3624_v33 = vld [vmem:[%s5335_s10 + $0x1f8] sm:$0xf]  ;;  %v3888_v34 = vld [vmem:[%s5335_s10 + $0x21c] sm:$0xf0] }
 0x2f6   : > { %3167 = vmatmul.bf16.gmra.mxu0 %v3513_v31  ;;  %3049 = vmatmul.bf16.gmra.mxu2 %v3505_v10  ;;  %v3592_v10 = vld [vmem:[%s5335_s10 + $0x1b0] sm:$0xf] }
 0x2f7   : > { %v2880_v19 = vpop.f32.mrf.mxu3 }
 0x2f8   : > { %v2881_v17 = vadd.f32 %v2880_v19, %v2822_v41 }
 0x2f9   : > { %v3001_v39 = vpop.f32.mrf.mxu1  ;;  %v2824_v30 = vpop.f32.mrf.mxu2 }
 0x2fa   : > { %v2940_v62 = vadd.f32 %v2939_v22, %v2881_v17  ;;  %v2825_v52 = vadd.f32 %v2824_v30, %v5940_v40  ;;  %v3873_v30 = vld [vmem:[%s5335_s10 + $0x1ac] sm:$0xf] }
 0x2fc   : > { %3226 = vmatmul.bf16.gmra.mxu1 %v3517_v35  ;;  %3108 = vmatmul.bf16.gmra.mxu3 %v3509_v44  ;;  %v2944_v25 = vpop.f32.mrf.mxu0  ;;  %v6035_v51 = vadd.f32 %v2998_v7, %v2940_v62  ;;  %v3585_v35 = vor.u32 %v3878_v56, %v3584_v26  ;;  %v3594_v44 = vld [vmem:[%s5335_s10 + $0x1d8] sm:$0xf0] }
 0x2ff   : > { %v2883_v11 = vpop.f32.mrf.mxu3 }
 0x300   : > { %v2884_v42 = vadd.f32 %v2883_v11, %v2825_v52  ;;  %v3586_v52 = vld [vmem:[%s5335_s10 + $0x1d0] sm:$0xf0] }
 0x301   : > { %v3003_v61 = vpop.f32.mrf.mxu1  ;;  %v2826_v18 = vpop.f32.mrf.mxu2  ;;  %v3589_v12 = vor.u32 %v3873_v30, %v3586_v52 }
 0x302   : > { %v2943_v2 = vadd.f32 %v2942_v28, %v2884_v42  ;;  %v2827_v40 = vadd.f32 %v2826_v18, %v5911_v14  ;;  %v3879_v28 = vld [vmem:[%s5335_s10 + $0x1d4] sm:$0xf0] }
 0x303   : > { %v3593_v19 = vor.u32 %v3879_v28, %v3592_v10 }
 0x304   : > { %v2947_v46 = vpop.f32.mrf.mxu0  ;;  %v6044_v37 = vadd.f32 %v3001_v39, %v2943_v2  ;;  %v3874_v39 = vld [vmem:[%s5335_s10 + $0x1b4] sm:$0xf] }
 0x305   : > { %v3597_v11 = vor.u32 %v3874_v39, %v3594_v44  ;;  %v3664_v39 = vld [vmem:[%s5335_s10 + $0x248] sm:$0xf]  ;;  %v3898_v44 = vld [vmem:[%s5335_s10 + $0x26c] sm:$0xf0] }
 0x306   : > { %3172 = vmatmul.bf16.gmra.mxu0 %v3553_v54  ;;  %3054 = vmatmul.bf16.gmra.mxu2 %v3545_v36  ;;  %v3632_v36 = vld [vmem:[%s5335_s10 + $0x200] sm:$0xf] }
 0x307   : > { %v2885_v22 = vpop.f32.mrf.mxu3 }
 0x308   : > { %v2886_v43 = vadd.f32 %v2885_v22, %v2827_v40 }
 0x309   : > { %v3006_v7 = vpop.f32.mrf.mxu1  ;;  %v2829_v23 = vpop.f32.mrf.mxu2 }
 0x30a   : > { %v2945_v14 = vadd.f32 %v2944_v25, %v2886_v43  ;;  %v2830_v27 = vadd.f32 %v2829_v23, %v5931_v50  ;;  %v3883_v23 = vld [vmem:[%s5335_s10 + $0x1fc] sm:$0xf] }
 0x30c   : > { %3231 = vmatmul.bf16.gmra.mxu1 %v3557_v45  ;;  %3113 = vmatmul.bf16.gmra.mxu3 %v3549_v15  ;;  %v2949_v16 = vpop.f32.mrf.mxu0  ;;  %v6049_v13 = vadd.f32 %v3003_v61, %v2945_v14  ;;  %v3625_v45 = vor.u32 %v3888_v34, %v3624_v33  ;;  %v3634_v15 = vld [vmem:[%s5335_s10 + $0x228] sm:$0xf0] }
 0x30f   : > { %v2888_v59 = vpop.f32.mrf.mxu3 }
 0x310   : > { %v2889_v31 = vadd.f32 %v2888_v59, %v2830_v27  ;;  %v3626_v27 = vld [vmem:[%s5335_s10 + $0x220] sm:$0xf0] }
 0x311   : > { %v3008_v41 = vpop.f32.mrf.mxu1  ;;  %v2831_v3 = vpop.f32.mrf.mxu2  ;;  %v3629_v10 = vor.u32 %v3883_v23, %v3626_v27 }
 0x312   : > { %v2948_v20 = vadd.f32 %v2947_v46, %v2889_v31  ;;  %v2832_v50 = vadd.f32 %v2831_v3, %v5956_v1  ;;  %v3889_v46 = vld [vmem:[%s5335_s10 + $0x224] sm:$0xf0] }
 0x313   : > { %v3633_v22 = vor.u32 %v3889_v46, %v3632_v36 }
 0x314   : > { %v2952_v17 = vpop.f32.mrf.mxu0  ;;  %v6058_v62 = vadd.f32 %v3006_v7, %v2948_v20  ;;  %v3884_v7 = vld [vmem:[%s5335_s10 + $0x204] sm:$0xf] }
 0x315   : > { %v3637_v59 = vor.u32 %v3884_v7, %v3634_v15  ;;  %v3704_v7 = vld [vmem:[%s5335_s10 + $0x298] sm:$0xf]  ;;  %v3908_v15 = vld [vmem:[%s5335_s10 + $0x2bc] sm:$0xf0] }
 0x316   : > { %3177 = vmatmul.bf16.gmra.mxu0 %v3593_v19  ;;  %3059 = vmatmul.bf16.gmra.mxu2 %v3585_v35  ;;  %v3672_v35 = vld [vmem:[%s5335_s10 + $0x250] sm:$0xf] }
 0x317   : > { %v2890_v25 = vpop.f32.mrf.mxu3 }
 0x318   : > { %v2891_v42 = vadd.f32 %v2890_v25, %v2832_v50 }
 0x319   : > { %v3011_v61 = vpop.f32.mrf.mxu1  ;;  %v2834_v24 = vpop.f32.mrf.mxu2 }
 0x31a   : > { %v2950_v1 = vadd.f32 %v2949_v16, %v2891_v42  ;;  %v2835_v0 = vadd.f32 %v2834_v24, %v5926_v32  ;;  %v3893_v24 = vld [vmem:[%s5335_s10 + $0x24c] sm:$0xf] }
 0x31c   : > { %3236 = vmatmul.bf16.gmra.mxu1 %v3597_v11  ;;  %3118 = vmatmul.bf16.gmra.mxu3 %v3589_v12  ;;  %v2954_v5 = vpop.f32.mrf.mxu0  ;;  %v6063_v2 = vadd.f32 %v3008_v41, %v2950_v1  ;;  %v3665_v11 = vor.u32 %v3898_v44, %v3664_v39  ;;  %v3674_v12 = vld [vmem:[%s5335_s10 + $0x278] sm:$0xf0] }
 0x31f   : > { %v2893_v18 = vpop.f32.mrf.mxu3 }
 0x320   : > { %v2894_v54 = vadd.f32 %v2893_v18, %v2835_v0  ;;  %v3666_v0 = vld [vmem:[%s5335_s10 + $0x270] sm:$0xf0] }
 0x321   : > { %v3013_v40 = vpop.f32.mrf.mxu1  ;;  %v2836_v47 = vpop.f32.mrf.mxu2  ;;  %v3669_v36 = vor.u32 %v3893_v24, %v3666_v0 }
 0x322   : > { %v2953_v49 = vadd.f32 %v2952_v17, %v2894_v54  ;;  %v2837_v32 = vadd.f32 %v2836_v47, %v5942_v9  ;;  %v3899_v17 = vld [vmem:[%s5335_s10 + $0x274] sm:$0xf0] }
 0x323   : > { %v3673_v25 = vor.u32 %v3899_v17, %v3672_v35 }
 0x324   : > { %v2957_v43 = vpop.f32.mrf.mxu0  ;;  %v6072_v14 = vadd.f32 %v3011_v61, %v2953_v49  ;;  %v3894_v61 = vld [vmem:[%s5335_s10 + $0x254] sm:$0xf] }
 0x325   : > { %v3677_v18 = vor.u32 %v3894_v61, %v3674_v12  ;;  %v3744_v61 = vld [vmem:[%s5335_s10 + $0x2e8] sm:$0xf]  ;;  %v3918_v12 = vld [vmem:[%s5335_s10 + $0x30c] sm:$0xf0] }
 0x326   : > { %3182 = vmatmul.bf16.gmra.mxu0 %v3633_v22  ;;  %3064 = vmatmul.bf16.gmra.mxu2 %v3625_v45  ;;  %v3712_v45 = vld [vmem:[%s5335_s10 + $0x2a0] sm:$0xf] }
 0x327   : > { %v2895_v16 = vpop.f32.mrf.mxu3 }
 0x328   : > { %v2896_v31 = vadd.f32 %v2895_v16, %v2837_v32 }
 0x329   : > { %v3016_v41 = vpop.f32.mrf.mxu1  ;;  %v2839_v28 = vpop.f32.mrf.mxu2 }
 0x32a   : > { %v2955_v9 = vadd.f32 %v2954_v5, %v2896_v31  ;;  %v2840_v26 = vadd.f32 %v2839_v28, %v5963_v6  ;;  %v3903_v28 = vld [vmem:[%s5335_s10 + $0x29c] sm:$0xf] }
 0x32c   : > { %3241 = vmatmul.bf16.gmra.mxu1 %v3637_v59  ;;  %3123 = vmatmul.bf16.gmra.mxu3 %v3629_v10  ;;  %v2959_v56 = vpop.f32.mrf.mxu0  ;;  %v6077_v20 = vadd.f32 %v3013_v40, %v2955_v9  ;;  %v3705_v59 = vor.u32 %v3908_v15, %v3704_v7  ;;  %v3714_v10 = vld [vmem:[%s5335_s10 + $0x2c8] sm:$0xf0] }
 0x32f   : > { %v2898_v3 = vpop.f32.mrf.mxu3 }
 0x330   : > { %v2899_v19 = vadd.f32 %v2898_v3, %v2840_v26  ;;  %v3706_v26 = vld [vmem:[%s5335_s10 + $0x2c0] sm:$0xf0] }
 0x331   : > { %v3018_v50 = vpop.f32.mrf.mxu1  ;;  %v2841_v52 = vpop.f32.mrf.mxu2  ;;  %v3709_v35 = vor.u32 %v3903_v28, %v3706_v26 }
 0x332   : > { %v2958_v30 = vadd.f32 %v2957_v43, %v2899_v19  ;;  %v2842_v6 = vadd.f32 %v2841_v52, %v5937_v57  ;;  %v3909_v43 = vld [vmem:[%s5335_s10 + $0x2c4] sm:$0xf0] }
 0x333   : > { %v3713_v16 = vor.u32 %v3909_v43, %v3712_v45 }
 0x334   : > { %v2962_v42 = vpop.f32.mrf.mxu0  ;;  %v6086_v1 = vadd.f32 %v3016_v41, %v2958_v30  ;;  %v3904_v41 = vld [vmem:[%s5335_s10 + $0x2a4] sm:$0xf] }
 0x335   : > { %v3717_v3 = vor.u32 %v3904_v41, %v3714_v10 }
 0x336   : > { %3187 = vmatmul.bf16.gmra.mxu0 %v3673_v25  ;;  %3069 = vmatmul.bf16.gmra.mxu2 %v3665_v11  ;;  %v3752_v11 = vld [vmem:[%s5335_s10 + $0x2f0] sm:$0xf] }
 0x337   : > { %v2900_v5 = vpop.f32.mrf.mxu3 }
 0x338   : > { %v2901_v54 = vadd.f32 %v2900_v5, %v2842_v6 }
 0x339   : > { %v3021_v40 = vpop.f32.mrf.mxu1  ;;  %v2844_v46 = vpop.f32.mrf.mxu2 }
 0x33a   : > { %v2960_v57 = vadd.f32 %v2959_v56, %v2901_v54  ;;  %v2845_v33 = vadd.f32 %v2844_v46, %v5958_v58  ;;  %v3746_v46 = vld [vmem:[%s5335_s10 + $0x310] sm:$0xf0] }
 0x33c   : > { %3246 = vmatmul.bf16.gmra.mxu1 %v3677_v18  ;;  %3128 = vmatmul.bf16.gmra.mxu3 %v3669_v36  ;;  %v2964_v34 = vpop.f32.mrf.mxu0  ;;  %v6091_v49 = vadd.f32 %v3018_v50, %v2960_v57  ;;  %v3745_v18 = vor.u32 %v3918_v12, %v3744_v61  ;;  %v3754_v36 = vld [vmem:[%s5335_s10 + $0x318] sm:$0xf0]  ;;  %v3913_v57 = vld [vmem:[%s5335_s10 + $0x2ec] sm:$0xf] }
 0x33d   : > { %v3749_v45 = vor.u32 %v3913_v57, %v3746_v46 }
 0x33f   : > { %v2903_v47 = vpop.f32.mrf.mxu3 }
 0x340   : > { %v2904_v22 = vadd.f32 %v2903_v47, %v2845_v33 }
 0x341   : > { %v3023_v32 = vpop.f32.mrf.mxu1  ;;  %v2846_v27 = vpop.f32.mrf.mxu2 }
 0x342   : > { %v2963_v23 = vadd.f32 %v2962_v42, %v2904_v22  ;;  %v2847_v58 = vadd.f32 %v2846_v27, %v5976_v8  ;;  %v3919_v42 = vld [vmem:[%s5335_s10 + $0x314] sm:$0xf0] }
 0x344   : > { %v3153_v31 = vpop.f32.mrf.mxu0  ;;  %v6100_v9 = vadd.f32 %v3021_v40, %v2963_v23  ;;  %v3914_v40 = vld [vmem:[%s5335_s10 + $0x2f4] sm:$0xf] }
 0x345   : > { %v3757_v47 = vor.u32 %v3914_v40, %v3754_v36 }
 0x346   : > { %3192 = vmatmul.bf16.gmra.mxu0 %v3713_v16  ;;  %3074 = vmatmul.bf16.gmra.mxu2 %v3705_v59 }
 0x347   : > { %v2905_v56 = vpop.f32.mrf.mxu3 }
 0x348   : > { %v2906_v19 = vadd.f32 %v2905_v56, %v2847_v58 }
 0x349   : > { %v3212_v50 = vpop.f32.mrf.mxu1  ;;  %v3035_v17 = vpop.f32.mrf.mxu2 }
 0x34a   : > { %v2965_v8 = vadd.f32 %v2964_v34, %v2906_v19  ;;  %v3036_v30 = vadd.f32 %v3035_v17, %v5972_v55  ;;  %v3753_v55 = vor.u32 %v3919_v42, %v3752_v11 }
 0x34c   : > { %3251 = vmatmul.bf16.gmra.mxu1 %v3717_v3  ;;  %3133 = vmatmul.bf16.gmra.mxu3 %v3709_v35  ;;  %v3155_v39 = vpop.f32.mrf.mxu0  ;;  %v6104_v44 = vadd.f32 %v3023_v32, %v2965_v8 }
 0x34f   : > { %v3094_v52 = vpop.f32.mrf.mxu3 }
 0x350   : > { %v3095_v25 = vadd.f32 %v3094_v52, %v3036_v30 }
 0x351   : > { %v3214_v6 = vpop.f32.mrf.mxu1  ;;  %v3037_v0 = vpop.f32.mrf.mxu2 }
 0x352   : > { %v3154_v24 = vadd.f32 %v3153_v31, %v3095_v25  ;;  %v3038_v33 = vadd.f32 %v3037_v0, %v5979_v21 }
 0x354   : > { %v3213_v5 = vadd.f32 %v3212_v50, %v3154_v24  ;;  %v3158_v54 = vpop.f32.mrf.mxu0 }
 0x356   : > { %3262 = vst [vmem:[%s6116_s24] sm:$0xff] %v3213_v5  ;;  %3197 = vmatmul.bf16.gmra.mxu0 %v3753_v55  ;;  %3079 = vmatmul.bf16.gmra.mxu2 %v3745_v18 }
 0x357   : > { %v3096_v34 = vpop.f32.mrf.mxu3 }
 0x358   : > { %v3097_v22 = vadd.f32 %v3096_v34, %v3038_v33 }
 0x359   : > { %v3217_v32 = vpop.f32.mrf.mxu1  ;;  %v3040_v7 = vpop.f32.mrf.mxu2 }
 0x35a   : > { %v3156_v43 = vadd.f32 %v3155_v39, %v3097_v22  ;;  %v3041_v27 = vadd.f32 %v3040_v7, %v5988_v4 }
 0x35c   : > { %3256 = vmatmul.bf16.gmra.mxu1 %v3757_v47  ;;  %v3215_v15 = vadd.f32 %v3214_v6, %v3156_v43  ;;  %3138 = vmatmul.bf16.gmra.mxu3 %v3749_v45  ;;  %v3160_v23 = vpop.f32.mrf.mxu0 }
 0x35e   : > { %3263 = vst [vmem:[%s6116_s24 + $0x8] sm:$0xff] %v3215_v15 }
 0x35f   : > { %v3099_v16 = vpop.f32.mrf.mxu3 }
 0x360   : > { %v3100_v21 = vadd.f32 %v3099_v16, %v3041_v27 }
 0x361   : > { %v3219_v58 = vpop.f32.mrf.mxu1  ;;  %v3042_v31 = vpop.f32.mrf.mxu2 }
 0x362   : > { %v3159_v59 = vadd.f32 %v3158_v54, %v3100_v21  ;;  %v3043_v28 = vadd.f32 %v3042_v31, %v5993_v63 }
 0x364   : > { %v3218_v41 = vadd.f32 %v3217_v32, %v3159_v59  ;;  %v3163_v10 = vpop.f32.mrf.mxu0 }
 0x366   : > { %3264 = vst [vmem:[%s6116_s24 + $0x10] sm:$0xff] %v3218_v41 }
 0x367   : > { %v3101_v26 = vpop.f32.mrf.mxu3 }
 0x368   : > { %v3102_v56 = vadd.f32 %v3101_v26, %v3043_v28 }
 0x369   : > { %v3222_v3 = vpop.f32.mrf.mxu1  ;;  %v3045_v50 = vpop.f32.mrf.mxu2 }
 0x36a   : > { %v3161_v19 = vadd.f32 %v3160_v23, %v3102_v56  ;;  %v3046_v4 = vadd.f32 %v3045_v50, %v6002_v53 }
 0x36c   : > { %v3220_v35 = vadd.f32 %v3219_v58, %v3161_v19  ;;  %v3165_v8 = vpop.f32.mrf.mxu0 }
 0x36e   : > { %3265 = vst [vmem:[%s6116_s24 + $0x18] sm:$0xff] %v3220_v35 }
 0x36f   : > { %v3104_v17 = vpop.f32.mrf.mxu3 }
 0x370   : > { %v3105_v39 = vadd.f32 %v3104_v17, %v3046_v4 }
 0x371   : > { %v3224_v30 = vpop.f32.mrf.mxu1  ;;  %v3047_v25 = vpop.f32.mrf.mxu2 }
 0x372   : > { %v3164_v52 = vadd.f32 %v3163_v10, %v3105_v39  ;;  %v3048_v63 = vadd.f32 %v3047_v25, %v6007_v48 }
 0x374   : > { %v3223_v6 = vadd.f32 %v3222_v3, %v3164_v52  ;;  %v3168_v11 = vpop.f32.mrf.mxu0 }
 0x376   : > { %3266 = vst [vmem:[%s6116_s24 + $0x20] sm:$0xff] %v3223_v6 }
 0x377   : > { %v3106_v42 = vpop.f32.mrf.mxu3 }
 0x378   : > { %v3107_v61 = vadd.f32 %v3106_v42, %v3048_v63 }
 0x379   : > { %v3227_v12 = vpop.f32.mrf.mxu1  ;;  %v3050_v0 = vpop.f32.mrf.mxu2 }
 0x37a   : > { %v3166_v24 = vadd.f32 %v3165_v8, %v3107_v61  ;;  %v3051_v53 = vadd.f32 %v3050_v0, %v6016_v29 }
 0x37c   : > { %v3225_v55 = vadd.f32 %v3224_v30, %v3166_v24  ;;  %v3170_v5 = vpop.f32.mrf.mxu0 }
 0x37e   : > { %3267 = vst [vmem:[%s6116_s24 + $0x28] sm:$0xff] %v3225_v55 }
 0x37f   : > { %v3109_v18 = vpop.f32.mrf.mxu3 }
 0x380   : > { %v3110_v54 = vadd.f32 %v3109_v18, %v3051_v53 }
 0x381   : > { %v3229_v40 = vpop.f32.mrf.mxu1  ;;  %v3052_v57 = vpop.f32.mrf.mxu2 }
 0x382   : > { %v3169_v36 = vadd.f32 %v3168_v11, %v3110_v54  ;;  %v3053_v48 = vadd.f32 %v3052_v57, %v6021_v38 }
 0x384   : > { %v3228_v46 = vadd.f32 %v3227_v12, %v3169_v36  ;;  %v3173_v33 = vpop.f32.mrf.mxu0 }
 0x386   : > { %3268 = vst [vmem:[%s6116_s24 + $0x30] sm:$0xff] %v3228_v46 }
 0x387   : > { %v3111_v34 = vpop.f32.mrf.mxu3 }
 0x388   : > { %v3112_v47 = vadd.f32 %v3111_v34, %v3053_v48 }
 0x389   : > { %v3232_v22 = vpop.f32.mrf.mxu1  ;;  %v3055_v45 = vpop.f32.mrf.mxu2 }
 0x38a   : > { %v3171_v32 = vadd.f32 %v3170_v5, %v3112_v47  ;;  %v3056_v29 = vadd.f32 %v3055_v45, %v6030_v60 }
 0x38c   : > { %v3230_v43 = vadd.f32 %v3229_v40, %v3171_v32  ;;  %v3175_v7 = vpop.f32.mrf.mxu0 }
 0x38e   : > { %3269 = vst [vmem:[%s6116_s24 + $0x38] sm:$0xff] %v3230_v43 }
 0x38f   : > { %v3114_v15 = vpop.f32.mrf.mxu3 }
 0x390   : > { %v3115_v23 = vadd.f32 %v3114_v15, %v3056_v29 }
 0x391   : > { %v3234_v27 = vpop.f32.mrf.mxu1  ;;  %v3057_v21 = vpop.f32.mrf.mxu2 }
 0x392   : > { %v3174_v16 = vadd.f32 %v3173_v33, %v3115_v23  ;;  %v3058_v38 = vadd.f32 %v3057_v21, %v6035_v51 }
 0x394   : > { %v3233_v58 = vadd.f32 %v3232_v22, %v3174_v16  ;;  %v3178_v59 = vpop.f32.mrf.mxu0 }
 0x396   : > { %3270 = vst [vmem:[%s6116_s24 + $0x40] sm:$0xff] %v3233_v58 }
 0x397   : > { %v3116_v31 = vpop.f32.mrf.mxu3 }
 0x398   : > { %v3117_v41 = vadd.f32 %v3116_v31, %v3058_v38 }
 0x399   : > { %v3237_v10 = vpop.f32.mrf.mxu1  ;;  %v3060_v26 = vpop.f32.mrf.mxu2 }
 0x39a   : > { %v3176_v28 = vadd.f32 %v3175_v7, %v3117_v41  ;;  %v3061_v60 = vadd.f32 %v3060_v26, %v6044_v37 }
 0x39c   : > { %v3235_v56 = vadd.f32 %v3234_v27, %v3176_v28  ;;  %v3180_v3 = vpop.f32.mrf.mxu0 }
 0x39e   : > { %3271 = vst [vmem:[%s6116_s24 + $0x48] sm:$0xff] %v3235_v56 }
 0x39f   : > { %v3119_v19 = vpop.f32.mrf.mxu3 }
 0x3a0   : > { %v3120_v50 = vadd.f32 %v3119_v19, %v3061_v60 }
 0x3a1   : > { %v3239_v35 = vpop.f32.mrf.mxu1  ;;  %v3062_v4 = vpop.f32.mrf.mxu2 }
 0x3a2   : > { %v3179_v8 = vadd.f32 %v3178_v59, %v3120_v50  ;;  %v3063_v51 = vadd.f32 %v3062_v4, %v6049_v13 }
 0x3a4   : > { %v3238_v17 = vadd.f32 %v3237_v10, %v3179_v8  ;;  %v3183_v39 = vpop.f32.mrf.mxu0 }
 0x3a6   : > { %3272 = vst [vmem:[%s6116_s24 + $0x50] sm:$0xff] %v3238_v17 }
 0x3a7   : > { %v3121_v30 = vpop.f32.mrf.mxu3 }
 0x3a8   : > { %v3122_v52 = vadd.f32 %v3121_v30, %v3063_v51 }
 0x3a9   : > { %v3242_v25 = vpop.f32.mrf.mxu1  ;;  %v3065_v11 = vpop.f32.mrf.mxu2 }
 0x3aa   : > { %v3181_v6 = vadd.f32 %v3180_v3, %v3122_v52  ;;  %v3066_v37 = vadd.f32 %v3065_v11, %v6058_v62 }
 0x3ac   : > { %v3240_v63 = vadd.f32 %v3239_v35, %v3181_v6  ;;  %v3185_v42 = vpop.f32.mrf.mxu0 }
 0x3ae   : > { %3273 = vst [vmem:[%s6116_s24 + $0x58] sm:$0xff] %v3240_v63 }
 0x3af   : > { %v3124_v61 = vpop.f32.mrf.mxu3 }
 0x3b0   : > { %v3125_v12 = vadd.f32 %v3124_v61, %v3066_v37 }
 0x3b1   : > { %v3244_v24 = vpop.f32.mrf.mxu1  ;;  %v3067_v55 = vpop.f32.mrf.mxu2 }
 0x3b2   : > { %v3184_v0 = vadd.f32 %v3183_v39, %v3125_v12  ;;  %v3068_v13 = vadd.f32 %v3067_v55, %v6063_v2 }
 0x3b4   : > { %v3243_v5 = vadd.f32 %v3242_v25, %v3184_v0  ;;  %v3188_v18 = vpop.f32.mrf.mxu0 }
 0x3b6   : > { %3274 = vst [vmem:[%s6116_s24 + $0x60] sm:$0xff] %v3243_v5 }
 0x3b7   : > { %v3126_v53 = vpop.f32.mrf.mxu3 }
 0x3b8   : > { %v3127_v54 = vadd.f32 %v3126_v53, %v3068_v13 }
 0x3b9   : > { %v3247_v40 = vpop.f32.mrf.mxu1  ;;  %v3070_v57 = vpop.f32.mrf.mxu2 }
 0x3ba   : > { %v3186_v36 = vadd.f32 %v3185_v42, %v3127_v54  ;;  %v3071_v62 = vadd.f32 %v3070_v57, %v6072_v14 }
 0x3bc   : > { %v3245_v46 = vadd.f32 %v3244_v24, %v3186_v36  ;;  %v3190_v34 = vpop.f32.mrf.mxu0 }
 0x3be   : > { %3275 = vst [vmem:[%s6116_s24 + $0x68] sm:$0xff] %v3245_v46 }
 0x3bf   : > { %v3129_v33 = vpop.f32.mrf.mxu3 }
 0x3c0   : > { %v3130_v48 = vadd.f32 %v3129_v33, %v3071_v62 }
 0x3c1   : > { %v3072_v22 = vpop.f32.mrf.mxu2  ;;  %v3249_v32 = vpop.f32.mrf.mxu1 }
 0x3c2   : > { %v3189_v47 = vadd.f32 %v3188_v18, %v3130_v48  ;;  %v3073_v2 = vadd.f32 %v3072_v22, %v6077_v20 }
 0x3c4   : > { %v3248_v45 = vadd.f32 %v3247_v40, %v3189_v47  ;;  %v3193_v15 = vpop.f32.mrf.mxu0 }
 0x3c6   : > { %3276 = vst [vmem:[%s6116_s24 + $0x70] sm:$0xff] %v3248_v45 }
 0x3c7   : > { %v3131_v43 = vpop.f32.mrf.mxu3 }
 0x3c8   : > { %v3132_v7 = vadd.f32 %v3131_v43, %v3073_v2 }
 0x3c9   : > { %v3075_v23 = vpop.f32.mrf.mxu2  ;;  %v3252_v16 = vpop.f32.mrf.mxu1 }
 0x3ca   : > { %v3191_v29 = vadd.f32 %v3190_v34, %v3132_v7  ;;  %v3076_v14 = vadd.f32 %v3075_v23, %v6086_v1 }
 0x3cc   : > { %v3250_v27 = vadd.f32 %v3249_v32, %v3191_v29  ;;  %v3195_v41 = vpop.f32.mrf.mxu0 }
 0x3ce   : > { %3277 = vst [vmem:[%s6116_s24 + $0x78] sm:$0xff] %v3250_v27 }
 0x3cf   : > { %v3134_v21 = vpop.f32.mrf.mxu3 }
 0x3d0   : > { %v3135_v58 = vadd.f32 %v3134_v21, %v3076_v14 }
 0x3d1   : > { %v3077_v38 = vpop.f32.mrf.mxu2  ;;  %v3254_v10 = vpop.f32.mrf.mxu1 }
 0x3d2   : > { %v3194_v59 = vadd.f32 %v3193_v15, %v3135_v58  ;;  %v3078_v20 = vadd.f32 %v3077_v38, %v6091_v49 }
 0x3d4   : > { %v3253_v31 = vadd.f32 %v3252_v16, %v3194_v59  ;;  %v3198_v1 = vpop.f32.mrf.mxu0 }
 0x3d6   : > { %3278 = vst [vmem:[%s6116_s24 + $0x80] sm:$0xff] %v3253_v31 }
 0x3d7   : > { %v3136_v28 = vpop.f32.mrf.mxu3 }
 0x3d8   : > { %v3137_v26 = vadd.f32 %v3136_v28, %v3078_v20 }
 0x3d9   : > { %v3080_v3 = vpop.f32.mrf.mxu2  ;;  %v3257_v8 = vpop.f32.mrf.mxu1 }
 0x3da   : > { %v3196_v56 = vadd.f32 %v3195_v41, %v3137_v26  ;;  %v3081_v19 = vadd.f32 %v3080_v3, %v6100_v9 }
 0x3dc   : > { %v3255_v60 = vadd.f32 %v3254_v10, %v3196_v56  ;;  %v3200_v52 = vpop.f32.mrf.mxu0 }
 0x3de   : > { %3279 = vst [vmem:[%s6116_s24 + $0x88] sm:$0xff] %v3255_v60 }
 0x3df   : > { %v3139_v50 = vpop.f32.mrf.mxu3 }
 0x3e0   : > { %v3140_v35 = vadd.f32 %v3139_v50, %v3081_v19 }
 0x3e1   : > { %v3082_v17 = vpop.f32.mrf.mxu2  ;;  %v3259_v6 = vpop.f32.mrf.mxu1 }
 0x3e2   : > { %v3199_v4 = vadd.f32 %v3198_v1, %v3140_v35  ;;  %v3083_v49 = vadd.f32 %v3082_v17, %v6104_v44 }
 0x3e4   : > { %v3258_v39 = vadd.f32 %v3257_v8, %v3199_v4 }
 0x3e6   : > { %3280 = vst [vmem:[%s6116_s24 + $0x90] sm:$0xff] %v3258_v39 }
 0x3e7   : > { %v3141_v51 = vpop.f32.mrf.mxu3 }
 0x3e8   : > { %v3142_v30 = vadd.f32 %v3141_v51, %v3083_v49 }
 0x3ea   : > { %v3201_v25 = vadd.f32 %v3200_v52, %v3142_v30 }
 0x3ec   : > { %v3260_v11 = vadd.f32 %v3259_v6, %v3201_v25 }
 0x3ee   : > { %3281 = vst [vmem:[%s6116_s24 + $0x98] sm:$0xff] %v3260_v11 }
 0x3ef PF: > { %s18_s27 = sadd.s32 1, %s4082_s27  }
 0x3f0   : > { %p15_p4 = scmp.ge.s32.totalorder %s18_s27, 4  }
 0x3f2   :  { %17 = sbr.rel (!%p15_p4) target bundleno = 1 (0x1), region = 85 }

</bundles_post_ra>
